<compile_context>
chip_gen: v7x
topology: tpu7x:2x2x1
jax: 0.10.0
libtpu: 0.0.40
codegen_flags: <defaults>
</compile_context>

<pallas_src>
import functools

import jax
import jax.numpy as jnp
from jax import lax
from jax.experimental import pallas as pl
from jax.experimental.pallas import tpu as pltpu


# ----------------------------------------------------------------------------
# Weight preprocessing (wrapper side, done once, plain XLA)
# ----------------------------------------------------------------------------
def _conv5x5_matrix(w):
    """PyTorch Conv2d weight (Cout, Cin, 5, 5) -> im2col matrix (25*Cin, Cout).

    Row ordering is (ky, kx, ci), matching the in-kernel im2col column order."""
    cout = w.shape[0]
    return jnp.transpose(w, (2, 3, 1, 0)).reshape(-1, cout)


def _convt_phase_matrix(w_t):
    """PyTorch ConvTranspose2d(k=4, s=2, p=1) weight (Cin, Cout, 4, 4) ->
    phase-combined matrix (9*Cin, 4*Cout).

    With x_pad the 1-padded input, the transposed conv output is
      y[2p+r, 2q+s, co] = sum_{dy,dx in {0,1}} x_pad[p+r+dy, q+s+dx, ci]
                          * w_t[ci, co, 3-r-2*dy, 3-s-2*dx]
    Rows are ordered by the shared 3x3 tap (u, v) = (r+dy, s+dx) then ci;
    columns by phase (2r+s) then co, so one matmul yields all four phases."""
    cin, cout = w_t.shape[0], w_t.shape[1]
    m = jnp.zeros((3, 3, cin, 2, 2, cout), jnp.float32)
    for r in range(2):
        for s in range(2):
            for dy in range(2):
                for dx in range(2):
                    u, v = r + dy, s + dx
                    ky, kx = 3 - r - 2 * dy, 3 - s - 2 * dx
                    m = m.at[u, v, :, r, s, :].set(w_t[:, :, ky, kx])
    return m.reshape(9 * cin, 4 * cout)


# ----------------------------------------------------------------------------
# Fused per-(batch, timestep) kernel
# ----------------------------------------------------------------------------
def _make_fused_kernel(zh, Cz, CL, CE, Cim):
    S1 = zh * zh          # pixels at the LSTM / decoder resolution
    C1 = 2 * CE           # channels after the first transposed conv
    bf16 = jnp.bfloat16

    def _im2col(col_ref, pad_ref, k, Ho, Wo, Cin):
        # Scatter the k*k taps of the padded input into the im2col scratch
        # (columns ordered (ky, kx, ci) to match the weight matrices) and return
        # a (Ho*Wo, k*k*Cin) bf16 matmul operand.
        for ky in range(k):
            for kx in range(k):
                j = ky * k + kx
                col_ref[:, :, j * Cin:(j + 1) * Cin] = (
                    pad_ref[ky:ky + Ho, kx:kx + Wo, :])
        return col_ref[...].reshape(Ho * Wo, k * k * Cin).astype(bf16)

    def kernel(inp_ref, wgx_ref, wgh_ref, brnn_ref, wdec_ref, bdec_ref,
               wct1_ref, bct1_ref, wct2_ref, bct2_ref,            # inputs
               canvas_ref,                                         # output (revisited)
               gx_ref, icol_ref, imh_ref, c_ref, hpad_ref,         # scratch
               x1pad_ref, c1col_ref, xph_ref, c2col_ref):
        t = pl.program_id(1)

        # ---- t == 0: reset carried state, cache the time-invariant gate part --
        @pl.when(t == 0)
        def _init():
            c_ref[...] = jnp.zeros_like(c_ref)
            imh_ref[...] = jnp.zeros_like(imh_ref)        # h_{-1} = 0
            canvas_ref[...] = jnp.zeros_like(canvas_ref)
            hpad_ref[...] = jnp.zeros_like(hpad_ref)      # zero-padding borders
            x1pad_ref[...] = jnp.zeros_like(x1pad_ref)
            xph_ref[...] = jnp.zeros_like(xph_ref)
            # Input contribution to the ConvLSTM gates (+ bias), hoisted out of
            # the time loop: 5x5 conv over cat([z, emb_query]) channels.
            icol = _im2col(icol_ref, inp_ref, 5, zh, zh, Cz)
            gx_ref[...] = (jnp.dot(icol, wgx_ref[...],
                                   preferred_element_type=jnp.float32)
                           + brnn_ref[...])

        # ---- ConvLSTM cell (gate conv epilogue fused, no HBM gates tensor) ----
        imh_prev = imh_ref[...].reshape(S1, 25 * CL).astype(bf16)
        gates = gx_ref[...] + jnp.dot(imh_prev, wgh_ref[...],
                                      preferred_element_type=jnp.float32)
        i_g = jax.nn.sigmoid(gates[:, 0 * CL:1 * CL])
        f_g = jax.nn.sigmoid(gates[:, 1 * CL:2 * CL])
        o_g = jax.nn.sigmoid(gates[:, 2 * CL:3 * CL])
        g_g = jnp.tanh(gates[:, 3 * CL:4 * CL])
        c_new = f_g * c_ref[...] + i_g * g_g
        h_new = o_g * jnp.tanh(c_new)                      # (S1, CL)
        c_ref[...] = c_new

        # Refresh the 5x5 im2col of the (2-padded) new hidden state: reused by
        # the decoder conv below AND by the gate conv of the next step.
        hpad_ref[2:2 + zh, 2:2 + zh, :] = h_new.reshape(zh, zh, CL)
        imh_new = _im2col(imh_ref, hpad_ref, 5, zh, zh, CL)

        # ---- decoder.decode: 5x5 conv + ReLU ----------------------------------
        x1 = jnp.maximum(
            jnp.dot(imh_new, wdec_ref[...], preferred_element_type=jnp.float32)
            + bdec_ref[...], 0.0)                          # (S1, CE)

        # ---- decoder.convt: ConvTranspose2d(4, s=2, p=1) + ReLU ---------------
        # One matmul produces all four output phases (columns (2r+s)*C1 + c);
        # the result is kept in phase form (never spatially interleaved).
        x1pad_ref[1:1 + zh, 1:1 + zh, :] = x1.reshape(zh, zh, CE)
        col1 = _im2col(c1col_ref, x1pad_ref, 3, zh, zh, CE)
        y1 = jnp.maximum(
            jnp.dot(col1, wct1_ref[...], preferred_element_type=jnp.float32)
            + bct1_ref[...], 0.0)                          # (S1, 4*C1)
        for r in range(2):
            for s in range(2):
                ph = 2 * r + s
                xph_ref[r, s, 1:1 + zh, 1:1 + zh, :] = (
                    y1[:, ph * C1:(ph + 1) * C1].reshape(zh, zh, C1))

        # ---- decoder.convt2: ConvTranspose2d(4, s=2, p=1), no activation ------
        # Consumes the phase-form xx2 directly ("phase space"): output block
        # (a, b), phase (r2, s2) covers final pixels (4p + 2a + r2, 4q + 2b + s2).
        for a in range(2):
            for b in range(2):
                for u in range(3):
                    ay = a + u - 1
                    py, oy = ay % 2, ay // 2
                    for v in range(3):
                        bx = b + v - 1
                        px, ox = bx % 2, bx // 2
                        j = u * 3 + v
                        c2col_ref[:, :, j * C1:(j + 1) * C1] = xph_ref[
                            py, px, 1 + oy:1 + oy + zh, 1 + ox:1 + ox + zh, :]
                y2 = (jnp.dot(c2col_ref[...].reshape(S1, 9 * C1).astype(bf16),
                              wct2_ref[...],
                              preferred_element_type=jnp.float32)
                      + bct2_ref[...])                     # (S1, 4*Cim)
                blk = 2 * a + b
                canvas_ref[blk * S1:(blk + 1) * S1, :] = (
                    canvas_ref[blk * S1:(blk + 1) * S1, :] + y2)

    return kernel


# ----------------------------------------------------------------------------
# Renderer forward (use_canvas_in_prior=False path)
# ----------------------------------------------------------------------------
def renderer_forward(z, emb_query, params, *, nc_lstm, nc_enc, im_channels,
                     num_steps):
    """z: (N, nz, zh, zh), emb_query: (N, nc_query, zh, zh) (NCHW, as in PyTorch).
    Returns mean_recon: (N, im_channels, 4*zh, 4*zh) (NCHW)."""
    N, nz, zh, _ = z.shape
    nc_query = emb_query.shape[1]
    Cz, CL, CE, Cim = nz + nc_query, nc_lstm, nc_enc, im_channels
    C1 = 2 * CE
    S1 = zh * zh
    assert params["rnn_w"].shape == (4 * CL, Cz + CL, 5, 5)

    # -- hoisted, time-invariant preprocessing (runs once, outside the loop) ----
    inp = jnp.concatenate([jnp.transpose(z, (0, 2, 3, 1)),
                           jnp.transpose(emb_query, (0, 2, 3, 1))],
                          axis=-1).astype(jnp.float32)               # NHWC
    inp_pad = jnp.pad(inp, ((0, 0), (2, 2), (2, 2), (0, 0)))         # pad for 5x5

    bf16 = jnp.bfloat16
    wgx = _conv5x5_matrix(params["rnn_w"][:, :Cz]).astype(bf16)       # (25*Cz, 4CL)
    wgh = _conv5x5_matrix(params["rnn_w"][:, Cz:]).astype(bf16)       # (25*CL, 4CL)
    wdec = _conv5x5_matrix(params["dec_w"]).astype(bf16)              # (25*CL, CE)
    wct1 = _convt_phase_matrix(params["ct1_w"]).astype(bf16)          # (9*CE, 4*C1)
    wct2 = _convt_phase_matrix(params["ct2_w"]).astype(bf16)          # (9*C1, 4*Cim)
    brnn = params["rnn_b"].reshape(1, 4 * CL).astype(jnp.float32)
    bdec = params["dec_b"].reshape(1, CE).astype(jnp.float32)
    bct1 = jnp.tile(params["ct1_b"], 4).reshape(1, 4 * C1).astype(jnp.float32)
    bct2 = jnp.tile(params["ct2_b"], 4).reshape(1, 4 * Cim).astype(jnp.float32)

    kernel = _make_fused_kernel(zh, Cz, CL, CE, Cim)
    grid_spec = pltpu.PrefetchScalarGridSpec(
        num_scalar_prefetch=0,
        grid=(N, num_steps),                 # batch parallel, time carried
        in_specs=[
            pl.BlockSpec((None, zh + 4, zh + 4, Cz), lambda n, t: (n, 0, 0, 0)),
            pl.BlockSpec((25 * Cz, 4 * CL), lambda n, t: (0, 0)),
            pl.BlockSpec((25 * CL, 4 * CL), lambda n, t: (0, 0)),
            pl.BlockSpec((1, 4 * CL), lambda n, t: (0, 0)),
            pl.BlockSpec((25 * CL, CE), lambda n, t: (0, 0)),
            pl.BlockSpec((1, CE), lambda n, t: (0, 0)),
            pl.BlockSpec((9 * CE, 4 * C1), lambda n, t: (0, 0)),
            pl.BlockSpec((1, 4 * C1), lambda n, t: (0, 0)),
            pl.BlockSpec((9 * C1, 4 * Cim), lambda n, t: (0, 0)),
            pl.BlockSpec((1, 4 * Cim), lambda n, t: (0, 0)),
        ],
        out_specs=pl.BlockSpec((None, 4 * S1, 4 * Cim), lambda n, t: (n, 0, 0)),
        scratch_shapes=[
            pltpu.VMEM((S1, 4 * CL), jnp.float32),                # gx (input gates)
            pltpu.VMEM((zh, zh, 25 * Cz), jnp.float32),           # icol = im2col(inp)
            pltpu.VMEM((zh, zh, 25 * CL), jnp.float32),           # imh  = im2col(h)
            pltpu.VMEM((S1, CL), jnp.float32),                    # c (cell state)
            pltpu.VMEM((zh + 4, zh + 4, CL), jnp.float32),        # hpad
            pltpu.VMEM((zh + 2, zh + 2, CE), jnp.float32),        # x1pad
            pltpu.VMEM((zh, zh, 9 * CE), jnp.float32),            # c1col
            pltpu.VMEM((2, 2, zh + 2, zh + 2, C1), jnp.float32),  # convt1 phases
            pltpu.VMEM((zh, zh, 9 * C1), jnp.float32),            # c2col
        ],
    )
    canvas = pl.pallas_call(
        kernel,
        out_shape=jax.ShapeDtypeStruct((N, 4 * S1, 4 * Cim), jnp.float32),
        grid_spec=grid_spec,
        compiler_params=pltpu.CompilerParams(
            dimension_semantics=("parallel", "arbitrary")),
    )(inp_pad, wgx, wgh, brnn, wdec, bdec, wct1, bct1, wct2, bct2)

    # Un-permute the block/phase-major canvas back to NCHW (free XLA reshape).
    out = canvas.reshape(N, 2, 2, zh, zh, 2, 2, Cim)    # [n, a, b, p, q, r, s, c]
    out = out.transpose(0, 7, 3, 1, 5, 4, 2, 6)         # [n, c, p, a, r, q, b, s]
    return out.reshape(N, Cim, 4 * zh, 4 * zh)


# ----------------------------------------------------------------------------
# Parameters (deterministic synthetic init, PyTorch layouts)
# ----------------------------------------------------------------------------
def init_renderer_params(key, *, im_channels, nc_enc, nc_lstm, nc_query, nz):
    ks = jax.random.split(key, 8)
    s = 0.1
    lstm_in = nz + nc_query + nc_lstm
    p = {}
    p["rnn_w"] = s * jax.random.normal(ks[0], (4 * nc_lstm, lstm_in, 5, 5), jnp.float32)
    p["rnn_b"] = s * jax.random.normal(ks[1], (4 * nc_lstm,), jnp.float32)
    p["dec_w"] = s * jax.random.normal(ks[2], (nc_enc, nc_lstm, 5, 5), jnp.float32)
    p["dec_b"] = s * jax.random.normal(ks[3], (nc_enc,), jnp.float32)
    p["ct1_w"] = s * jax.random.normal(ks[4], (nc_enc, 2 * nc_enc, 4, 4), jnp.float32)
    p["ct1_b"] = s * jax.random.normal(ks[5], (2 * nc_enc,), jnp.float32)
    p["ct2_w"] = s * jax.random.normal(ks[6], (2 * nc_enc, im_channels, 4, 4), jnp.float32)
    p["ct2_b"] = s * jax.random.normal(ks[7], (im_channels,), jnp.float32)
    return p


# ----------------------------------------------------------------------------
# Pure-JAX (XLA) reference of the same forward pass, for correctness checking
# ----------------------------------------------------------------------------
def _reference_forward(z, emb_query, params, *, nc_lstm, im_channels, num_steps):
    N, _, zh, _ = z.shape
    CL = nc_lstm
    dn = ("NCHW", "OIHW", "NCHW")
    hp = lax.Precision.HIGHEST

    def conv5(x, w, b):
        y = lax.conv_general_dilated(x, w, (1, 1), ((2, 2), (2, 2)),
                                     dimension_numbers=dn, precision=hp)
        return y + b.reshape(1, -1, 1, 1)

    def convt(x, w_t, b):   # ConvTranspose2d(k=4, s=2, p=1)
        w = jnp.transpose(w_t[:, :, ::-1, ::-1], (1, 0, 2, 3))
        y = lax.conv_general_dilated(x, w, (1, 1), ((2, 2), (2, 2)),
                                     lhs_dilation=(2, 2),
                                     dimension_numbers=dn, precision=hp)
        return y + b.reshape(1, -1, 1, 1)

    inp = jnp.concatenate([z, emb_query], axis=1)
    h = jnp.zeros((N, CL, zh, zh), jnp.float32)
    c = jnp.zeros((N, CL, zh, zh), jnp.float32)
    canvas = jnp.zeros((N, im_channels, 4 * zh, 4 * zh), jnp.float32)
    for _ in range(num_steps):
        g = conv5(jnp.concatenate([inp, h], axis=1), params["rnn_w"], params["rnn_b"])
        i_g = jax.nn.sigmoid(g[:, 0 * CL:1 * CL])
        f_g = jax.nn.sigmoid(g[:, 1 * CL:2 * CL])
        o_g = jax.nn.sigmoid(g[:, 2 * CL:3 * CL])
        g_g = jnp.tanh(g[:, 3 * CL:4 * CL])
        c = f_g * c + i_g * g_g
        h = o_g * jnp.tanh(c)
        xx = jax.nn.relu(conv5(h, params["dec_w"], params["dec_b"]))
        xx = jax.nn.relu(convt(xx, params["ct1_w"], params["ct1_b"]))
        canvas = canvas + convt(xx, params["ct2_w"], params["ct2_b"])
    return canvas


if __name__ == "__main__":
    # small, self-consistent shapes (im_height must equal 4 * z_height)
    N = 2
    im_channels = 3
    nc_enc = 8
    nc_lstm = 8
    nc_query = 5
    nz = 6
    z_height = 4
    num_steps = 2

    key = jax.random.PRNGKey(0)
    k_params, k_z, k_q = jax.random.split(key, 3)
    params = init_renderer_params(
        k_params, im_channels=im_channels, nc_enc=nc_enc,
        nc_lstm=nc_lstm, nc_query=nc_query, nz=nz)
    z = jax.random.normal(k_z, (N, nz, z_height, z_height), jnp.float32)
    emb_query = jax.random.normal(k_q, (N, nc_query, z_height, z_height), jnp.float32)

    fwd = jax.jit(functools.partial(
        renderer_forward, nc_lstm=nc_lstm, nc_enc=nc_enc,
        im_channels=im_channels, num_steps=num_steps))
    out = jax.block_until_ready(fwd(z, emb_query, params))

    assert out.shape == (N, im_channels, 4 * z_height, 4 * z_height), out.shape
    assert jnp.isfinite(out).all()

    # correctness check against a pure-JAX reference (loose tol: bf16 MXU inputs)
    ref = _reference_forward(z, emb_query, params, nc_lstm=nc_lstm,
                             im_channels=im_channels, num_steps=num_steps)
    err = float(jnp.max(jnp.abs(out - ref)))
    assert err < 1e-1, f"max abs error vs reference: {err}"

    print("KERNEL_OK")
</pallas_src>

<mosaic_0001>
module attributes {stable_mosaic.version = 11 : i64} {
  func.func @kernel(%arg0: i32, %arg1: i32, %arg2: memref<1x8x8x11xf32, #tpu.memory_space<vmem>>, %arg3: memref<275x32xbf16, #tpu.memory_space<vmem>>, %arg4: memref<200x32xbf16, #tpu.memory_space<vmem>>, %arg5: memref<1x32xf32, #tpu.memory_space<vmem>>, %arg6: memref<200x8xbf16, #tpu.memory_space<vmem>>, %arg7: memref<1x8xf32, #tpu.memory_space<vmem>>, %arg8: memref<72x64xbf16, #tpu.memory_space<vmem>>, %arg9: memref<1x64xf32, #tpu.memory_space<vmem>>, %arg10: memref<144x12xbf16, #tpu.memory_space<vmem>>, %arg11: memref<1x12xf32, #tpu.memory_space<vmem>>, %arg12: memref<1x64x12xf32, #tpu.memory_space<vmem>>, %arg13: memref<16x32xf32, #tpu.memory_space<vmem>>, %arg14: memref<4x4x275xf32, #tpu.memory_space<vmem>>, %arg15: memref<4x4x200xf32, #tpu.memory_space<vmem>>, %arg16: memref<16x8xf32, #tpu.memory_space<vmem>>, %arg17: memref<8x8x8xf32, #tpu.memory_space<vmem>>, %arg18: memref<6x6x8xf32, #tpu.memory_space<vmem>>, %arg19: memref<4x4x72xf32, #tpu.memory_space<vmem>>, %arg20: memref<2x2x6x6x16xf32, #tpu.memory_space<vmem>>, %arg21: memref<4x4x144xf32, #tpu.memory_space<vmem>>) attributes {dimension_semantics = [#tpu.dimension_semantics<parallel>, #tpu.dimension_semantics<arbitrary>], iteration_bounds = array<i64: 2, 2>, scalar_prefetch = 0 : i64, scratch_operands = 9 : i64, tpu.core_type = #tpu.core_type<tc>, window_params = [{transform_indices = @transform_0, window_bounds = array<i64: 1, 8, 8, 11>}, {pipeline_mode = #tpu.pipeline_mode<synchronous>, transform_indices = @transform_1, window_bounds = array<i64: 275, 32>}, {pipeline_mode = #tpu.pipeline_mode<synchronous>, transform_indices = @transform_2, window_bounds = array<i64: 200, 32>}, {pipeline_mode = #tpu.pipeline_mode<synchronous>, transform_indices = @transform_3, window_bounds = array<i64: 1, 32>}, {pipeline_mode = #tpu.pipeline_mode<synchronous>, transform_indices = @transform_4, window_bounds = array<i64: 200, 8>}, {pipeline_mode = #tpu.pipeline_mode<synchronous>, transform_indices = @transform_5, window_bounds = array<i64: 1, 8>}, {pipeline_mode = #tpu.pipeline_mode<synchronous>, transform_indices = @transform_6, window_bounds = array<i64: 72, 64>}, {pipeline_mode = #tpu.pipeline_mode<synchronous>, transform_indices = @transform_7, window_bounds = array<i64: 1, 64>}, {pipeline_mode = #tpu.pipeline_mode<synchronous>, transform_indices = @transform_8, window_bounds = array<i64: 144, 12>}, {pipeline_mode = #tpu.pipeline_mode<synchronous>, transform_indices = @transform_9, window_bounds = array<i64: 1, 12>}, {transform_indices = @transform_10, window_bounds = array<i64: 1, 64, 12>}]} {
    %c0_i32 = arith.constant 0 : i32
    %0 = arith.cmpi eq, %arg1, %c0_i32 : i32
    %1 = arith.extui %0 : i1 to i32
    %c0_i32_0 = arith.constant 0 : i32
    %2 = arith.cmpi ne, %1, %c0_i32_0 : i32
    scf.if %2 {
      %cst_578 = arith.constant 0.000000e+00 : f32
      %313 = vector.broadcast %cst_578 : f32 to vector<16x8xf32>
      %c0_579 = arith.constant 0 : index
      %c0_580 = arith.constant 0 : index
      %314 = vector.load %arg16[%c0_579, %c0_580] : memref<16x8xf32, #tpu.memory_space<vmem>>, vector<16x8xf32>
      tpu.vector_store %arg16[%c0_579, %c0_580], %313 {strides = array<i32>} : memref<16x8xf32, #tpu.memory_space<vmem>>, vector<16x8xf32>,
      %cst_581 = arith.constant 0.000000e+00 : f32
      %315 = vector.broadcast %cst_581 : f32 to vector<4x4x200xf32>
      %c0_582 = arith.constant 0 : index
      %c0_583 = arith.constant 0 : index
      %c0_584 = arith.constant 0 : index
      %316 = vector.load %arg15[%c0_582, %c0_583, %c0_584] : memref<4x4x200xf32, #tpu.memory_space<vmem>>, vector<4x4x200xf32>
      tpu.vector_store %arg15[%c0_582, %c0_583, %c0_584], %315 {strides = array<i32>} : memref<4x4x200xf32, #tpu.memory_space<vmem>>, vector<4x4x200xf32>,
      %cst_585 = arith.constant 0.000000e+00 : f32
      %317 = vector.broadcast %cst_585 : f32 to vector<64x12xf32>
      %c0_586 = arith.constant 0 : index
      %c0_587 = arith.constant 0 : index
      %c0_588 = arith.constant 0 : index
      %318 = vector.load %arg12[%c0_586, %c0_587, %c0_588] : memref<1x64x12xf32, #tpu.memory_space<vmem>>, vector<1x64x12xf32>
      %319 = vector.shape_cast %318 : vector<1x64x12xf32> to vector<64x12xf32>
      %320 = vector.shape_cast %317 : vector<64x12xf32> to vector<1x64x12xf32>
      tpu.vector_store %arg12[%c0_586, %c0_587, %c0_588], %320 {strides = array<i32>} : memref<1x64x12xf32, #tpu.memory_space<vmem>>, vector<1x64x12xf32>,
      %cst_589 = arith.constant 0.000000e+00 : f32
      %321 = vector.broadcast %cst_589 : f32 to vector<8x8x8xf32>
      %c0_590 = arith.constant 0 : index
      %c0_591 = arith.constant 0 : index
      %c0_592 = arith.constant 0 : index
      %322 = vector.load %arg17[%c0_590, %c0_591, %c0_592] : memref<8x8x8xf32, #tpu.memory_space<vmem>>, vector<8x8x8xf32>
      tpu.vector_store %arg17[%c0_590, %c0_591, %c0_592], %321 {strides = array<i32>} : memref<8x8x8xf32, #tpu.memory_space<vmem>>, vector<8x8x8xf32>,
      %cst_593 = arith.constant 0.000000e+00 : f32
      %323 = vector.broadcast %cst_593 : f32 to vector<6x6x8xf32>
      %c0_594 = arith.constant 0 : index
      %c0_595 = arith.constant 0 : index
      %c0_596 = arith.constant 0 : index
      %324 = vector.load %arg18[%c0_594, %c0_595, %c0_596] : memref<6x6x8xf32, #tpu.memory_space<vmem>>, vector<6x6x8xf32>
      tpu.vector_store %arg18[%c0_594, %c0_595, %c0_596], %323 {strides = array<i32>} : memref<6x6x8xf32, #tpu.memory_space<vmem>>, vector<6x6x8xf32>,
      %cst_597 = arith.constant 0.000000e+00 : f32
      %325 = vector.broadcast %cst_597 : f32 to vector<2x2x6x6x16xf32>
      %c0_598 = arith.constant 0 : index
      %c0_599 = arith.constant 0 : index
      %c0_600 = arith.constant 0 : index
      %c0_601 = arith.constant 0 : index
      %c0_602 = arith.constant 0 : index
      %326 = vector.load %arg20[%c0_598, %c0_599, %c0_600, %c0_601, %c0_602] : memref<2x2x6x6x16xf32, #tpu.memory_space<vmem>>, vector<2x2x6x6x16xf32>
      tpu.vector_store %arg20[%c0_598, %c0_599, %c0_600, %c0_601, %c0_602], %325 {strides = array<i32>} : memref<2x2x6x6x16xf32, #tpu.memory_space<vmem>>, vector<2x2x6x6x16xf32>,
      %c0_603 = arith.constant 0 : index
      %c0_604 = arith.constant 0 : index
      %c0_605 = arith.constant 0 : index
      %c0_606 = arith.constant 0 : index
      %327 = vector.load %arg2[%c0_603, %c0_604, %c0_605, %c0_606] : memref<1x8x8x11xf32, #tpu.memory_space<vmem>>, vector<1x4x4x11xf32>
      %328 = vector.shape_cast %327 : vector<1x4x4x11xf32> to vector<4x4x11xf32>
      %c0_607 = arith.constant 0 : index
      %c0_608 = arith.constant 0 : index
      %c0_609 = arith.constant 0 : index
      %329 = vector.load %arg14[%c0_607, %c0_608, %c0_609] : memref<4x4x275xf32, #tpu.memory_space<vmem>>, vector<4x4x11xf32>
      tpu.vector_store %arg14[%c0_607, %c0_608, %c0_609], %328 {strides = array<i32>} : memref<4x4x275xf32, #tpu.memory_space<vmem>>, vector<4x4x11xf32>,
      %c0_610 = arith.constant 0 : index
      %c0_611 = arith.constant 0 : index
      %c1_612 = arith.constant 1 : index
      %c0_613 = arith.constant 0 : index
      %330 = vector.load %arg2[%c0_610, %c0_611, %c1_612, %c0_613] : memref<1x8x8x11xf32, #tpu.memory_space<vmem>>, vector<1x4x4x11xf32>
      %331 = vector.shape_cast %330 : vector<1x4x4x11xf32> to vector<4x4x11xf32>
      %c0_614 = arith.constant 0 : index
      %c0_615 = arith.constant 0 : index
      %c11 = arith.constant 11 : index
      %332 = vector.load %arg14[%c0_614, %c0_615, %c11] : memref<4x4x275xf32, #tpu.memory_space<vmem>>, vector<4x4x11xf32>
      tpu.vector_store %arg14[%c0_614, %c0_615, %c11], %331 {strides = array<i32>} : memref<4x4x275xf32, #tpu.memory_space<vmem>>, vector<4x4x11xf32>,
      %c0_616 = arith.constant 0 : index
      %c0_617 = arith.constant 0 : index
      %c2_618 = arith.constant 2 : index
      %c0_619 = arith.constant 0 : index
      %333 = vector.load %arg2[%c0_616, %c0_617, %c2_618, %c0_619] : memref<1x8x8x11xf32, #tpu.memory_space<vmem>>, vector<1x4x4x11xf32>
      %334 = vector.shape_cast %333 : vector<1x4x4x11xf32> to vector<4x4x11xf32>
      %c0_620 = arith.constant 0 : index
      %c0_621 = arith.constant 0 : index
      %c22 = arith.constant 22 : index
      %335 = vector.load %arg14[%c0_620, %c0_621, %c22] : memref<4x4x275xf32, #tpu.memory_space<vmem>>, vector<4x4x11xf32>
      tpu.vector_store %arg14[%c0_620, %c0_621, %c22], %334 {strides = array<i32>} : memref<4x4x275xf32, #tpu.memory_space<vmem>>, vector<4x4x11xf32>,
      %c0_622 = arith.constant 0 : index
      %c0_623 = arith.constant 0 : index
      %c3_624 = arith.constant 3 : index
      %c0_625 = arith.constant 0 : index
      %336 = vector.load %arg2[%c0_622, %c0_623, %c3_624, %c0_625] : memref<1x8x8x11xf32, #tpu.memory_space<vmem>>, vector<1x4x4x11xf32>
      %337 = vector.shape_cast %336 : vector<1x4x4x11xf32> to vector<4x4x11xf32>
      %c0_626 = arith.constant 0 : index
      %c0_627 = arith.constant 0 : index
      %c33 = arith.constant 33 : index
      %338 = vector.load %arg14[%c0_626, %c0_627, %c33] : memref<4x4x275xf32, #tpu.memory_space<vmem>>, vector<4x4x11xf32>
      tpu.vector_store %arg14[%c0_626, %c0_627, %c33], %337 {strides = array<i32>} : memref<4x4x275xf32, #tpu.memory_space<vmem>>, vector<4x4x11xf32>,
      %c0_628 = arith.constant 0 : index
      %c0_629 = arith.constant 0 : index
      %c4_630 = arith.constant 4 : index
      %c0_631 = arith.constant 0 : index
      %339 = vector.load %arg2[%c0_628, %c0_629, %c4_630, %c0_631] : memref<1x8x8x11xf32, #tpu.memory_space<vmem>>, vector<1x4x4x11xf32>
      %340 = vector.shape_cast %339 : vector<1x4x4x11xf32> to vector<4x4x11xf32>
      %c0_632 = arith.constant 0 : index
      %c0_633 = arith.constant 0 : index
      %c44 = arith.constant 44 : index
      %341 = vector.load %arg14[%c0_632, %c0_633, %c44] : memref<4x4x275xf32, #tpu.memory_space<vmem>>, vector<4x4x11xf32>
      tpu.vector_store %arg14[%c0_632, %c0_633, %c44], %340 {strides = array<i32>} : memref<4x4x275xf32, #tpu.memory_space<vmem>>, vector<4x4x11xf32>,
      %c0_634 = arith.constant 0 : index
      %c1_635 = arith.constant 1 : index
      %c0_636 = arith.constant 0 : index
      %c0_637 = arith.constant 0 : index
      %342 = vector.load %arg2[%c0_634, %c1_635, %c0_636, %c0_637] : memref<1x8x8x11xf32, #tpu.memory_space<vmem>>, vector<1x4x4x11xf32>
      %343 = vector.shape_cast %342 : vector<1x4x4x11xf32> to vector<4x4x11xf32>
      %c0_638 = arith.constant 0 : index
      %c0_639 = arith.constant 0 : index
      %c55 = arith.constant 55 : index
      %344 = vector.load %arg14[%c0_638, %c0_639, %c55] : memref<4x4x275xf32, #tpu.memory_space<vmem>>, vector<4x4x11xf32>
      tpu.vector_store %arg14[%c0_638, %c0_639, %c55], %343 {strides = array<i32>} : memref<4x4x275xf32, #tpu.memory_space<vmem>>, vector<4x4x11xf32>,
      %c0_640 = arith.constant 0 : index
      %c1_641 = arith.constant 1 : index
      %c1_642 = arith.constant 1 : index
      %c0_643 = arith.constant 0 : index
      %345 = vector.load %arg2[%c0_640, %c1_641, %c1_642, %c0_643] : memref<1x8x8x11xf32, #tpu.memory_space<vmem>>, vector<1x4x4x11xf32>
      %346 = vector.shape_cast %345 : vector<1x4x4x11xf32> to vector<4x4x11xf32>
      %c0_644 = arith.constant 0 : index
      %c0_645 = arith.constant 0 : index
      %c66 = arith.constant 66 : index
      %347 = vector.load %arg14[%c0_644, %c0_645, %c66] : memref<4x4x275xf32, #tpu.memory_space<vmem>>, vector<4x4x11xf32>
      tpu.vector_store %arg14[%c0_644, %c0_645, %c66], %346 {strides = array<i32>} : memref<4x4x275xf32, #tpu.memory_space<vmem>>, vector<4x4x11xf32>,
      %c0_646 = arith.constant 0 : index
      %c1_647 = arith.constant 1 : index
      %c2_648 = arith.constant 2 : index
      %c0_649 = arith.constant 0 : index
      %348 = vector.load %arg2[%c0_646, %c1_647, %c2_648, %c0_649] : memref<1x8x8x11xf32, #tpu.memory_space<vmem>>, vector<1x4x4x11xf32>
      %349 = vector.shape_cast %348 : vector<1x4x4x11xf32> to vector<4x4x11xf32>
      %c0_650 = arith.constant 0 : index
      %c0_651 = arith.constant 0 : index
      %c77 = arith.constant 77 : index
      %350 = vector.load %arg14[%c0_650, %c0_651, %c77] : memref<4x4x275xf32, #tpu.memory_space<vmem>>, vector<4x4x11xf32>
      tpu.vector_store %arg14[%c0_650, %c0_651, %c77], %349 {strides = array<i32>} : memref<4x4x275xf32, #tpu.memory_space<vmem>>, vector<4x4x11xf32>,
      %c0_652 = arith.constant 0 : index
      %c1_653 = arith.constant 1 : index
      %c3_654 = arith.constant 3 : index
      %c0_655 = arith.constant 0 : index
      %351 = vector.load %arg2[%c0_652, %c1_653, %c3_654, %c0_655] : memref<1x8x8x11xf32, #tpu.memory_space<vmem>>, vector<1x4x4x11xf32>
      %352 = vector.shape_cast %351 : vector<1x4x4x11xf32> to vector<4x4x11xf32>
      %c0_656 = arith.constant 0 : index
      %c0_657 = arith.constant 0 : index
      %c88_658 = arith.constant 88 : index
      %353 = vector.load %arg14[%c0_656, %c0_657, %c88_658] : memref<4x4x275xf32, #tpu.memory_space<vmem>>, vector<4x4x11xf32>
      tpu.vector_store %arg14[%c0_656, %c0_657, %c88_658], %352 {strides = array<i32>} : memref<4x4x275xf32, #tpu.memory_space<vmem>>, vector<4x4x11xf32>,
      %c0_659 = arith.constant 0 : index
      %c1_660 = arith.constant 1 : index
      %c4_661 = arith.constant 4 : index
      %c0_662 = arith.constant 0 : index
      %354 = vector.load %arg2[%c0_659, %c1_660, %c4_661, %c0_662] : memref<1x8x8x11xf32, #tpu.memory_space<vmem>>, vector<1x4x4x11xf32>
      %355 = vector.shape_cast %354 : vector<1x4x4x11xf32> to vector<4x4x11xf32>
      %c0_663 = arith.constant 0 : index
      %c0_664 = arith.constant 0 : index
      %c99 = arith.constant 99 : index
      %356 = vector.load %arg14[%c0_663, %c0_664, %c99] : memref<4x4x275xf32, #tpu.memory_space<vmem>>, vector<4x4x11xf32>
      tpu.vector_store %arg14[%c0_663, %c0_664, %c99], %355 {strides = array<i32>} : memref<4x4x275xf32, #tpu.memory_space<vmem>>, vector<4x4x11xf32>,
      %c0_665 = arith.constant 0 : index
      %c2_666 = arith.constant 2 : index
      %c0_667 = arith.constant 0 : index
      %c0_668 = arith.constant 0 : index
      %357 = vector.load %arg2[%c0_665, %c2_666, %c0_667, %c0_668] : memref<1x8x8x11xf32, #tpu.memory_space<vmem>>, vector<1x4x4x11xf32>
      %358 = vector.shape_cast %357 : vector<1x4x4x11xf32> to vector<4x4x11xf32>
      %c0_669 = arith.constant 0 : index
      %c0_670 = arith.constant 0 : index
      %c110 = arith.constant 110 : index
      %359 = vector.load %arg14[%c0_669, %c0_670, %c110] : memref<4x4x275xf32, #tpu.memory_space<vmem>>, vector<4x4x11xf32>
      tpu.vector_store %arg14[%c0_669, %c0_670, %c110], %358 {strides = array<i32>} : memref<4x4x275xf32, #tpu.memory_space<vmem>>, vector<4x4x11xf32>,
      %c0_671 = arith.constant 0 : index
      %c2_672 = arith.constant 2 : index
      %c1_673 = arith.constant 1 : index
      %c0_674 = arith.constant 0 : index
      %360 = vector.load %arg2[%c0_671, %c2_672, %c1_673, %c0_674] : memref<1x8x8x11xf32, #tpu.memory_space<vmem>>, vector<1x4x4x11xf32>
      %361 = vector.shape_cast %360 : vector<1x4x4x11xf32> to vector<4x4x11xf32>
      %c0_675 = arith.constant 0 : index
      %c0_676 = arith.constant 0 : index
      %c121 = arith.constant 121 : index
      %362 = vector.load %arg14[%c0_675, %c0_676, %c121] : memref<4x4x275xf32, #tpu.memory_space<vmem>>, vector<4x4x11xf32>
      tpu.vector_store %arg14[%c0_675, %c0_676, %c121], %361 {strides = array<i32>} : memref<4x4x275xf32, #tpu.memory_space<vmem>>, vector<4x4x11xf32>,
      %c0_677 = arith.constant 0 : index
      %c2_678 = arith.constant 2 : index
      %c2_679 = arith.constant 2 : index
      %c0_680 = arith.constant 0 : index
      %363 = vector.load %arg2[%c0_677, %c2_678, %c2_679, %c0_680] : memref<1x8x8x11xf32, #tpu.memory_space<vmem>>, vector<1x4x4x11xf32>
      %364 = vector.shape_cast %363 : vector<1x4x4x11xf32> to vector<4x4x11xf32>
      %c0_681 = arith.constant 0 : index
      %c0_682 = arith.constant 0 : index
      %c132 = arith.constant 132 : index
      %365 = vector.load %arg14[%c0_681, %c0_682, %c132] : memref<4x4x275xf32, #tpu.memory_space<vmem>>, vector<4x4x11xf32>
      tpu.vector_store %arg14[%c0_681, %c0_682, %c132], %364 {strides = array<i32>} : memref<4x4x275xf32, #tpu.memory_space<vmem>>, vector<4x4x11xf32>,
      %c0_683 = arith.constant 0 : index
      %c2_684 = arith.constant 2 : index
      %c3_685 = arith.constant 3 : index
      %c0_686 = arith.constant 0 : index
      %366 = vector.load %arg2[%c0_683, %c2_684, %c3_685, %c0_686] : memref<1x8x8x11xf32, #tpu.memory_space<vmem>>, vector<1x4x4x11xf32>
      %367 = vector.shape_cast %366 : vector<1x4x4x11xf32> to vector<4x4x11xf32>
      %c0_687 = arith.constant 0 : index
      %c0_688 = arith.constant 0 : index
      %c143 = arith.constant 143 : index
      %368 = vector.load %arg14[%c0_687, %c0_688, %c143] : memref<4x4x275xf32, #tpu.memory_space<vmem>>, vector<4x4x11xf32>
      tpu.vector_store %arg14[%c0_687, %c0_688, %c143], %367 {strides = array<i32>} : memref<4x4x275xf32, #tpu.memory_space<vmem>>, vector<4x4x11xf32>,
      %c0_689 = arith.constant 0 : index
      %c2_690 = arith.constant 2 : index
      %c4_691 = arith.constant 4 : index
      %c0_692 = arith.constant 0 : index
      %369 = vector.load %arg2[%c0_689, %c2_690, %c4_691, %c0_692] : memref<1x8x8x11xf32, #tpu.memory_space<vmem>>, vector<1x4x4x11xf32>
      %370 = vector.shape_cast %369 : vector<1x4x4x11xf32> to vector<4x4x11xf32>
      %c0_693 = arith.constant 0 : index
      %c0_694 = arith.constant 0 : index
      %c154 = arith.constant 154 : index
      %371 = vector.load %arg14[%c0_693, %c0_694, %c154] : memref<4x4x275xf32, #tpu.memory_space<vmem>>, vector<4x4x11xf32>
      tpu.vector_store %arg14[%c0_693, %c0_694, %c154], %370 {strides = array<i32>} : memref<4x4x275xf32, #tpu.memory_space<vmem>>, vector<4x4x11xf32>,
      %c0_695 = arith.constant 0 : index
      %c3_696 = arith.constant 3 : index
      %c0_697 = arith.constant 0 : index
      %c0_698 = arith.constant 0 : index
      %372 = vector.load %arg2[%c0_695, %c3_696, %c0_697, %c0_698] : memref<1x8x8x11xf32, #tpu.memory_space<vmem>>, vector<1x4x4x11xf32>
      %373 = vector.shape_cast %372 : vector<1x4x4x11xf32> to vector<4x4x11xf32>
      %c0_699 = arith.constant 0 : index
      %c0_700 = arith.constant 0 : index
      %c165 = arith.constant 165 : index
      %374 = vector.load %arg14[%c0_699, %c0_700, %c165] : memref<4x4x275xf32, #tpu.memory_space<vmem>>, vector<4x4x11xf32>
      tpu.vector_store %arg14[%c0_699, %c0_700, %c165], %373 {strides = array<i32>} : memref<4x4x275xf32, #tpu.memory_space<vmem>>, vector<4x4x11xf32>,
      %c0_701 = arith.constant 0 : index
      %c3_702 = arith.constant 3 : index
      %c1_703 = arith.constant 1 : index
      %c0_704 = arith.constant 0 : index
      %375 = vector.load %arg2[%c0_701, %c3_702, %c1_703, %c0_704] : memref<1x8x8x11xf32, #tpu.memory_space<vmem>>, vector<1x4x4x11xf32>
      %376 = vector.shape_cast %375 : vector<1x4x4x11xf32> to vector<4x4x11xf32>
      %c0_705 = arith.constant 0 : index
      %c0_706 = arith.constant 0 : index
      %c176_707 = arith.constant 176 : index
      %377 = vector.load %arg14[%c0_705, %c0_706, %c176_707] : memref<4x4x275xf32, #tpu.memory_space<vmem>>, vector<4x4x11xf32>
      tpu.vector_store %arg14[%c0_705, %c0_706, %c176_707], %376 {strides = array<i32>} : memref<4x4x275xf32, #tpu.memory_space<vmem>>, vector<4x4x11xf32>,
      %c0_708 = arith.constant 0 : index
      %c3_709 = arith.constant 3 : index
      %c2_710 = arith.constant 2 : index
      %c0_711 = arith.constant 0 : index
      %378 = vector.load %arg2[%c0_708, %c3_709, %c2_710, %c0_711] : memref<1x8x8x11xf32, #tpu.memory_space<vmem>>, vector<1x4x4x11xf32>
      %379 = vector.shape_cast %378 : vector<1x4x4x11xf32> to vector<4x4x11xf32>
      %c0_712 = arith.constant 0 : index
      %c0_713 = arith.constant 0 : index
      %c187 = arith.constant 187 : index
      %380 = vector.load %arg14[%c0_712, %c0_713, %c187] : memref<4x4x275xf32, #tpu.memory_space<vmem>>, vector<4x4x11xf32>
      tpu.vector_store %arg14[%c0_712, %c0_713, %c187], %379 {strides = array<i32>} : memref<4x4x275xf32, #tpu.memory_space<vmem>>, vector<4x4x11xf32>,
      %c0_714 = arith.constant 0 : index
      %c3_715 = arith.constant 3 : index
      %c3_716 = arith.constant 3 : index
      %c0_717 = arith.constant 0 : index
      %381 = vector.load %arg2[%c0_714, %c3_715, %c3_716, %c0_717] : memref<1x8x8x11xf32, #tpu.memory_space<vmem>>, vector<1x4x4x11xf32>
      %382 = vector.shape_cast %381 : vector<1x4x4x11xf32> to vector<4x4x11xf32>
      %c0_718 = arith.constant 0 : index
      %c0_719 = arith.constant 0 : index
      %c198 = arith.constant 198 : index
      %383 = vector.load %arg14[%c0_718, %c0_719, %c198] : memref<4x4x275xf32, #tpu.memory_space<vmem>>, vector<4x4x11xf32>
      tpu.vector_store %arg14[%c0_718, %c0_719, %c198], %382 {strides = array<i32>} : memref<4x4x275xf32, #tpu.memory_space<vmem>>, vector<4x4x11xf32>,
      %c0_720 = arith.constant 0 : index
      %c3_721 = arith.constant 3 : index
      %c4_722 = arith.constant 4 : index
      %c0_723 = arith.constant 0 : index
      %384 = vector.load %arg2[%c0_720, %c3_721, %c4_722, %c0_723] : memref<1x8x8x11xf32, #tpu.memory_space<vmem>>, vector<1x4x4x11xf32>
      %385 = vector.shape_cast %384 : vector<1x4x4x11xf32> to vector<4x4x11xf32>
      %c0_724 = arith.constant 0 : index
      %c0_725 = arith.constant 0 : index
      %c209 = arith.constant 209 : index
      %386 = vector.load %arg14[%c0_724, %c0_725, %c209] : memref<4x4x275xf32, #tpu.memory_space<vmem>>, vector<4x4x11xf32>
      tpu.vector_store %arg14[%c0_724, %c0_725, %c209], %385 {strides = array<i32>} : memref<4x4x275xf32, #tpu.memory_space<vmem>>, vector<4x4x11xf32>,
      %c0_726 = arith.constant 0 : index
      %c4_727 = arith.constant 4 : index
      %c0_728 = arith.constant 0 : index
      %c0_729 = arith.constant 0 : index
      %387 = vector.load %arg2[%c0_726, %c4_727, %c0_728, %c0_729] : memref<1x8x8x11xf32, #tpu.memory_space<vmem>>, vector<1x4x4x11xf32>
      %388 = vector.shape_cast %387 : vector<1x4x4x11xf32> to vector<4x4x11xf32>
      %c0_730 = arith.constant 0 : index
      %c0_731 = arith.constant 0 : index
      %c220 = arith.constant 220 : index
      %389 = vector.load %arg14[%c0_730, %c0_731, %c220] : memref<4x4x275xf32, #tpu.memory_space<vmem>>, vector<4x4x11xf32>
      tpu.vector_store %arg14[%c0_730, %c0_731, %c220], %388 {strides = array<i32>} : memref<4x4x275xf32, #tpu.memory_space<vmem>>, vector<4x4x11xf32>,
      %c0_732 = arith.constant 0 : index
      %c4_733 = arith.constant 4 : index
      %c1_734 = arith.constant 1 : index
      %c0_735 = arith.constant 0 : index
      %390 = vector.load %arg2[%c0_732, %c4_733, %c1_734, %c0_735] : memref<1x8x8x11xf32, #tpu.memory_space<vmem>>, vector<1x4x4x11xf32>
      %391 = vector.shape_cast %390 : vector<1x4x4x11xf32> to vector<4x4x11xf32>
      %c0_736 = arith.constant 0 : index
      %c0_737 = arith.constant 0 : index
      %c231 = arith.constant 231 : index
      %392 = vector.load %arg14[%c0_736, %c0_737, %c231] : memref<4x4x275xf32, #tpu.memory_space<vmem>>, vector<4x4x11xf32>
      tpu.vector_store %arg14[%c0_736, %c0_737, %c231], %391 {strides = array<i32>} : memref<4x4x275xf32, #tpu.memory_space<vmem>>, vector<4x4x11xf32>,
      %c0_738 = arith.constant 0 : index
      %c4_739 = arith.constant 4 : index
      %c2_740 = arith.constant 2 : index
      %c0_741 = arith.constant 0 : index
      %393 = vector.load %arg2[%c0_738, %c4_739, %c2_740, %c0_741] : memref<1x8x8x11xf32, #tpu.memory_space<vmem>>, vector<1x4x4x11xf32>
      %394 = vector.shape_cast %393 : vector<1x4x4x11xf32> to vector<4x4x11xf32>
      %c0_742 = arith.constant 0 : index
      %c0_743 = arith.constant 0 : index
      %c242 = arith.constant 242 : index
      %395 = vector.load %arg14[%c0_742, %c0_743, %c242] : memref<4x4x275xf32, #tpu.memory_space<vmem>>, vector<4x4x11xf32>
      tpu.vector_store %arg14[%c0_742, %c0_743, %c242], %394 {strides = array<i32>} : memref<4x4x275xf32, #tpu.memory_space<vmem>>, vector<4x4x11xf32>,
      %c0_744 = arith.constant 0 : index
      %c4_745 = arith.constant 4 : index
      %c3_746 = arith.constant 3 : index
      %c0_747 = arith.constant 0 : index
      %396 = vector.load %arg2[%c0_744, %c4_745, %c3_746, %c0_747] : memref<1x8x8x11xf32, #tpu.memory_space<vmem>>, vector<1x4x4x11xf32>
      %397 = vector.shape_cast %396 : vector<1x4x4x11xf32> to vector<4x4x11xf32>
      %c0_748 = arith.constant 0 : index
      %c0_749 = arith.constant 0 : index
      %c253 = arith.constant 253 : index
      %398 = vector.load %arg14[%c0_748, %c0_749, %c253] : memref<4x4x275xf32, #tpu.memory_space<vmem>>, vector<4x4x11xf32>
      tpu.vector_store %arg14[%c0_748, %c0_749, %c253], %397 {strides = array<i32>} : memref<4x4x275xf32, #tpu.memory_space<vmem>>, vector<4x4x11xf32>,
      %c0_750 = arith.constant 0 : index
      %c4_751 = arith.constant 4 : index
      %c4_752 = arith.constant 4 : index
      %c0_753 = arith.constant 0 : index
      %399 = vector.load %arg2[%c0_750, %c4_751, %c4_752, %c0_753] : memref<1x8x8x11xf32, #tpu.memory_space<vmem>>, vector<1x4x4x11xf32>
      %400 = vector.shape_cast %399 : vector<1x4x4x11xf32> to vector<4x4x11xf32>
      %c0_754 = arith.constant 0 : index
      %c0_755 = arith.constant 0 : index
      %c264 = arith.constant 264 : index
      %401 = vector.load %arg14[%c0_754, %c0_755, %c264] : memref<4x4x275xf32, #tpu.memory_space<vmem>>, vector<4x4x11xf32>
      tpu.vector_store %arg14[%c0_754, %c0_755, %c264], %400 {strides = array<i32>} : memref<4x4x275xf32, #tpu.memory_space<vmem>>, vector<4x4x11xf32>,
      %c0_756 = arith.constant 0 : index
      %c0_757 = arith.constant 0 : index
      %c0_758 = arith.constant 0 : index
      %402 = vector.load %arg14[%c0_756, %c0_757, %c0_758] : memref<4x4x275xf32, #tpu.memory_space<vmem>>, vector<4x4x275xf32>
      %403 = vector.shape_cast %402 : vector<4x4x275xf32> to vector<16x275xf32>
      %404 = arith.truncf %403 : vector<16x275xf32> to vector<16x275xbf16>
      %c0_759 = arith.constant 0 : index
      %c0_760 = arith.constant 0 : index
      %405 = vector.load %arg3[%c0_759, %c0_760] : memref<275x32xbf16, #tpu.memory_space<vmem>>, vector<275x32xbf16>
      %cst_761 = arith.constant dense<0.000000e+00> : vector<16x32xf32>
      %406 = tpu.matmul %404, %405, %cst_761 {dimension_numbers = #tpu.dot_dimension_numbers<[1], [0], [0], [1], [0, 0, 1, 1], [], []>} : vector<16x275xbf16>, vector<275x32xbf16>, vector<16x32xf32> -> vector<16x32xf32>
      %c0_762 = arith.constant 0 : index
      %c0_763 = arith.constant 0 : index
      %407 = vector.load %arg5[%c0_762, %c0_763] : memref<1x32xf32, #tpu.memory_space<vmem>>, vector<1x32xf32>
      %408 = vector.broadcast %407 : vector<1x32xf32> to vector<16x32xf32>
      %409 = arith.addf %406, %408 : vector<16x32xf32>
      %c0_764 = arith.constant 0 : index
      %c0_765 = arith.constant 0 : index
      %410 = vector.load %arg13[%c0_764, %c0_765] : memref<16x32xf32, #tpu.memory_space<vmem>>, vector<16x32xf32>
      tpu.vector_store %arg13[%c0_764, %c0_765], %409 {strides = array<i32>} : memref<16x32xf32, #tpu.memory_space<vmem>>, vector<16x32xf32>,
    } else {
    }
    %c0 = arith.constant 0 : index
    %c0_1 = arith.constant 0 : index
    %c0_2 = arith.constant 0 : index
    %3 = vector.load %arg15[%c0, %c0_1, %c0_2] : memref<4x4x200xf32, #tpu.memory_space<vmem>>, vector<4x4x200xf32>
    %4 = vector.shape_cast %3 : vector<4x4x200xf32> to vector<16x200xf32>
    %5 = arith.truncf %4 : vector<16x200xf32> to vector<16x200xbf16>
    %c0_3 = arith.constant 0 : index
    %c0_4 = arith.constant 0 : index
    %6 = vector.load %arg13[%c0_3, %c0_4] : memref<16x32xf32, #tpu.memory_space<vmem>>, vector<16x32xf32>
    %c0_5 = arith.constant 0 : index
    %c0_6 = arith.constant 0 : index
    %7 = vector.load %arg4[%c0_5, %c0_6] : memref<200x32xbf16, #tpu.memory_space<vmem>>, vector<200x32xbf16>
    %cst = arith.constant dense<0.000000e+00> : vector<16x32xf32>
    %8 = tpu.matmul %5, %7, %cst {dimension_numbers = #tpu.dot_dimension_numbers<[1], [0], [0], [1], [0, 0, 1, 1], [], []>} : vector<16x200xbf16>, vector<200x32xbf16>, vector<16x32xf32> -> vector<16x32xf32>
    %9 = arith.addf %6, %8 : vector<16x32xf32>
    %10 = vector.extract_strided_slice %9 {offsets = [0, 0], sizes = [16, 8], strides = [1, 1]} : vector<16x32xf32> to vector<16x8xf32>
    %11 = arith.negf %10 : vector<16x8xf32>
    %12 = math.exp %11 : vector<16x8xf32>
    %cst_7 = arith.constant 1.000000e+00 : f32
    %13 = vector.broadcast %cst_7 : f32 to vector<16x8xf32>
    %14 = arith.addf %13, %12 : vector<16x8xf32>
    %15 = arith.divf %13, %14 : vector<16x8xf32>
    %16 = vector.extract_strided_slice %9 {offsets = [0, 8], sizes = [16, 8], strides = [1, 1]} : vector<16x32xf32> to vector<16x8xf32>
    %17 = arith.negf %16 : vector<16x8xf32>
    %18 = math.exp %17 : vector<16x8xf32>
    %cst_8 = arith.constant 1.000000e+00 : f32
    %19 = vector.broadcast %cst_8 : f32 to vector<16x8xf32>
    %20 = arith.addf %19, %18 : vector<16x8xf32>
    %21 = arith.divf %19, %20 : vector<16x8xf32>
    %22 = vector.extract_strided_slice %9 {offsets = [0, 16], sizes = [16, 8], strides = [1, 1]} : vector<16x32xf32> to vector<16x8xf32>
    %23 = arith.negf %22 : vector<16x8xf32>
    %24 = math.exp %23 : vector<16x8xf32>
    %cst_9 = arith.constant 1.000000e+00 : f32
    %25 = vector.broadcast %cst_9 : f32 to vector<16x8xf32>
    %26 = arith.addf %25, %24 : vector<16x8xf32>
    %27 = arith.divf %25, %26 : vector<16x8xf32>
    %28 = vector.extract_strided_slice %9 {offsets = [0, 24], sizes = [16, 8], strides = [1, 1]} : vector<16x32xf32> to vector<16x8xf32>
    %29 = math.tanh %28 : vector<16x8xf32>
    %c0_10 = arith.constant 0 : index
    %c0_11 = arith.constant 0 : index
    %30 = vector.load %arg16[%c0_10, %c0_11] : memref<16x8xf32, #tpu.memory_space<vmem>>, vector<16x8xf32>
    %31 = arith.mulf %21, %30 : vector<16x8xf32>
    %32 = arith.mulf %15, %29 : vector<16x8xf32>
    %33 = arith.addf %31, %32 : vector<16x8xf32>
    %34 = math.tanh %33 : vector<16x8xf32>
    %35 = arith.mulf %27, %34 : vector<16x8xf32>
    %c0_12 = arith.constant 0 : index
    %c0_13 = arith.constant 0 : index
    %36 = vector.load %arg16[%c0_12, %c0_13] : memref<16x8xf32, #tpu.memory_space<vmem>>, vector<16x8xf32>
    tpu.vector_store %arg16[%c0_12, %c0_13], %33 {strides = array<i32>} : memref<16x8xf32, #tpu.memory_space<vmem>>, vector<16x8xf32>,
    %37 = vector.shape_cast %35 : vector<16x8xf32> to vector<4x4x8xf32>
    %c2 = arith.constant 2 : index
    %c2_14 = arith.constant 2 : index
    %c0_15 = arith.constant 0 : index
    %38 = vector.load %arg17[%c2, %c2_14, %c0_15] : memref<8x8x8xf32, #tpu.memory_space<vmem>>, vector<4x4x8xf32>
    tpu.vector_store %arg17[%c2, %c2_14, %c0_15], %37 {strides = array<i32>} : memref<8x8x8xf32, #tpu.memory_space<vmem>>, vector<4x4x8xf32>,
    %c0_16 = arith.constant 0 : index
    %c0_17 = arith.constant 0 : index
    %c0_18 = arith.constant 0 : index
    %39 = vector.load %arg17[%c0_16, %c0_17, %c0_18] : memref<8x8x8xf32, #tpu.memory_space<vmem>>, vector<4x4x8xf32>
    %c0_19 = arith.constant 0 : index
    %c0_20 = arith.constant 0 : index
    %c0_21 = arith.constant 0 : index
    %40 = vector.load %arg15[%c0_19, %c0_20, %c0_21] : memref<4x4x200xf32, #tpu.memory_space<vmem>>, vector<4x4x8xf32>
    tpu.vector_store %arg15[%c0_19, %c0_20, %c0_21], %39 {strides = array<i32>} : memref<4x4x200xf32, #tpu.memory_space<vmem>>, vector<4x4x8xf32>,
    %c0_22 = arith.constant 0 : index
    %c1 = arith.constant 1 : index
    %c0_23 = arith.constant 0 : index
    %41 = vector.load %arg17[%c0_22, %c1, %c0_23] : memref<8x8x8xf32, #tpu.memory_space<vmem>>, vector<4x4x8xf32>
    %c0_24 = arith.constant 0 : index
    %c0_25 = arith.constant 0 : index
    %c8 = arith.constant 8 : index
    %42 = vector.load %arg15[%c0_24, %c0_25, %c8] : memref<4x4x200xf32, #tpu.memory_space<vmem>>, vector<4x4x8xf32>
    tpu.vector_store %arg15[%c0_24, %c0_25, %c8], %41 {strides = array<i32>} : memref<4x4x200xf32, #tpu.memory_space<vmem>>, vector<4x4x8xf32>,
    %c0_26 = arith.constant 0 : index
    %c2_27 = arith.constant 2 : index
    %c0_28 = arith.constant 0 : index
    %43 = vector.load %arg17[%c0_26, %c2_27, %c0_28] : memref<8x8x8xf32, #tpu.memory_space<vmem>>, vector<4x4x8xf32>
    %c0_29 = arith.constant 0 : index
    %c0_30 = arith.constant 0 : index
    %c16 = arith.constant 16 : index
    %44 = vector.load %arg15[%c0_29, %c0_30, %c16] : memref<4x4x200xf32, #tpu.memory_space<vmem>>, vector<4x4x8xf32>
    tpu.vector_store %arg15[%c0_29, %c0_30, %c16], %43 {strides = array<i32>} : memref<4x4x200xf32, #tpu.memory_space<vmem>>, vector<4x4x8xf32>,
    %c0_31 = arith.constant 0 : index
    %c3 = arith.constant 3 : index
    %c0_32 = arith.constant 0 : index
    %45 = vector.load %arg17[%c0_31, %c3, %c0_32] : memref<8x8x8xf32, #tpu.memory_space<vmem>>, vector<4x4x8xf32>
    %c0_33 = arith.constant 0 : index
    %c0_34 = arith.constant 0 : index
    %c24 = arith.constant 24 : index
    %46 = vector.load %arg15[%c0_33, %c0_34, %c24] : memref<4x4x200xf32, #tpu.memory_space<vmem>>, vector<4x4x8xf32>
    tpu.vector_store %arg15[%c0_33, %c0_34, %c24], %45 {strides = array<i32>} : memref<4x4x200xf32, #tpu.memory_space<vmem>>, vector<4x4x8xf32>,
    %c0_35 = arith.constant 0 : index
    %c4 = arith.constant 4 : index
    %c0_36 = arith.constant 0 : index
    %47 = vector.load %arg17[%c0_35, %c4, %c0_36] : memref<8x8x8xf32, #tpu.memory_space<vmem>>, vector<4x4x8xf32>
    %c0_37 = arith.constant 0 : index
    %c0_38 = arith.constant 0 : index
    %c32 = arith.constant 32 : index
    %48 = vector.load %arg15[%c0_37, %c0_38, %c32] : memref<4x4x200xf32, #tpu.memory_space<vmem>>, vector<4x4x8xf32>
    tpu.vector_store %arg15[%c0_37, %c0_38, %c32], %47 {strides = array<i32>} : memref<4x4x200xf32, #tpu.memory_space<vmem>>, vector<4x4x8xf32>,
    %c1_39 = arith.constant 1 : index
    %c0_40 = arith.constant 0 : index
    %c0_41 = arith.constant 0 : index
    %49 = vector.load %arg17[%c1_39, %c0_40, %c0_41] : memref<8x8x8xf32, #tpu.memory_space<vmem>>, vector<4x4x8xf32>
    %c0_42 = arith.constant 0 : index
    %c0_43 = arith.constant 0 : index
    %c40 = arith.constant 40 : index
    %50 = vector.load %arg15[%c0_42, %c0_43, %c40] : memref<4x4x200xf32, #tpu.memory_space<vmem>>, vector<4x4x8xf32>
    tpu.vector_store %arg15[%c0_42, %c0_43, %c40], %49 {strides = array<i32>} : memref<4x4x200xf32, #tpu.memory_space<vmem>>, vector<4x4x8xf32>,
    %c1_44 = arith.constant 1 : index
    %c1_45 = arith.constant 1 : index
    %c0_46 = arith.constant 0 : index
    %51 = vector.load %arg17[%c1_44, %c1_45, %c0_46] : memref<8x8x8xf32, #tpu.memory_space<vmem>>, vector<4x4x8xf32>
    %c0_47 = arith.constant 0 : index
    %c0_48 = arith.constant 0 : index
    %c48 = arith.constant 48 : index
    %52 = vector.load %arg15[%c0_47, %c0_48, %c48] : memref<4x4x200xf32, #tpu.memory_space<vmem>>, vector<4x4x8xf32>
    tpu.vector_store %arg15[%c0_47, %c0_48, %c48], %51 {strides = array<i32>} : memref<4x4x200xf32, #tpu.memory_space<vmem>>, vector<4x4x8xf32>,
    %c1_49 = arith.constant 1 : index
    %c2_50 = arith.constant 2 : index
    %c0_51 = arith.constant 0 : index
    %53 = vector.load %arg17[%c1_49, %c2_50, %c0_51] : memref<8x8x8xf32, #tpu.memory_space<vmem>>, vector<4x4x8xf32>
    %c0_52 = arith.constant 0 : index
    %c0_53 = arith.constant 0 : index
    %c56 = arith.constant 56 : index
    %54 = vector.load %arg15[%c0_52, %c0_53, %c56] : memref<4x4x200xf32, #tpu.memory_space<vmem>>, vector<4x4x8xf32>
    tpu.vector_store %arg15[%c0_52, %c0_53, %c56], %53 {strides = array<i32>} : memref<4x4x200xf32, #tpu.memory_space<vmem>>, vector<4x4x8xf32>,
    %c1_54 = arith.constant 1 : index
    %c3_55 = arith.constant 3 : index
    %c0_56 = arith.constant 0 : index
    %55 = vector.load %arg17[%c1_54, %c3_55, %c0_56] : memref<8x8x8xf32, #tpu.memory_space<vmem>>, vector<4x4x8xf32>
    %c0_57 = arith.constant 0 : index
    %c0_58 = arith.constant 0 : index
    %c64 = arith.constant 64 : index
    %56 = vector.load %arg15[%c0_57, %c0_58, %c64] : memref<4x4x200xf32, #tpu.memory_space<vmem>>, vector<4x4x8xf32>
    tpu.vector_store %arg15[%c0_57, %c0_58, %c64], %55 {strides = array<i32>} : memref<4x4x200xf32, #tpu.memory_space<vmem>>, vector<4x4x8xf32>,
    %c1_59 = arith.constant 1 : index
    %c4_60 = arith.constant 4 : index
    %c0_61 = arith.constant 0 : index
    %57 = vector.load %arg17[%c1_59, %c4_60, %c0_61] : memref<8x8x8xf32, #tpu.memory_space<vmem>>, vector<4x4x8xf32>
    %c0_62 = arith.constant 0 : index
    %c0_63 = arith.constant 0 : index
    %c72 = arith.constant 72 : index
    %58 = vector.load %arg15[%c0_62, %c0_63, %c72] : memref<4x4x200xf32, #tpu.memory_space<vmem>>, vector<4x4x8xf32>
    tpu.vector_store %arg15[%c0_62, %c0_63, %c72], %57 {strides = array<i32>} : memref<4x4x200xf32, #tpu.memory_space<vmem>>, vector<4x4x8xf32>,
    %c2_64 = arith.constant 2 : index
    %c0_65 = arith.constant 0 : index
    %c0_66 = arith.constant 0 : index
    %59 = vector.load %arg17[%c2_64, %c0_65, %c0_66] : memref<8x8x8xf32, #tpu.memory_space<vmem>>, vector<4x4x8xf32>
    %c0_67 = arith.constant 0 : index
    %c0_68 = arith.constant 0 : index
    %c80 = arith.constant 80 : index
    %60 = vector.load %arg15[%c0_67, %c0_68, %c80] : memref<4x4x200xf32, #tpu.memory_space<vmem>>, vector<4x4x8xf32>
    tpu.vector_store %arg15[%c0_67, %c0_68, %c80], %59 {strides = array<i32>} : memref<4x4x200xf32, #tpu.memory_space<vmem>>, vector<4x4x8xf32>,
    %c2_69 = arith.constant 2 : index
    %c1_70 = arith.constant 1 : index
    %c0_71 = arith.constant 0 : index
    %61 = vector.load %arg17[%c2_69, %c1_70, %c0_71] : memref<8x8x8xf32, #tpu.memory_space<vmem>>, vector<4x4x8xf32>
    %c0_72 = arith.constant 0 : index
    %c0_73 = arith.constant 0 : index
    %c88 = arith.constant 88 : index
    %62 = vector.load %arg15[%c0_72, %c0_73, %c88] : memref<4x4x200xf32, #tpu.memory_space<vmem>>, vector<4x4x8xf32>
    tpu.vector_store %arg15[%c0_72, %c0_73, %c88], %61 {strides = array<i32>} : memref<4x4x200xf32, #tpu.memory_space<vmem>>, vector<4x4x8xf32>,
    %c2_74 = arith.constant 2 : index
    %c2_75 = arith.constant 2 : index
    %c0_76 = arith.constant 0 : index
    %63 = vector.load %arg17[%c2_74, %c2_75, %c0_76] : memref<8x8x8xf32, #tpu.memory_space<vmem>>, vector<4x4x8xf32>
    %c0_77 = arith.constant 0 : index
    %c0_78 = arith.constant 0 : index
    %c96 = arith.constant 96 : index
    %64 = vector.load %arg15[%c0_77, %c0_78, %c96] : memref<4x4x200xf32, #tpu.memory_space<vmem>>, vector<4x4x8xf32>
    tpu.vector_store %arg15[%c0_77, %c0_78, %c96], %63 {strides = array<i32>} : memref<4x4x200xf32, #tpu.memory_space<vmem>>, vector<4x4x8xf32>,
    %c2_79 = arith.constant 2 : index
    %c3_80 = arith.constant 3 : index
    %c0_81 = arith.constant 0 : index
    %65 = vector.load %arg17[%c2_79, %c3_80, %c0_81] : memref<8x8x8xf32, #tpu.memory_space<vmem>>, vector<4x4x8xf32>
    %c0_82 = arith.constant 0 : index
    %c0_83 = arith.constant 0 : index
    %c104 = arith.constant 104 : index
    %66 = vector.load %arg15[%c0_82, %c0_83, %c104] : memref<4x4x200xf32, #tpu.memory_space<vmem>>, vector<4x4x8xf32>
    tpu.vector_store %arg15[%c0_82, %c0_83, %c104], %65 {strides = array<i32>} : memref<4x4x200xf32, #tpu.memory_space<vmem>>, vector<4x4x8xf32>,
    %c2_84 = arith.constant 2 : index
    %c4_85 = arith.constant 4 : index
    %c0_86 = arith.constant 0 : index
    %67 = vector.load %arg17[%c2_84, %c4_85, %c0_86] : memref<8x8x8xf32, #tpu.memory_space<vmem>>, vector<4x4x8xf32>
    %c0_87 = arith.constant 0 : index
    %c0_88 = arith.constant 0 : index
    %c112 = arith.constant 112 : index
    %68 = vector.load %arg15[%c0_87, %c0_88, %c112] : memref<4x4x200xf32, #tpu.memory_space<vmem>>, vector<4x4x8xf32>
    tpu.vector_store %arg15[%c0_87, %c0_88, %c112], %67 {strides = array<i32>} : memref<4x4x200xf32, #tpu.memory_space<vmem>>, vector<4x4x8xf32>,
    %c3_89 = arith.constant 3 : index
    %c0_90 = arith.constant 0 : index
    %c0_91 = arith.constant 0 : index
    %69 = vector.load %arg17[%c3_89, %c0_90, %c0_91] : memref<8x8x8xf32, #tpu.memory_space<vmem>>, vector<4x4x8xf32>
    %c0_92 = arith.constant 0 : index
    %c0_93 = arith.constant 0 : index
    %c120 = arith.constant 120 : index
    %70 = vector.load %arg15[%c0_92, %c0_93, %c120] : memref<4x4x200xf32, #tpu.memory_space<vmem>>, vector<4x4x8xf32>
    tpu.vector_store %arg15[%c0_92, %c0_93, %c120], %69 {strides = array<i32>} : memref<4x4x200xf32, #tpu.memory_space<vmem>>, vector<4x4x8xf32>,
    %c3_94 = arith.constant 3 : index
    %c1_95 = arith.constant 1 : index
    %c0_96 = arith.constant 0 : index
    %71 = vector.load %arg17[%c3_94, %c1_95, %c0_96] : memref<8x8x8xf32, #tpu.memory_space<vmem>>, vector<4x4x8xf32>
    %c0_97 = arith.constant 0 : index
    %c0_98 = arith.constant 0 : index
    %c128 = arith.constant 128 : index
    %72 = vector.load %arg15[%c0_97, %c0_98, %c128] : memref<4x4x200xf32, #tpu.memory_space<vmem>>, vector<4x4x8xf32>
    tpu.vector_store %arg15[%c0_97, %c0_98, %c128], %71 {strides = array<i32>} : memref<4x4x200xf32, #tpu.memory_space<vmem>>, vector<4x4x8xf32>,
    %c3_99 = arith.constant 3 : index
    %c2_100 = arith.constant 2 : index
    %c0_101 = arith.constant 0 : index
    %73 = vector.load %arg17[%c3_99, %c2_100, %c0_101] : memref<8x8x8xf32, #tpu.memory_space<vmem>>, vector<4x4x8xf32>
    %c0_102 = arith.constant 0 : index
    %c0_103 = arith.constant 0 : index
    %c136 = arith.constant 136 : index
    %74 = vector.load %arg15[%c0_102, %c0_103, %c136] : memref<4x4x200xf32, #tpu.memory_space<vmem>>, vector<4x4x8xf32>
    tpu.vector_store %arg15[%c0_102, %c0_103, %c136], %73 {strides = array<i32>} : memref<4x4x200xf32, #tpu.memory_space<vmem>>, vector<4x4x8xf32>,
    %c3_104 = arith.constant 3 : index
    %c3_105 = arith.constant 3 : index
    %c0_106 = arith.constant 0 : index
    %75 = vector.load %arg17[%c3_104, %c3_105, %c0_106] : memref<8x8x8xf32, #tpu.memory_space<vmem>>, vector<4x4x8xf32>
    %c0_107 = arith.constant 0 : index
    %c0_108 = arith.constant 0 : index
    %c144 = arith.constant 144 : index
    %76 = vector.load %arg15[%c0_107, %c0_108, %c144] : memref<4x4x200xf32, #tpu.memory_space<vmem>>, vector<4x4x8xf32>
    tpu.vector_store %arg15[%c0_107, %c0_108, %c144], %75 {strides = array<i32>} : memref<4x4x200xf32, #tpu.memory_space<vmem>>, vector<4x4x8xf32>,
    %c3_109 = arith.constant 3 : index
    %c4_110 = arith.constant 4 : index
    %c0_111 = arith.constant 0 : index
    %77 = vector.load %arg17[%c3_109, %c4_110, %c0_111] : memref<8x8x8xf32, #tpu.memory_space<vmem>>, vector<4x4x8xf32>
    %c0_112 = arith.constant 0 : index
    %c0_113 = arith.constant 0 : index
    %c152 = arith.constant 152 : index
    %78 = vector.load %arg15[%c0_112, %c0_113, %c152] : memref<4x4x200xf32, #tpu.memory_space<vmem>>, vector<4x4x8xf32>
    tpu.vector_store %arg15[%c0_112, %c0_113, %c152], %77 {strides = array<i32>} : memref<4x4x200xf32, #tpu.memory_space<vmem>>, vector<4x4x8xf32>,
    %c4_114 = arith.constant 4 : index
    %c0_115 = arith.constant 0 : index
    %c0_116 = arith.constant 0 : index
    %79 = vector.load %arg17[%c4_114, %c0_115, %c0_116] : memref<8x8x8xf32, #tpu.memory_space<vmem>>, vector<4x4x8xf32>
    %c0_117 = arith.constant 0 : index
    %c0_118 = arith.constant 0 : index
    %c160 = arith.constant 160 : index
    %80 = vector.load %arg15[%c0_117, %c0_118, %c160] : memref<4x4x200xf32, #tpu.memory_space<vmem>>, vector<4x4x8xf32>
    tpu.vector_store %arg15[%c0_117, %c0_118, %c160], %79 {strides = array<i32>} : memref<4x4x200xf32, #tpu.memory_space<vmem>>, vector<4x4x8xf32>,
    %c4_119 = arith.constant 4 : index
    %c1_120 = arith.constant 1 : index
    %c0_121 = arith.constant 0 : index
    %81 = vector.load %arg17[%c4_119, %c1_120, %c0_121] : memref<8x8x8xf32, #tpu.memory_space<vmem>>, vector<4x4x8xf32>
    %c0_122 = arith.constant 0 : index
    %c0_123 = arith.constant 0 : index
    %c168 = arith.constant 168 : index
    %82 = vector.load %arg15[%c0_122, %c0_123, %c168] : memref<4x4x200xf32, #tpu.memory_space<vmem>>, vector<4x4x8xf32>
    tpu.vector_store %arg15[%c0_122, %c0_123, %c168], %81 {strides = array<i32>} : memref<4x4x200xf32, #tpu.memory_space<vmem>>, vector<4x4x8xf32>,
    %c4_124 = arith.constant 4 : index
    %c2_125 = arith.constant 2 : index
    %c0_126 = arith.constant 0 : index
    %83 = vector.load %arg17[%c4_124, %c2_125, %c0_126] : memref<8x8x8xf32, #tpu.memory_space<vmem>>, vector<4x4x8xf32>
    %c0_127 = arith.constant 0 : index
    %c0_128 = arith.constant 0 : index
    %c176 = arith.constant 176 : index
    %84 = vector.load %arg15[%c0_127, %c0_128, %c176] : memref<4x4x200xf32, #tpu.memory_space<vmem>>, vector<4x4x8xf32>
    tpu.vector_store %arg15[%c0_127, %c0_128, %c176], %83 {strides = array<i32>} : memref<4x4x200xf32, #tpu.memory_space<vmem>>, vector<4x4x8xf32>,
    %c4_129 = arith.constant 4 : index
    %c3_130 = arith.constant 3 : index
    %c0_131 = arith.constant 0 : index
    %85 = vector.load %arg17[%c4_129, %c3_130, %c0_131] : memref<8x8x8xf32, #tpu.memory_space<vmem>>, vector<4x4x8xf32>
    %c0_132 = arith.constant 0 : index
    %c0_133 = arith.constant 0 : index
    %c184 = arith.constant 184 : index
    %86 = vector.load %arg15[%c0_132, %c0_133, %c184] : memref<4x4x200xf32, #tpu.memory_space<vmem>>, vector<4x4x8xf32>
    tpu.vector_store %arg15[%c0_132, %c0_133, %c184], %85 {strides = array<i32>} : memref<4x4x200xf32, #tpu.memory_space<vmem>>, vector<4x4x8xf32>,
    %c4_134 = arith.constant 4 : index
    %c4_135 = arith.constant 4 : index
    %c0_136 = arith.constant 0 : index
    %87 = vector.load %arg17[%c4_134, %c4_135, %c0_136] : memref<8x8x8xf32, #tpu.memory_space<vmem>>, vector<4x4x8xf32>
    %c0_137 = arith.constant 0 : index
    %c0_138 = arith.constant 0 : index
    %c192 = arith.constant 192 : index
    %88 = vector.load %arg15[%c0_137, %c0_138, %c192] : memref<4x4x200xf32, #tpu.memory_space<vmem>>, vector<4x4x8xf32>
    tpu.vector_store %arg15[%c0_137, %c0_138, %c192], %87 {strides = array<i32>} : memref<4x4x200xf32, #tpu.memory_space<vmem>>, vector<4x4x8xf32>,
    %c0_139 = arith.constant 0 : index
    %c0_140 = arith.constant 0 : index
    %c0_141 = arith.constant 0 : index
    %89 = vector.load %arg15[%c0_139, %c0_140, %c0_141] : memref<4x4x200xf32, #tpu.memory_space<vmem>>, vector<4x4x200xf32>
    %90 = vector.shape_cast %89 : vector<4x4x200xf32> to vector<16x200xf32>
    %91 = arith.truncf %90 : vector<16x200xf32> to vector<16x200xbf16>
    %c0_142 = arith.constant 0 : index
    %c0_143 = arith.constant 0 : index
    %92 = vector.load %arg6[%c0_142, %c0_143] : memref<200x8xbf16, #tpu.memory_space<vmem>>, vector<200x8xbf16>
    %cst_144 = arith.constant dense<0.000000e+00> : vector<16x8xf32>
    %93 = tpu.matmul %91, %92, %cst_144 {dimension_numbers = #tpu.dot_dimension_numbers<[1], [0], [0], [1], [0, 0, 1, 1], [], []>} : vector<16x200xbf16>, vector<200x8xbf16>, vector<16x8xf32> -> vector<16x8xf32>
    %c0_145 = arith.constant 0 : index
    %c0_146 = arith.constant 0 : index
    %94 = vector.load %arg7[%c0_145, %c0_146] : memref<1x8xf32, #tpu.memory_space<vmem>>, vector<1x8xf32>
    %95 = vector.broadcast %94 : vector<1x8xf32> to vector<16x8xf32>
    %96 = arith.addf %93, %95 : vector<16x8xf32>
    %cst_147 = arith.constant 0.000000e+00 : f32
    %97 = vector.broadcast %cst_147 : f32 to vector<16x8xf32>
    %98 = arith.maximumf %96, %97 : vector<16x8xf32>
    %99 = vector.shape_cast %98 : vector<16x8xf32> to vector<4x4x8xf32>
    %c1_148 = arith.constant 1 : index
    %c1_149 = arith.constant 1 : index
    %c0_150 = arith.constant 0 : index
    %100 = vector.load %arg18[%c1_148, %c1_149, %c0_150] : memref<6x6x8xf32, #tpu.memory_space<vmem>>, vector<4x4x8xf32>
    tpu.vector_store %arg18[%c1_148, %c1_149, %c0_150], %99 {strides = array<i32>} : memref<6x6x8xf32, #tpu.memory_space<vmem>>, vector<4x4x8xf32>,
    %c0_151 = arith.constant 0 : index
    %c0_152 = arith.constant 0 : index
    %c0_153 = arith.constant 0 : index
    %101 = vector.load %arg18[%c0_151, %c0_152, %c0_153] : memref<6x6x8xf32, #tpu.memory_space<vmem>>, vector<4x4x8xf32>
    %c0_154 = arith.constant 0 : index
    %c0_155 = arith.constant 0 : index
    %c0_156 = arith.constant 0 : index
    %102 = vector.load %arg19[%c0_154, %c0_155, %c0_156] : memref<4x4x72xf32, #tpu.memory_space<vmem>>, vector<4x4x8xf32>
    tpu.vector_store %arg19[%c0_154, %c0_155, %c0_156], %101 {strides = array<i32>} : memref<4x4x72xf32, #tpu.memory_space<vmem>>, vector<4x4x8xf32>,
    %c0_157 = arith.constant 0 : index
    %c1_158 = arith.constant 1 : index
    %c0_159 = arith.constant 0 : index
    %103 = vector.load %arg18[%c0_157, %c1_158, %c0_159] : memref<6x6x8xf32, #tpu.memory_space<vmem>>, vector<4x4x8xf32>
    %c0_160 = arith.constant 0 : index
    %c0_161 = arith.constant 0 : index
    %c8_162 = arith.constant 8 : index
    %104 = vector.load %arg19[%c0_160, %c0_161, %c8_162] : memref<4x4x72xf32, #tpu.memory_space<vmem>>, vector<4x4x8xf32>
    tpu.vector_store %arg19[%c0_160, %c0_161, %c8_162], %103 {strides = array<i32>} : memref<4x4x72xf32, #tpu.memory_space<vmem>>, vector<4x4x8xf32>,
    %c0_163 = arith.constant 0 : index
    %c2_164 = arith.constant 2 : index
    %c0_165 = arith.constant 0 : index
    %105 = vector.load %arg18[%c0_163, %c2_164, %c0_165] : memref<6x6x8xf32, #tpu.memory_space<vmem>>, vector<4x4x8xf32>
    %c0_166 = arith.constant 0 : index
    %c0_167 = arith.constant 0 : index
    %c16_168 = arith.constant 16 : index
    %106 = vector.load %arg19[%c0_166, %c0_167, %c16_168] : memref<4x4x72xf32, #tpu.memory_space<vmem>>, vector<4x4x8xf32>
    tpu.vector_store %arg19[%c0_166, %c0_167, %c16_168], %105 {strides = array<i32>} : memref<4x4x72xf32, #tpu.memory_space<vmem>>, vector<4x4x8xf32>,
    %c1_169 = arith.constant 1 : index
    %c0_170 = arith.constant 0 : index
    %c0_171 = arith.constant 0 : index
    %107 = vector.load %arg18[%c1_169, %c0_170, %c0_171] : memref<6x6x8xf32, #tpu.memory_space<vmem>>, vector<4x4x8xf32>
    %c0_172 = arith.constant 0 : index
    %c0_173 = arith.constant 0 : index
    %c24_174 = arith.constant 24 : index
    %108 = vector.load %arg19[%c0_172, %c0_173, %c24_174] : memref<4x4x72xf32, #tpu.memory_space<vmem>>, vector<4x4x8xf32>
    tpu.vector_store %arg19[%c0_172, %c0_173, %c24_174], %107 {strides = array<i32>} : memref<4x4x72xf32, #tpu.memory_space<vmem>>, vector<4x4x8xf32>,
    %c1_175 = arith.constant 1 : index
    %c1_176 = arith.constant 1 : index
    %c0_177 = arith.constant 0 : index
    %109 = vector.load %arg18[%c1_175, %c1_176, %c0_177] : memref<6x6x8xf32, #tpu.memory_space<vmem>>, vector<4x4x8xf32>
    %c0_178 = arith.constant 0 : index
    %c0_179 = arith.constant 0 : index
    %c32_180 = arith.constant 32 : index
    %110 = vector.load %arg19[%c0_178, %c0_179, %c32_180] : memref<4x4x72xf32, #tpu.memory_space<vmem>>, vector<4x4x8xf32>
    tpu.vector_store %arg19[%c0_178, %c0_179, %c32_180], %109 {strides = array<i32>} : memref<4x4x72xf32, #tpu.memory_space<vmem>>, vector<4x4x8xf32>,
    %c1_181 = arith.constant 1 : index
    %c2_182 = arith.constant 2 : index
    %c0_183 = arith.constant 0 : index
    %111 = vector.load %arg18[%c1_181, %c2_182, %c0_183] : memref<6x6x8xf32, #tpu.memory_space<vmem>>, vector<4x4x8xf32>
    %c0_184 = arith.constant 0 : index
    %c0_185 = arith.constant 0 : index
    %c40_186 = arith.constant 40 : index
    %112 = vector.load %arg19[%c0_184, %c0_185, %c40_186] : memref<4x4x72xf32, #tpu.memory_space<vmem>>, vector<4x4x8xf32>
    tpu.vector_store %arg19[%c0_184, %c0_185, %c40_186], %111 {strides = array<i32>} : memref<4x4x72xf32, #tpu.memory_space<vmem>>, vector<4x4x8xf32>,
    %c2_187 = arith.constant 2 : index
    %c0_188 = arith.constant 0 : index
    %c0_189 = arith.constant 0 : index
    %113 = vector.load %arg18[%c2_187, %c0_188, %c0_189] : memref<6x6x8xf32, #tpu.memory_space<vmem>>, vector<4x4x8xf32>
    %c0_190 = arith.constant 0 : index
    %c0_191 = arith.constant 0 : index
    %c48_192 = arith.constant 48 : index
    %114 = vector.load %arg19[%c0_190, %c0_191, %c48_192] : memref<4x4x72xf32, #tpu.memory_space<vmem>>, vector<4x4x8xf32>
    tpu.vector_store %arg19[%c0_190, %c0_191, %c48_192], %113 {strides = array<i32>} : memref<4x4x72xf32, #tpu.memory_space<vmem>>, vector<4x4x8xf32>,
    %c2_193 = arith.constant 2 : index
    %c1_194 = arith.constant 1 : index
    %c0_195 = arith.constant 0 : index
    %115 = vector.load %arg18[%c2_193, %c1_194, %c0_195] : memref<6x6x8xf32, #tpu.memory_space<vmem>>, vector<4x4x8xf32>
    %c0_196 = arith.constant 0 : index
    %c0_197 = arith.constant 0 : index
    %c56_198 = arith.constant 56 : index
    %116 = vector.load %arg19[%c0_196, %c0_197, %c56_198] : memref<4x4x72xf32, #tpu.memory_space<vmem>>, vector<4x4x8xf32>
    tpu.vector_store %arg19[%c0_196, %c0_197, %c56_198], %115 {strides = array<i32>} : memref<4x4x72xf32, #tpu.memory_space<vmem>>, vector<4x4x8xf32>,
    %c2_199 = arith.constant 2 : index
    %c2_200 = arith.constant 2 : index
    %c0_201 = arith.constant 0 : index
    %117 = vector.load %arg18[%c2_199, %c2_200, %c0_201] : memref<6x6x8xf32, #tpu.memory_space<vmem>>, vector<4x4x8xf32>
    %c0_202 = arith.constant 0 : index
    %c0_203 = arith.constant 0 : index
    %c64_204 = arith.constant 64 : index
    %118 = vector.load %arg19[%c0_202, %c0_203, %c64_204] : memref<4x4x72xf32, #tpu.memory_space<vmem>>, vector<4x4x8xf32>
    tpu.vector_store %arg19[%c0_202, %c0_203, %c64_204], %117 {strides = array<i32>} : memref<4x4x72xf32, #tpu.memory_space<vmem>>, vector<4x4x8xf32>,
    %c0_205 = arith.constant 0 : index
    %c0_206 = arith.constant 0 : index
    %c0_207 = arith.constant 0 : index
    %119 = vector.load %arg19[%c0_205, %c0_206, %c0_207] : memref<4x4x72xf32, #tpu.memory_space<vmem>>, vector<4x4x72xf32>
    %120 = vector.shape_cast %119 : vector<4x4x72xf32> to vector<16x72xf32>
    %121 = arith.truncf %120 : vector<16x72xf32> to vector<16x72xbf16>
    %c0_208 = arith.constant 0 : index
    %c0_209 = arith.constant 0 : index
    %122 = vector.load %arg8[%c0_208, %c0_209] : memref<72x64xbf16, #tpu.memory_space<vmem>>, vector<72x64xbf16>
    %cst_210 = arith.constant dense<0.000000e+00> : vector<16x64xf32>
    %123 = tpu.matmul %121, %122, %cst_210 {dimension_numbers = #tpu.dot_dimension_numbers<[1], [0], [0], [1], [0, 0, 1, 1], [], []>} : vector<16x72xbf16>, vector<72x64xbf16>, vector<16x64xf32> -> vector<16x64xf32>
    %c0_211 = arith.constant 0 : index
    %c0_212 = arith.constant 0 : index
    %124 = vector.load %arg9[%c0_211, %c0_212] : memref<1x64xf32, #tpu.memory_space<vmem>>, vector<1x64xf32>
    %125 = vector.broadcast %124 : vector<1x64xf32> to vector<16x64xf32>
    %126 = arith.addf %123, %125 : vector<16x64xf32>
    %cst_213 = arith.constant 0.000000e+00 : f32
    %127 = vector.broadcast %cst_213 : f32 to vector<16x64xf32>
    %128 = arith.maximumf %126, %127 : vector<16x64xf32>
    %129 = vector.extract_strided_slice %128 {offsets = [0, 0], sizes = [16, 16], strides = [1, 1]} : vector<16x64xf32> to vector<16x16xf32>
    %130 = vector.shape_cast %129 : vector<16x16xf32> to vector<4x4x16xf32>
    %c0_214 = arith.constant 0 : index
    %c0_215 = arith.constant 0 : index
    %c1_216 = arith.constant 1 : index
    %c1_217 = arith.constant 1 : index
    %c0_218 = arith.constant 0 : index
    %131 = vector.load %arg20[%c0_214, %c0_215, %c1_216, %c1_217, %c0_218] : memref<2x2x6x6x16xf32, #tpu.memory_space<vmem>>, vector<1x1x4x4x16xf32>
    %132 = vector.shape_cast %131 : vector<1x1x4x4x16xf32> to vector<4x4x16xf32>
    %133 = vector.shape_cast %130 : vector<4x4x16xf32> to vector<1x1x4x4x16xf32>
    tpu.vector_store %arg20[%c0_214, %c0_215, %c1_216, %c1_217, %c0_218], %133 {strides = array<i32>} : memref<2x2x6x6x16xf32, #tpu.memory_space<vmem>>, vector<1x1x4x4x16xf32>,
    %134 = vector.extract_strided_slice %128 {offsets = [0, 16], sizes = [16, 16], strides = [1, 1]} : vector<16x64xf32> to vector<16x16xf32>
    %135 = vector.shape_cast %134 : vector<16x16xf32> to vector<4x4x16xf32>
    %c0_219 = arith.constant 0 : index
    %c1_220 = arith.constant 1 : index
    %c1_221 = arith.constant 1 : index
    %c1_222 = arith.constant 1 : index
    %c0_223 = arith.constant 0 : index
    %136 = vector.load %arg20[%c0_219, %c1_220, %c1_221, %c1_222, %c0_223] : memref<2x2x6x6x16xf32, #tpu.memory_space<vmem>>, vector<1x1x4x4x16xf32>
    %137 = vector.shape_cast %136 : vector<1x1x4x4x16xf32> to vector<4x4x16xf32>
    %138 = vector.shape_cast %135 : vector<4x4x16xf32> to vector<1x1x4x4x16xf32>
    tpu.vector_store %arg20[%c0_219, %c1_220, %c1_221, %c1_222, %c0_223], %138 {strides = array<i32>} : memref<2x2x6x6x16xf32, #tpu.memory_space<vmem>>, vector<1x1x4x4x16xf32>,
    %139 = vector.extract_strided_slice %128 {offsets = [0, 32], sizes = [16, 16], strides = [1, 1]} : vector<16x64xf32> to vector<16x16xf32>
    %140 = vector.shape_cast %139 : vector<16x16xf32> to vector<4x4x16xf32>
    %c1_224 = arith.constant 1 : index
    %c0_225 = arith.constant 0 : index
    %c1_226 = arith.constant 1 : index
    %c1_227 = arith.constant 1 : index
    %c0_228 = arith.constant 0 : index
    %141 = vector.load %arg20[%c1_224, %c0_225, %c1_226, %c1_227, %c0_228] : memref<2x2x6x6x16xf32, #tpu.memory_space<vmem>>, vector<1x1x4x4x16xf32>
    %142 = vector.shape_cast %141 : vector<1x1x4x4x16xf32> to vector<4x4x16xf32>
    %143 = vector.shape_cast %140 : vector<4x4x16xf32> to vector<1x1x4x4x16xf32>
    tpu.vector_store %arg20[%c1_224, %c0_225, %c1_226, %c1_227, %c0_228], %143 {strides = array<i32>} : memref<2x2x6x6x16xf32, #tpu.memory_space<vmem>>, vector<1x1x4x4x16xf32>,
    %144 = vector.extract_strided_slice %128 {offsets = [0, 48], sizes = [16, 16], strides = [1, 1]} : vector<16x64xf32> to vector<16x16xf32>
    %145 = vector.shape_cast %144 : vector<16x16xf32> to vector<4x4x16xf32>
    %c1_229 = arith.constant 1 : index
    %c1_230 = arith.constant 1 : index
    %c1_231 = arith.constant 1 : index
    %c1_232 = arith.constant 1 : index
    %c0_233 = arith.constant 0 : index
    %146 = vector.load %arg20[%c1_229, %c1_230, %c1_231, %c1_232, %c0_233] : memref<2x2x6x6x16xf32, #tpu.memory_space<vmem>>, vector<1x1x4x4x16xf32>
    %147 = vector.shape_cast %146 : vector<1x1x4x4x16xf32> to vector<4x4x16xf32>
    %148 = vector.shape_cast %145 : vector<4x4x16xf32> to vector<1x1x4x4x16xf32>
    tpu.vector_store %arg20[%c1_229, %c1_230, %c1_231, %c1_232, %c0_233], %148 {strides = array<i32>} : memref<2x2x6x6x16xf32, #tpu.memory_space<vmem>>, vector<1x1x4x4x16xf32>,
    %c1_234 = arith.constant 1 : index
    %c1_235 = arith.constant 1 : index
    %c0_236 = arith.constant 0 : index
    %c0_237 = arith.constant 0 : index
    %c0_238 = arith.constant 0 : index
    %149 = vector.load %arg20[%c1_234, %c1_235, %c0_236, %c0_237, %c0_238] : memref<2x2x6x6x16xf32, #tpu.memory_space<vmem>>, vector<1x1x4x4x16xf32>
    %150 = vector.shape_cast %149 : vector<1x1x4x4x16xf32> to vector<4x4x16xf32>
    %c0_239 = arith.constant 0 : index
    %c0_240 = arith.constant 0 : index
    %c0_241 = arith.constant 0 : index
    %151 = vector.load %arg21[%c0_239, %c0_240, %c0_241] : memref<4x4x144xf32, #tpu.memory_space<vmem>>, vector<4x4x16xf32>
    tpu.vector_store %arg21[%c0_239, %c0_240, %c0_241], %150 {strides = array<i32>} : memref<4x4x144xf32, #tpu.memory_space<vmem>>, vector<4x4x16xf32>,
    %c1_242 = arith.constant 1 : index
    %c0_243 = arith.constant 0 : index
    %c0_244 = arith.constant 0 : index
    %c1_245 = arith.constant 1 : index
    %c0_246 = arith.constant 0 : index
    %152 = vector.load %arg20[%c1_242, %c0_243, %c0_244, %c1_245, %c0_246] : memref<2x2x6x6x16xf32, #tpu.memory_space<vmem>>, vector<1x1x4x4x16xf32>
    %153 = vector.shape_cast %152 : vector<1x1x4x4x16xf32> to vector<4x4x16xf32>
    %c0_247 = arith.constant 0 : index
    %c0_248 = arith.constant 0 : index
    %c16_249 = arith.constant 16 : index
    %154 = vector.load %arg21[%c0_247, %c0_248, %c16_249] : memref<4x4x144xf32, #tpu.memory_space<vmem>>, vector<4x4x16xf32>
    tpu.vector_store %arg21[%c0_247, %c0_248, %c16_249], %153 {strides = array<i32>} : memref<4x4x144xf32, #tpu.memory_space<vmem>>, vector<4x4x16xf32>,
    %c1_250 = arith.constant 1 : index
    %c1_251 = arith.constant 1 : index
    %c0_252 = arith.constant 0 : index
    %c1_253 = arith.constant 1 : index
    %c0_254 = arith.constant 0 : index
    %155 = vector.load %arg20[%c1_250, %c1_251, %c0_252, %c1_253, %c0_254] : memref<2x2x6x6x16xf32, #tpu.memory_space<vmem>>, vector<1x1x4x4x16xf32>
    %156 = vector.shape_cast %155 : vector<1x1x4x4x16xf32> to vector<4x4x16xf32>
    %c0_255 = arith.constant 0 : index
    %c0_256 = arith.constant 0 : index
    %c32_257 = arith.constant 32 : index
    %157 = vector.load %arg21[%c0_255, %c0_256, %c32_257] : memref<4x4x144xf32, #tpu.memory_space<vmem>>, vector<4x4x16xf32>
    tpu.vector_store %arg21[%c0_255, %c0_256, %c32_257], %156 {strides = array<i32>} : memref<4x4x144xf32, #tpu.memory_space<vmem>>, vector<4x4x16xf32>,
    %c0_258 = arith.constant 0 : index
    %c1_259 = arith.constant 1 : index
    %c1_260 = arith.constant 1 : index
    %c0_261 = arith.constant 0 : index
    %c0_262 = arith.constant 0 : index
    %158 = vector.load %arg20[%c0_258, %c1_259, %c1_260, %c0_261, %c0_262] : memref<2x2x6x6x16xf32, #tpu.memory_space<vmem>>, vector<1x1x4x4x16xf32>
    %159 = vector.shape_cast %158 : vector<1x1x4x4x16xf32> to vector<4x4x16xf32>
    %c0_263 = arith.constant 0 : index
    %c0_264 = arith.constant 0 : index
    %c48_265 = arith.constant 48 : index
    %160 = vector.load %arg21[%c0_263, %c0_264, %c48_265] : memref<4x4x144xf32, #tpu.memory_space<vmem>>, vector<4x4x16xf32>
    tpu.vector_store %arg21[%c0_263, %c0_264, %c48_265], %159 {strides = array<i32>} : memref<4x4x144xf32, #tpu.memory_space<vmem>>, vector<4x4x16xf32>,
    %c0_266 = arith.constant 0 : index
    %c0_267 = arith.constant 0 : index
    %c1_268 = arith.constant 1 : index
    %c1_269 = arith.constant 1 : index
    %c0_270 = arith.constant 0 : index
    %161 = vector.load %arg20[%c0_266, %c0_267, %c1_268, %c1_269, %c0_270] : memref<2x2x6x6x16xf32, #tpu.memory_space<vmem>>, vector<1x1x4x4x16xf32>
    %162 = vector.shape_cast %161 : vector<1x1x4x4x16xf32> to vector<4x4x16xf32>
    %c0_271 = arith.constant 0 : index
    %c0_272 = arith.constant 0 : index
    %c64_273 = arith.constant 64 : index
    %163 = vector.load %arg21[%c0_271, %c0_272, %c64_273] : memref<4x4x144xf32, #tpu.memory_space<vmem>>, vector<4x4x16xf32>
    tpu.vector_store %arg21[%c0_271, %c0_272, %c64_273], %162 {strides = array<i32>} : memref<4x4x144xf32, #tpu.memory_space<vmem>>, vector<4x4x16xf32>,
    %c0_274 = arith.constant 0 : index
    %c1_275 = arith.constant 1 : index
    %c1_276 = arith.constant 1 : index
    %c1_277 = arith.constant 1 : index
    %c0_278 = arith.constant 0 : index
    %164 = vector.load %arg20[%c0_274, %c1_275, %c1_276, %c1_277, %c0_278] : memref<2x2x6x6x16xf32, #tpu.memory_space<vmem>>, vector<1x1x4x4x16xf32>
    %165 = vector.shape_cast %164 : vector<1x1x4x4x16xf32> to vector<4x4x16xf32>
    %c0_279 = arith.constant 0 : index
    %c0_280 = arith.constant 0 : index
    %c80_281 = arith.constant 80 : index
    %166 = vector.load %arg21[%c0_279, %c0_280, %c80_281] : memref<4x4x144xf32, #tpu.memory_space<vmem>>, vector<4x4x16xf32>
    tpu.vector_store %arg21[%c0_279, %c0_280, %c80_281], %165 {strides = array<i32>} : memref<4x4x144xf32, #tpu.memory_space<vmem>>, vector<4x4x16xf32>,
    %c1_282 = arith.constant 1 : index
    %c1_283 = arith.constant 1 : index
    %c1_284 = arith.constant 1 : index
    %c0_285 = arith.constant 0 : index
    %c0_286 = arith.constant 0 : index
    %167 = vector.load %arg20[%c1_282, %c1_283, %c1_284, %c0_285, %c0_286] : memref<2x2x6x6x16xf32, #tpu.memory_space<vmem>>, vector<1x1x4x4x16xf32>
    %168 = vector.shape_cast %167 : vector<1x1x4x4x16xf32> to vector<4x4x16xf32>
    %c0_287 = arith.constant 0 : index
    %c0_288 = arith.constant 0 : index
    %c96_289 = arith.constant 96 : index
    %169 = vector.load %arg21[%c0_287, %c0_288, %c96_289] : memref<4x4x144xf32, #tpu.memory_space<vmem>>, vector<4x4x16xf32>
    tpu.vector_store %arg21[%c0_287, %c0_288, %c96_289], %168 {strides = array<i32>} : memref<4x4x144xf32, #tpu.memory_space<vmem>>, vector<4x4x16xf32>,
    %c1_290 = arith.constant 1 : index
    %c0_291 = arith.constant 0 : index
    %c1_292 = arith.constant 1 : index
    %c1_293 = arith.constant 1 : index
    %c0_294 = arith.constant 0 : index
    %170 = vector.load %arg20[%c1_290, %c0_291, %c1_292, %c1_293, %c0_294] : memref<2x2x6x6x16xf32, #tpu.memory_space<vmem>>, vector<1x1x4x4x16xf32>
    %171 = vector.shape_cast %170 : vector<1x1x4x4x16xf32> to vector<4x4x16xf32>
    %c0_295 = arith.constant 0 : index
    %c0_296 = arith.constant 0 : index
    %c112_297 = arith.constant 112 : index
    %172 = vector.load %arg21[%c0_295, %c0_296, %c112_297] : memref<4x4x144xf32, #tpu.memory_space<vmem>>, vector<4x4x16xf32>
    tpu.vector_store %arg21[%c0_295, %c0_296, %c112_297], %171 {strides = array<i32>} : memref<4x4x144xf32, #tpu.memory_space<vmem>>, vector<4x4x16xf32>,
    %c1_298 = arith.constant 1 : index
    %c1_299 = arith.constant 1 : index
    %c1_300 = arith.constant 1 : index
    %c1_301 = arith.constant 1 : index
    %c0_302 = arith.constant 0 : index
    %173 = vector.load %arg20[%c1_298, %c1_299, %c1_300, %c1_301, %c0_302] : memref<2x2x6x6x16xf32, #tpu.memory_space<vmem>>, vector<1x1x4x4x16xf32>
    %174 = vector.shape_cast %173 : vector<1x1x4x4x16xf32> to vector<4x4x16xf32>
    %c0_303 = arith.constant 0 : index
    %c0_304 = arith.constant 0 : index
    %c128_305 = arith.constant 128 : index
    %175 = vector.load %arg21[%c0_303, %c0_304, %c128_305] : memref<4x4x144xf32, #tpu.memory_space<vmem>>, vector<4x4x16xf32>
    tpu.vector_store %arg21[%c0_303, %c0_304, %c128_305], %174 {strides = array<i32>} : memref<4x4x144xf32, #tpu.memory_space<vmem>>, vector<4x4x16xf32>,
    %c0_306 = arith.constant 0 : index
    %c0_307 = arith.constant 0 : index
    %c0_308 = arith.constant 0 : index
    %176 = vector.load %arg21[%c0_306, %c0_307, %c0_308] : memref<4x4x144xf32, #tpu.memory_space<vmem>>, vector<4x4x144xf32>
    %177 = vector.shape_cast %176 : vector<4x4x144xf32> to vector<16x144xf32>
    %178 = arith.truncf %177 : vector<16x144xf32> to vector<16x144xbf16>
    %c0_309 = arith.constant 0 : index
    %c0_310 = arith.constant 0 : index
    %179 = vector.load %arg10[%c0_309, %c0_310] : memref<144x12xbf16, #tpu.memory_space<vmem>>, vector<144x12xbf16>
    %cst_311 = arith.constant dense<0.000000e+00> : vector<16x12xf32>
    %180 = tpu.matmul %178, %179, %cst_311 {dimension_numbers = #tpu.dot_dimension_numbers<[1], [0], [0], [1], [0, 0, 1, 1], [], []>} : vector<16x144xbf16>, vector<144x12xbf16>, vector<16x12xf32> -> vector<16x12xf32>
    %c0_312 = arith.constant 0 : index
    %c0_313 = arith.constant 0 : index
    %181 = vector.load %arg11[%c0_312, %c0_313] : memref<1x12xf32, #tpu.memory_space<vmem>>, vector<1x12xf32>
    %182 = vector.broadcast %181 : vector<1x12xf32> to vector<16x12xf32>
    %183 = arith.addf %180, %182 : vector<16x12xf32>
    %c0_314 = arith.constant 0 : index
    %c0_315 = arith.constant 0 : index
    %c0_316 = arith.constant 0 : index
    %184 = vector.load %arg12[%c0_314, %c0_315, %c0_316] : memref<1x64x12xf32, #tpu.memory_space<vmem>>, vector<1x16x12xf32>
    %185 = vector.shape_cast %184 : vector<1x16x12xf32> to vector<16x12xf32>
    %186 = arith.addf %185, %183 : vector<16x12xf32>
    %c0_317 = arith.constant 0 : index
    %c0_318 = arith.constant 0 : index
    %c0_319 = arith.constant 0 : index
    %187 = vector.load %arg12[%c0_317, %c0_318, %c0_319] : memref<1x64x12xf32, #tpu.memory_space<vmem>>, vector<1x16x12xf32>
    %188 = vector.shape_cast %187 : vector<1x16x12xf32> to vector<16x12xf32>
    %189 = vector.shape_cast %186 : vector<16x12xf32> to vector<1x16x12xf32>
    tpu.vector_store %arg12[%c0_317, %c0_318, %c0_319], %189 {strides = array<i32>} : memref<1x64x12xf32, #tpu.memory_space<vmem>>, vector<1x16x12xf32>,
    %c1_320 = arith.constant 1 : index
    %c0_321 = arith.constant 0 : index
    %c0_322 = arith.constant 0 : index
    %c1_323 = arith.constant 1 : index
    %c0_324 = arith.constant 0 : index
    %190 = vector.load %arg20[%c1_320, %c0_321, %c0_322, %c1_323, %c0_324] : memref<2x2x6x6x16xf32, #tpu.memory_space<vmem>>, vector<1x1x4x4x16xf32>
    %191 = vector.shape_cast %190 : vector<1x1x4x4x16xf32> to vector<4x4x16xf32>
    %c0_325 = arith.constant 0 : index
    %c0_326 = arith.constant 0 : index
    %c0_327 = arith.constant 0 : index
    %192 = vector.load %arg21[%c0_325, %c0_326, %c0_327] : memref<4x4x144xf32, #tpu.memory_space<vmem>>, vector<4x4x16xf32>
    tpu.vector_store %arg21[%c0_325, %c0_326, %c0_327], %191 {strides = array<i32>} : memref<4x4x144xf32, #tpu.memory_space<vmem>>, vector<4x4x16xf32>,
    %c1_328 = arith.constant 1 : index
    %c1_329 = arith.constant 1 : index
    %c0_330 = arith.constant 0 : index
    %c1_331 = arith.constant 1 : index
    %c0_332 = arith.constant 0 : index
    %193 = vector.load %arg20[%c1_328, %c1_329, %c0_330, %c1_331, %c0_332] : memref<2x2x6x6x16xf32, #tpu.memory_space<vmem>>, vector<1x1x4x4x16xf32>
    %194 = vector.shape_cast %193 : vector<1x1x4x4x16xf32> to vector<4x4x16xf32>
    %c0_333 = arith.constant 0 : index
    %c0_334 = arith.constant 0 : index
    %c16_335 = arith.constant 16 : index
    %195 = vector.load %arg21[%c0_333, %c0_334, %c16_335] : memref<4x4x144xf32, #tpu.memory_space<vmem>>, vector<4x4x16xf32>
    tpu.vector_store %arg21[%c0_333, %c0_334, %c16_335], %194 {strides = array<i32>} : memref<4x4x144xf32, #tpu.memory_space<vmem>>, vector<4x4x16xf32>,
    %c1_336 = arith.constant 1 : index
    %c0_337 = arith.constant 0 : index
    %c0_338 = arith.constant 0 : index
    %c2_339 = arith.constant 2 : index
    %c0_340 = arith.constant 0 : index
    %196 = vector.load %arg20[%c1_336, %c0_337, %c0_338, %c2_339, %c0_340] : memref<2x2x6x6x16xf32, #tpu.memory_space<vmem>>, vector<1x1x4x4x16xf32>
    %197 = vector.shape_cast %196 : vector<1x1x4x4x16xf32> to vector<4x4x16xf32>
    %c0_341 = arith.constant 0 : index
    %c0_342 = arith.constant 0 : index
    %c32_343 = arith.constant 32 : index
    %198 = vector.load %arg21[%c0_341, %c0_342, %c32_343] : memref<4x4x144xf32, #tpu.memory_space<vmem>>, vector<4x4x16xf32>
    tpu.vector_store %arg21[%c0_341, %c0_342, %c32_343], %197 {strides = array<i32>} : memref<4x4x144xf32, #tpu.memory_space<vmem>>, vector<4x4x16xf32>,
    %c0_344 = arith.constant 0 : index
    %c0_345 = arith.constant 0 : index
    %c1_346 = arith.constant 1 : index
    %c1_347 = arith.constant 1 : index
    %c0_348 = arith.constant 0 : index
    %199 = vector.load %arg20[%c0_344, %c0_345, %c1_346, %c1_347, %c0_348] : memref<2x2x6x6x16xf32, #tpu.memory_space<vmem>>, vector<1x1x4x4x16xf32>
    %200 = vector.shape_cast %199 : vector<1x1x4x4x16xf32> to vector<4x4x16xf32>
    %c0_349 = arith.constant 0 : index
    %c0_350 = arith.constant 0 : index
    %c48_351 = arith.constant 48 : index
    %201 = vector.load %arg21[%c0_349, %c0_350, %c48_351] : memref<4x4x144xf32, #tpu.memory_space<vmem>>, vector<4x4x16xf32>
    tpu.vector_store %arg21[%c0_349, %c0_350, %c48_351], %200 {strides = array<i32>} : memref<4x4x144xf32, #tpu.memory_space<vmem>>, vector<4x4x16xf32>,
    %c0_352 = arith.constant 0 : index
    %c1_353 = arith.constant 1 : index
    %c1_354 = arith.constant 1 : index
    %c1_355 = arith.constant 1 : index
    %c0_356 = arith.constant 0 : index
    %202 = vector.load %arg20[%c0_352, %c1_353, %c1_354, %c1_355, %c0_356] : memref<2x2x6x6x16xf32, #tpu.memory_space<vmem>>, vector<1x1x4x4x16xf32>
    %203 = vector.shape_cast %202 : vector<1x1x4x4x16xf32> to vector<4x4x16xf32>
    %c0_357 = arith.constant 0 : index
    %c0_358 = arith.constant 0 : index
    %c64_359 = arith.constant 64 : index
    %204 = vector.load %arg21[%c0_357, %c0_358, %c64_359] : memref<4x4x144xf32, #tpu.memory_space<vmem>>, vector<4x4x16xf32>
    tpu.vector_store %arg21[%c0_357, %c0_358, %c64_359], %203 {strides = array<i32>} : memref<4x4x144xf32, #tpu.memory_space<vmem>>, vector<4x4x16xf32>,
    %c0_360 = arith.constant 0 : index
    %c0_361 = arith.constant 0 : index
    %c1_362 = arith.constant 1 : index
    %c2_363 = arith.constant 2 : index
    %c0_364 = arith.constant 0 : index
    %205 = vector.load %arg20[%c0_360, %c0_361, %c1_362, %c2_363, %c0_364] : memref<2x2x6x6x16xf32, #tpu.memory_space<vmem>>, vector<1x1x4x4x16xf32>
    %206 = vector.shape_cast %205 : vector<1x1x4x4x16xf32> to vector<4x4x16xf32>
    %c0_365 = arith.constant 0 : index
    %c0_366 = arith.constant 0 : index
    %c80_367 = arith.constant 80 : index
    %207 = vector.load %arg21[%c0_365, %c0_366, %c80_367] : memref<4x4x144xf32, #tpu.memory_space<vmem>>, vector<4x4x16xf32>
    tpu.vector_store %arg21[%c0_365, %c0_366, %c80_367], %206 {strides = array<i32>} : memref<4x4x144xf32, #tpu.memory_space<vmem>>, vector<4x4x16xf32>,
    %c1_368 = arith.constant 1 : index
    %c0_369 = arith.constant 0 : index
    %c1_370 = arith.constant 1 : index
    %c1_371 = arith.constant 1 : index
    %c0_372 = arith.constant 0 : index
    %208 = vector.load %arg20[%c1_368, %c0_369, %c1_370, %c1_371, %c0_372] : memref<2x2x6x6x16xf32, #tpu.memory_space<vmem>>, vector<1x1x4x4x16xf32>
    %209 = vector.shape_cast %208 : vector<1x1x4x4x16xf32> to vector<4x4x16xf32>
    %c0_373 = arith.constant 0 : index
    %c0_374 = arith.constant 0 : index
    %c96_375 = arith.constant 96 : index
    %210 = vector.load %arg21[%c0_373, %c0_374, %c96_375] : memref<4x4x144xf32, #tpu.memory_space<vmem>>, vector<4x4x16xf32>
    tpu.vector_store %arg21[%c0_373, %c0_374, %c96_375], %209 {strides = array<i32>} : memref<4x4x144xf32, #tpu.memory_space<vmem>>, vector<4x4x16xf32>,
    %c1_376 = arith.constant 1 : index
    %c1_377 = arith.constant 1 : index
    %c1_378 = arith.constant 1 : index
    %c1_379 = arith.constant 1 : index
    %c0_380 = arith.constant 0 : index
    %211 = vector.load %arg20[%c1_376, %c1_377, %c1_378, %c1_379, %c0_380] : memref<2x2x6x6x16xf32, #tpu.memory_space<vmem>>, vector<1x1x4x4x16xf32>
    %212 = vector.shape_cast %211 : vector<1x1x4x4x16xf32> to vector<4x4x16xf32>
    %c0_381 = arith.constant 0 : index
    %c0_382 = arith.constant 0 : index
    %c112_383 = arith.constant 112 : index
    %213 = vector.load %arg21[%c0_381, %c0_382, %c112_383] : memref<4x4x144xf32, #tpu.memory_space<vmem>>, vector<4x4x16xf32>
    tpu.vector_store %arg21[%c0_381, %c0_382, %c112_383], %212 {strides = array<i32>} : memref<4x4x144xf32, #tpu.memory_space<vmem>>, vector<4x4x16xf32>,
    %c1_384 = arith.constant 1 : index
    %c0_385 = arith.constant 0 : index
    %c1_386 = arith.constant 1 : index
    %c2_387 = arith.constant 2 : index
    %c0_388 = arith.constant 0 : index
    %214 = vector.load %arg20[%c1_384, %c0_385, %c1_386, %c2_387, %c0_388] : memref<2x2x6x6x16xf32, #tpu.memory_space<vmem>>, vector<1x1x4x4x16xf32>
    %215 = vector.shape_cast %214 : vector<1x1x4x4x16xf32> to vector<4x4x16xf32>
    %c0_389 = arith.constant 0 : index
    %c0_390 = arith.constant 0 : index
    %c128_391 = arith.constant 128 : index
    %216 = vector.load %arg21[%c0_389, %c0_390, %c128_391] : memref<4x4x144xf32, #tpu.memory_space<vmem>>, vector<4x4x16xf32>
    tpu.vector_store %arg21[%c0_389, %c0_390, %c128_391], %215 {strides = array<i32>} : memref<4x4x144xf32, #tpu.memory_space<vmem>>, vector<4x4x16xf32>,
    %c0_392 = arith.constant 0 : index
    %c0_393 = arith.constant 0 : index
    %c0_394 = arith.constant 0 : index
    %217 = vector.load %arg21[%c0_392, %c0_393, %c0_394] : memref<4x4x144xf32, #tpu.memory_space<vmem>>, vector<4x4x144xf32>
    %218 = vector.shape_cast %217 : vector<4x4x144xf32> to vector<16x144xf32>
    %219 = arith.truncf %218 : vector<16x144xf32> to vector<16x144xbf16>
    %c0_395 = arith.constant 0 : index
    %c0_396 = arith.constant 0 : index
    %220 = vector.load %arg10[%c0_395, %c0_396] : memref<144x12xbf16, #tpu.memory_space<vmem>>, vector<144x12xbf16>
    %cst_397 = arith.constant dense<0.000000e+00> : vector<16x12xf32>
    %221 = tpu.matmul %219, %220, %cst_397 {dimension_numbers = #tpu.dot_dimension_numbers<[1], [0], [0], [1], [0, 0, 1, 1], [], []>} : vector<16x144xbf16>, vector<144x12xbf16>, vector<16x12xf32> -> vector<16x12xf32>
    %c0_398 = arith.constant 0 : index
    %c0_399 = arith.constant 0 : index
    %222 = vector.load %arg11[%c0_398, %c0_399] : memref<1x12xf32, #tpu.memory_space<vmem>>, vector<1x12xf32>
    %223 = vector.broadcast %222 : vector<1x12xf32> to vector<16x12xf32>
    %224 = arith.addf %221, %223 : vector<16x12xf32>
    %c0_400 = arith.constant 0 : index
    %c16_401 = arith.constant 16 : index
    %c0_402 = arith.constant 0 : index
    %225 = vector.load %arg12[%c0_400, %c16_401, %c0_402] : memref<1x64x12xf32, #tpu.memory_space<vmem>>, vector<1x16x12xf32>
    %226 = vector.shape_cast %225 : vector<1x16x12xf32> to vector<16x12xf32>
    %227 = arith.addf %226, %224 : vector<16x12xf32>
    %c0_403 = arith.constant 0 : index
    %c16_404 = arith.constant 16 : index
    %c0_405 = arith.constant 0 : index
    %228 = vector.load %arg12[%c0_403, %c16_404, %c0_405] : memref<1x64x12xf32, #tpu.memory_space<vmem>>, vector<1x16x12xf32>
    %229 = vector.shape_cast %228 : vector<1x16x12xf32> to vector<16x12xf32>
    %230 = vector.shape_cast %227 : vector<16x12xf32> to vector<1x16x12xf32>
    tpu.vector_store %arg12[%c0_403, %c16_404, %c0_405], %230 {strides = array<i32>} : memref<1x64x12xf32, #tpu.memory_space<vmem>>, vector<1x16x12xf32>,
    %c0_406 = arith.constant 0 : index
    %c1_407 = arith.constant 1 : index
    %c1_408 = arith.constant 1 : index
    %c0_409 = arith.constant 0 : index
    %c0_410 = arith.constant 0 : index
    %231 = vector.load %arg20[%c0_406, %c1_407, %c1_408, %c0_409, %c0_410] : memref<2x2x6x6x16xf32, #tpu.memory_space<vmem>>, vector<1x1x4x4x16xf32>
    %232 = vector.shape_cast %231 : vector<1x1x4x4x16xf32> to vector<4x4x16xf32>
    %c0_411 = arith.constant 0 : index
    %c0_412 = arith.constant 0 : index
    %c0_413 = arith.constant 0 : index
    %233 = vector.load %arg21[%c0_411, %c0_412, %c0_413] : memref<4x4x144xf32, #tpu.memory_space<vmem>>, vector<4x4x16xf32>
    tpu.vector_store %arg21[%c0_411, %c0_412, %c0_413], %232 {strides = array<i32>} : memref<4x4x144xf32, #tpu.memory_space<vmem>>, vector<4x4x16xf32>,
    %c0_414 = arith.constant 0 : index
    %c0_415 = arith.constant 0 : index
    %c1_416 = arith.constant 1 : index
    %c1_417 = arith.constant 1 : index
    %c0_418 = arith.constant 0 : index
    %234 = vector.load %arg20[%c0_414, %c0_415, %c1_416, %c1_417, %c0_418] : memref<2x2x6x6x16xf32, #tpu.memory_space<vmem>>, vector<1x1x4x4x16xf32>
    %235 = vector.shape_cast %234 : vector<1x1x4x4x16xf32> to vector<4x4x16xf32>
    %c0_419 = arith.constant 0 : index
    %c0_420 = arith.constant 0 : index
    %c16_421 = arith.constant 16 : index
    %236 = vector.load %arg21[%c0_419, %c0_420, %c16_421] : memref<4x4x144xf32, #tpu.memory_space<vmem>>, vector<4x4x16xf32>
    tpu.vector_store %arg21[%c0_419, %c0_420, %c16_421], %235 {strides = array<i32>} : memref<4x4x144xf32, #tpu.memory_space<vmem>>, vector<4x4x16xf32>,
    %c0_422 = arith.constant 0 : index
    %c1_423 = arith.constant 1 : index
    %c1_424 = arith.constant 1 : index
    %c1_425 = arith.constant 1 : index
    %c0_426 = arith.constant 0 : index
    %237 = vector.load %arg20[%c0_422, %c1_423, %c1_424, %c1_425, %c0_426] : memref<2x2x6x6x16xf32, #tpu.memory_space<vmem>>, vector<1x1x4x4x16xf32>
    %238 = vector.shape_cast %237 : vector<1x1x4x4x16xf32> to vector<4x4x16xf32>
    %c0_427 = arith.constant 0 : index
    %c0_428 = arith.constant 0 : index
    %c32_429 = arith.constant 32 : index
    %239 = vector.load %arg21[%c0_427, %c0_428, %c32_429] : memref<4x4x144xf32, #tpu.memory_space<vmem>>, vector<4x4x16xf32>
    tpu.vector_store %arg21[%c0_427, %c0_428, %c32_429], %238 {strides = array<i32>} : memref<4x4x144xf32, #tpu.memory_space<vmem>>, vector<4x4x16xf32>,
    %c1_430 = arith.constant 1 : index
    %c1_431 = arith.constant 1 : index
    %c1_432 = arith.constant 1 : index
    %c0_433 = arith.constant 0 : index
    %c0_434 = arith.constant 0 : index
    %240 = vector.load %arg20[%c1_430, %c1_431, %c1_432, %c0_433, %c0_434] : memref<2x2x6x6x16xf32, #tpu.memory_space<vmem>>, vector<1x1x4x4x16xf32>
    %241 = vector.shape_cast %240 : vector<1x1x4x4x16xf32> to vector<4x4x16xf32>
    %c0_435 = arith.constant 0 : index
    %c0_436 = arith.constant 0 : index
    %c48_437 = arith.constant 48 : index
    %242 = vector.load %arg21[%c0_435, %c0_436, %c48_437] : memref<4x4x144xf32, #tpu.memory_space<vmem>>, vector<4x4x16xf32>
    tpu.vector_store %arg21[%c0_435, %c0_436, %c48_437], %241 {strides = array<i32>} : memref<4x4x144xf32, #tpu.memory_space<vmem>>, vector<4x4x16xf32>,
    %c1_438 = arith.constant 1 : index
    %c0_439 = arith.constant 0 : index
    %c1_440 = arith.constant 1 : index
    %c1_441 = arith.constant 1 : index
    %c0_442 = arith.constant 0 : index
    %243 = vector.load %arg20[%c1_438, %c0_439, %c1_440, %c1_441, %c0_442] : memref<2x2x6x6x16xf32, #tpu.memory_space<vmem>>, vector<1x1x4x4x16xf32>
    %244 = vector.shape_cast %243 : vector<1x1x4x4x16xf32> to vector<4x4x16xf32>
    %c0_443 = arith.constant 0 : index
    %c0_444 = arith.constant 0 : index
    %c64_445 = arith.constant 64 : index
    %245 = vector.load %arg21[%c0_443, %c0_444, %c64_445] : memref<4x4x144xf32, #tpu.memory_space<vmem>>, vector<4x4x16xf32>
    tpu.vector_store %arg21[%c0_443, %c0_444, %c64_445], %244 {strides = array<i32>} : memref<4x4x144xf32, #tpu.memory_space<vmem>>, vector<4x4x16xf32>,
    %c1_446 = arith.constant 1 : index
    %c1_447 = arith.constant 1 : index
    %c1_448 = arith.constant 1 : index
    %c1_449 = arith.constant 1 : index
    %c0_450 = arith.constant 0 : index
    %246 = vector.load %arg20[%c1_446, %c1_447, %c1_448, %c1_449, %c0_450] : memref<2x2x6x6x16xf32, #tpu.memory_space<vmem>>, vector<1x1x4x4x16xf32>
    %247 = vector.shape_cast %246 : vector<1x1x4x4x16xf32> to vector<4x4x16xf32>
    %c0_451 = arith.constant 0 : index
    %c0_452 = arith.constant 0 : index
    %c80_453 = arith.constant 80 : index
    %248 = vector.load %arg21[%c0_451, %c0_452, %c80_453] : memref<4x4x144xf32, #tpu.memory_space<vmem>>, vector<4x4x16xf32>
    tpu.vector_store %arg21[%c0_451, %c0_452, %c80_453], %247 {strides = array<i32>} : memref<4x4x144xf32, #tpu.memory_space<vmem>>, vector<4x4x16xf32>,
    %c0_454 = arith.constant 0 : index
    %c1_455 = arith.constant 1 : index
    %c2_456 = arith.constant 2 : index
    %c0_457 = arith.constant 0 : index
    %c0_458 = arith.constant 0 : index
    %249 = vector.load %arg20[%c0_454, %c1_455, %c2_456, %c0_457, %c0_458] : memref<2x2x6x6x16xf32, #tpu.memory_space<vmem>>, vector<1x1x4x4x16xf32>
    %250 = vector.shape_cast %249 : vector<1x1x4x4x16xf32> to vector<4x4x16xf32>
    %c0_459 = arith.constant 0 : index
    %c0_460 = arith.constant 0 : index
    %c96_461 = arith.constant 96 : index
    %251 = vector.load %arg21[%c0_459, %c0_460, %c96_461] : memref<4x4x144xf32, #tpu.memory_space<vmem>>, vector<4x4x16xf32>
    tpu.vector_store %arg21[%c0_459, %c0_460, %c96_461], %250 {strides = array<i32>} : memref<4x4x144xf32, #tpu.memory_space<vmem>>, vector<4x4x16xf32>,
    %c0_462 = arith.constant 0 : index
    %c0_463 = arith.constant 0 : index
    %c2_464 = arith.constant 2 : index
    %c1_465 = arith.constant 1 : index
    %c0_466 = arith.constant 0 : index
    %252 = vector.load %arg20[%c0_462, %c0_463, %c2_464, %c1_465, %c0_466] : memref<2x2x6x6x16xf32, #tpu.memory_space<vmem>>, vector<1x1x4x4x16xf32>
    %253 = vector.shape_cast %252 : vector<1x1x4x4x16xf32> to vector<4x4x16xf32>
    %c0_467 = arith.constant 0 : index
    %c0_468 = arith.constant 0 : index
    %c112_469 = arith.constant 112 : index
    %254 = vector.load %arg21[%c0_467, %c0_468, %c112_469] : memref<4x4x144xf32, #tpu.memory_space<vmem>>, vector<4x4x16xf32>
    tpu.vector_store %arg21[%c0_467, %c0_468, %c112_469], %253 {strides = array<i32>} : memref<4x4x144xf32, #tpu.memory_space<vmem>>, vector<4x4x16xf32>,
    %c0_470 = arith.constant 0 : index
    %c1_471 = arith.constant 1 : index
    %c2_472 = arith.constant 2 : index
    %c1_473 = arith.constant 1 : index
    %c0_474 = arith.constant 0 : index
    %255 = vector.load %arg20[%c0_470, %c1_471, %c2_472, %c1_473, %c0_474] : memref<2x2x6x6x16xf32, #tpu.memory_space<vmem>>, vector<1x1x4x4x16xf32>
    %256 = vector.shape_cast %255 : vector<1x1x4x4x16xf32> to vector<4x4x16xf32>
    %c0_475 = arith.constant 0 : index
    %c0_476 = arith.constant 0 : index
    %c128_477 = arith.constant 128 : index
    %257 = vector.load %arg21[%c0_475, %c0_476, %c128_477] : memref<4x4x144xf32, #tpu.memory_space<vmem>>, vector<4x4x16xf32>
    tpu.vector_store %arg21[%c0_475, %c0_476, %c128_477], %256 {strides = array<i32>} : memref<4x4x144xf32, #tpu.memory_space<vmem>>, vector<4x4x16xf32>,
    %c0_478 = arith.constant 0 : index
    %c0_479 = arith.constant 0 : index
    %c0_480 = arith.constant 0 : index
    %258 = vector.load %arg21[%c0_478, %c0_479, %c0_480] : memref<4x4x144xf32, #tpu.memory_space<vmem>>, vector<4x4x144xf32>
    %259 = vector.shape_cast %258 : vector<4x4x144xf32> to vector<16x144xf32>
    %260 = arith.truncf %259 : vector<16x144xf32> to vector<16x144xbf16>
    %c0_481 = arith.constant 0 : index
    %c0_482 = arith.constant 0 : index
    %261 = vector.load %arg10[%c0_481, %c0_482] : memref<144x12xbf16, #tpu.memory_space<vmem>>, vector<144x12xbf16>
    %cst_483 = arith.constant dense<0.000000e+00> : vector<16x12xf32>
    %262 = tpu.matmul %260, %261, %cst_483 {dimension_numbers = #tpu.dot_dimension_numbers<[1], [0], [0], [1], [0, 0, 1, 1], [], []>} : vector<16x144xbf16>, vector<144x12xbf16>, vector<16x12xf32> -> vector<16x12xf32>
    %c0_484 = arith.constant 0 : index
    %c0_485 = arith.constant 0 : index
    %263 = vector.load %arg11[%c0_484, %c0_485] : memref<1x12xf32, #tpu.memory_space<vmem>>, vector<1x12xf32>
    %264 = vector.broadcast %263 : vector<1x12xf32> to vector<16x12xf32>
    %265 = arith.addf %262, %264 : vector<16x12xf32>
    %c0_486 = arith.constant 0 : index
    %c32_487 = arith.constant 32 : index
    %c0_488 = arith.constant 0 : index
    %266 = vector.load %arg12[%c0_486, %c32_487, %c0_488] : memref<1x64x12xf32, #tpu.memory_space<vmem>>, vector<1x16x12xf32>
    %267 = vector.shape_cast %266 : vector<1x16x12xf32> to vector<16x12xf32>
    %268 = arith.addf %267, %265 : vector<16x12xf32>
    %c0_489 = arith.constant 0 : index
    %c32_490 = arith.constant 32 : index
    %c0_491 = arith.constant 0 : index
    %269 = vector.load %arg12[%c0_489, %c32_490, %c0_491] : memref<1x64x12xf32, #tpu.memory_space<vmem>>, vector<1x16x12xf32>
    %270 = vector.shape_cast %269 : vector<1x16x12xf32> to vector<16x12xf32>
    %271 = vector.shape_cast %268 : vector<16x12xf32> to vector<1x16x12xf32>
    tpu.vector_store %arg12[%c0_489, %c32_490, %c0_491], %271 {strides = array<i32>} : memref<1x64x12xf32, #tpu.memory_space<vmem>>, vector<1x16x12xf32>,
    %c0_492 = arith.constant 0 : index
    %c0_493 = arith.constant 0 : index
    %c1_494 = arith.constant 1 : index
    %c1_495 = arith.constant 1 : index
    %c0_496 = arith.constant 0 : index
    %272 = vector.load %arg20[%c0_492, %c0_493, %c1_494, %c1_495, %c0_496] : memref<2x2x6x6x16xf32, #tpu.memory_space<vmem>>, vector<1x1x4x4x16xf32>
    %273 = vector.shape_cast %272 : vector<1x1x4x4x16xf32> to vector<4x4x16xf32>
    %c0_497 = arith.constant 0 : index
    %c0_498 = arith.constant 0 : index
    %c0_499 = arith.constant 0 : index
    %274 = vector.load %arg21[%c0_497, %c0_498, %c0_499] : memref<4x4x144xf32, #tpu.memory_space<vmem>>, vector<4x4x16xf32>
    tpu.vector_store %arg21[%c0_497, %c0_498, %c0_499], %273 {strides = array<i32>} : memref<4x4x144xf32, #tpu.memory_space<vmem>>, vector<4x4x16xf32>,
    %c0_500 = arith.constant 0 : index
    %c1_501 = arith.constant 1 : index
    %c1_502 = arith.constant 1 : index
    %c1_503 = arith.constant 1 : index
    %c0_504 = arith.constant 0 : index
    %275 = vector.load %arg20[%c0_500, %c1_501, %c1_502, %c1_503, %c0_504] : memref<2x2x6x6x16xf32, #tpu.memory_space<vmem>>, vector<1x1x4x4x16xf32>
    %276 = vector.shape_cast %275 : vector<1x1x4x4x16xf32> to vector<4x4x16xf32>
    %c0_505 = arith.constant 0 : index
    %c0_506 = arith.constant 0 : index
    %c16_507 = arith.constant 16 : index
    %277 = vector.load %arg21[%c0_505, %c0_506, %c16_507] : memref<4x4x144xf32, #tpu.memory_space<vmem>>, vector<4x4x16xf32>
    tpu.vector_store %arg21[%c0_505, %c0_506, %c16_507], %276 {strides = array<i32>} : memref<4x4x144xf32, #tpu.memory_space<vmem>>, vector<4x4x16xf32>,
    %c0_508 = arith.constant 0 : index
    %c0_509 = arith.constant 0 : index
    %c1_510 = arith.constant 1 : index
    %c2_511 = arith.constant 2 : index
    %c0_512 = arith.constant 0 : index
    %278 = vector.load %arg20[%c0_508, %c0_509, %c1_510, %c2_511, %c0_512] : memref<2x2x6x6x16xf32, #tpu.memory_space<vmem>>, vector<1x1x4x4x16xf32>
    %279 = vector.shape_cast %278 : vector<1x1x4x4x16xf32> to vector<4x4x16xf32>
    %c0_513 = arith.constant 0 : index
    %c0_514 = arith.constant 0 : index
    %c32_515 = arith.constant 32 : index
    %280 = vector.load %arg21[%c0_513, %c0_514, %c32_515] : memref<4x4x144xf32, #tpu.memory_space<vmem>>, vector<4x4x16xf32>
    tpu.vector_store %arg21[%c0_513, %c0_514, %c32_515], %279 {strides = array<i32>} : memref<4x4x144xf32, #tpu.memory_space<vmem>>, vector<4x4x16xf32>,
    %c1_516 = arith.constant 1 : index
    %c0_517 = arith.constant 0 : index
    %c1_518 = arith.constant 1 : index
    %c1_519 = arith.constant 1 : index
    %c0_520 = arith.constant 0 : index
    %281 = vector.load %arg20[%c1_516, %c0_517, %c1_518, %c1_519, %c0_520] : memref<2x2x6x6x16xf32, #tpu.memory_space<vmem>>, vector<1x1x4x4x16xf32>
    %282 = vector.shape_cast %281 : vector<1x1x4x4x16xf32> to vector<4x4x16xf32>
    %c0_521 = arith.constant 0 : index
    %c0_522 = arith.constant 0 : index
    %c48_523 = arith.constant 48 : index
    %283 = vector.load %arg21[%c0_521, %c0_522, %c48_523] : memref<4x4x144xf32, #tpu.memory_space<vmem>>, vector<4x4x16xf32>
    tpu.vector_store %arg21[%c0_521, %c0_522, %c48_523], %282 {strides = array<i32>} : memref<4x4x144xf32, #tpu.memory_space<vmem>>, vector<4x4x16xf32>,
    %c1_524 = arith.constant 1 : index
    %c1_525 = arith.constant 1 : index
    %c1_526 = arith.constant 1 : index
    %c1_527 = arith.constant 1 : index
    %c0_528 = arith.constant 0 : index
    %284 = vector.load %arg20[%c1_524, %c1_525, %c1_526, %c1_527, %c0_528] : memref<2x2x6x6x16xf32, #tpu.memory_space<vmem>>, vector<1x1x4x4x16xf32>
    %285 = vector.shape_cast %284 : vector<1x1x4x4x16xf32> to vector<4x4x16xf32>
    %c0_529 = arith.constant 0 : index
    %c0_530 = arith.constant 0 : index
    %c64_531 = arith.constant 64 : index
    %286 = vector.load %arg21[%c0_529, %c0_530, %c64_531] : memref<4x4x144xf32, #tpu.memory_space<vmem>>, vector<4x4x16xf32>
    tpu.vector_store %arg21[%c0_529, %c0_530, %c64_531], %285 {strides = array<i32>} : memref<4x4x144xf32, #tpu.memory_space<vmem>>, vector<4x4x16xf32>,
    %c1_532 = arith.constant 1 : index
    %c0_533 = arith.constant 0 : index
    %c1_534 = arith.constant 1 : index
    %c2_535 = arith.constant 2 : index
    %c0_536 = arith.constant 0 : index
    %287 = vector.load %arg20[%c1_532, %c0_533, %c1_534, %c2_535, %c0_536] : memref<2x2x6x6x16xf32, #tpu.memory_space<vmem>>, vector<1x1x4x4x16xf32>
    %288 = vector.shape_cast %287 : vector<1x1x4x4x16xf32> to vector<4x4x16xf32>
    %c0_537 = arith.constant 0 : index
    %c0_538 = arith.constant 0 : index
    %c80_539 = arith.constant 80 : index
    %289 = vector.load %arg21[%c0_537, %c0_538, %c80_539] : memref<4x4x144xf32, #tpu.memory_space<vmem>>, vector<4x4x16xf32>
    tpu.vector_store %arg21[%c0_537, %c0_538, %c80_539], %288 {strides = array<i32>} : memref<4x4x144xf32, #tpu.memory_space<vmem>>, vector<4x4x16xf32>,
    %c0_540 = arith.constant 0 : index
    %c0_541 = arith.constant 0 : index
    %c2_542 = arith.constant 2 : index
    %c1_543 = arith.constant 1 : index
    %c0_544 = arith.constant 0 : index
    %290 = vector.load %arg20[%c0_540, %c0_541, %c2_542, %c1_543, %c0_544] : memref<2x2x6x6x16xf32, #tpu.memory_space<vmem>>, vector<1x1x4x4x16xf32>
    %291 = vector.shape_cast %290 : vector<1x1x4x4x16xf32> to vector<4x4x16xf32>
    %c0_545 = arith.constant 0 : index
    %c0_546 = arith.constant 0 : index
    %c96_547 = arith.constant 96 : index
    %292 = vector.load %arg21[%c0_545, %c0_546, %c96_547] : memref<4x4x144xf32, #tpu.memory_space<vmem>>, vector<4x4x16xf32>
    tpu.vector_store %arg21[%c0_545, %c0_546, %c96_547], %291 {strides = array<i32>} : memref<4x4x144xf32, #tpu.memory_space<vmem>>, vector<4x4x16xf32>,
    %c0_548 = arith.constant 0 : index
    %c1_549 = arith.constant 1 : index
    %c2_550 = arith.constant 2 : index
    %c1_551 = arith.constant 1 : index
    %c0_552 = arith.constant 0 : index
    %293 = vector.load %arg20[%c0_548, %c1_549, %c2_550, %c1_551, %c0_552] : memref<2x2x6x6x16xf32, #tpu.memory_space<vmem>>, vector<1x1x4x4x16xf32>
    %294 = vector.shape_cast %293 : vector<1x1x4x4x16xf32> to vector<4x4x16xf32>
    %c0_553 = arith.constant 0 : index
    %c0_554 = arith.constant 0 : index
    %c112_555 = arith.constant 112 : index
    %295 = vector.load %arg21[%c0_553, %c0_554, %c112_555] : memref<4x4x144xf32, #tpu.memory_space<vmem>>, vector<4x4x16xf32>
    tpu.vector_store %arg21[%c0_553, %c0_554, %c112_555], %294 {strides = array<i32>} : memref<4x4x144xf32, #tpu.memory_space<vmem>>, vector<4x4x16xf32>,
    %c0_556 = arith.constant 0 : index
    %c0_557 = arith.constant 0 : index
    %c2_558 = arith.constant 2 : index
    %c2_559 = arith.constant 2 : index
    %c0_560 = arith.constant 0 : index
    %296 = vector.load %arg20[%c0_556, %c0_557, %c2_558, %c2_559, %c0_560] : memref<2x2x6x6x16xf32, #tpu.memory_space<vmem>>, vector<1x1x4x4x16xf32>
    %297 = vector.shape_cast %296 : vector<1x1x4x4x16xf32> to vector<4x4x16xf32>
    %c0_561 = arith.constant 0 : index
    %c0_562 = arith.constant 0 : index
    %c128_563 = arith.constant 128 : index
    %298 = vector.load %arg21[%c0_561, %c0_562, %c128_563] : memref<4x4x144xf32, #tpu.memory_space<vmem>>, vector<4x4x16xf32>
    tpu.vector_store %arg21[%c0_561, %c0_562, %c128_563], %297 {strides = array<i32>} : memref<4x4x144xf32, #tpu.memory_space<vmem>>, vector<4x4x16xf32>,
    %c0_564 = arith.constant 0 : index
    %c0_565 = arith.constant 0 : index
    %c0_566 = arith.constant 0 : index
    %299 = vector.load %arg21[%c0_564, %c0_565, %c0_566] : memref<4x4x144xf32, #tpu.memory_space<vmem>>, vector<4x4x144xf32>
    %300 = vector.shape_cast %299 : vector<4x4x144xf32> to vector<16x144xf32>
    %301 = arith.truncf %300 : vector<16x144xf32> to vector<16x144xbf16>
    %c0_567 = arith.constant 0 : index
    %c0_568 = arith.constant 0 : index
    %302 = vector.load %arg10[%c0_567, %c0_568] : memref<144x12xbf16, #tpu.memory_space<vmem>>, vector<144x12xbf16>
    %cst_569 = arith.constant dense<0.000000e+00> : vector<16x12xf32>
    %303 = tpu.matmul %301, %302, %cst_569 {dimension_numbers = #tpu.dot_dimension_numbers<[1], [0], [0], [1], [0, 0, 1, 1], [], []>} : vector<16x144xbf16>, vector<144x12xbf16>, vector<16x12xf32> -> vector<16x12xf32>
    %c0_570 = arith.constant 0 : index
    %c0_571 = arith.constant 0 : index
    %304 = vector.load %arg11[%c0_570, %c0_571] : memref<1x12xf32, #tpu.memory_space<vmem>>, vector<1x12xf32>
    %305 = vector.broadcast %304 : vector<1x12xf32> to vector<16x12xf32>
    %306 = arith.addf %303, %305 : vector<16x12xf32>
    %c0_572 = arith.constant 0 : index
    %c48_573 = arith.constant 48 : index
    %c0_574 = arith.constant 0 : index
    %307 = vector.load %arg12[%c0_572, %c48_573, %c0_574] : memref<1x64x12xf32, #tpu.memory_space<vmem>>, vector<1x16x12xf32>
    %308 = vector.shape_cast %307 : vector<1x16x12xf32> to vector<16x12xf32>
    %309 = arith.addf %308, %306 : vector<16x12xf32>
    %c0_575 = arith.constant 0 : index
    %c48_576 = arith.constant 48 : index
    %c0_577 = arith.constant 0 : index
    %310 = vector.load %arg12[%c0_575, %c48_576, %c0_577] : memref<1x64x12xf32, #tpu.memory_space<vmem>>, vector<1x16x12xf32>
    %311 = vector.shape_cast %310 : vector<1x16x12xf32> to vector<16x12xf32>
    %312 = vector.shape_cast %309 : vector<16x12xf32> to vector<1x16x12xf32>
    tpu.vector_store %arg12[%c0_575, %c48_576, %c0_577], %312 {strides = array<i32>} : memref<1x64x12xf32, #tpu.memory_space<vmem>>, vector<1x16x12xf32>,
    return
  }
  func.func @transform_0(%arg0: i32, %arg1: i32) -> (i32, i32, i32, i32) {
    %c0_i32 = arith.constant 0 : i32
    %c0_i32_0 = arith.constant 0 : i32
    %c0_i32_1 = arith.constant 0 : i32
    %c0_i32_2 = arith.constant 0 : i32
    return %arg0, %c0_i32, %c0_i32_0, %c0_i32_1 : i32, i32, i32, i32
  }
  func.func @transform_1(%arg0: i32, %arg1: i32) -> (i32, i32) {
    %c0_i32 = arith.constant 0 : i32
    %c0_i32_0 = arith.constant 0 : i32
    %c0_i32_1 = arith.constant 0 : i32
    return %c0_i32, %c0_i32_0 : i32, i32
  }
  func.func @transform_2(%arg0: i32, %arg1: i32) -> (i32, i32) {
    %c0_i32 = arith.constant 0 : i32
    %c0_i32_0 = arith.constant 0 : i32
    %c0_i32_1 = arith.constant 0 : i32
    return %c0_i32, %c0_i32_0 : i32, i32
  }
  func.func @transform_3(%arg0: i32, %arg1: i32) -> (i32, i32) {
    %c0_i32 = arith.constant 0 : i32
    %c0_i32_0 = arith.constant 0 : i32
    %c0_i32_1 = arith.constant 0 : i32
    return %c0_i32, %c0_i32_0 : i32, i32
  }
  func.func @transform_4(%arg0: i32, %arg1: i32) -> (i32, i32) {
    %c0_i32 = arith.constant 0 : i32
    %c0_i32_0 = arith.constant 0 : i32
    %c0_i32_1 = arith.constant 0 : i32
    return %c0_i32, %c0_i32_0 : i32, i32
  }
  func.func @transform_5(%arg0: i32, %arg1: i32) -> (i32, i32) {
    %c0_i32 = arith.constant 0 : i32
    %c0_i32_0 = arith.constant 0 : i32
    %c0_i32_1 = arith.constant 0 : i32
    return %c0_i32, %c0_i32_0 : i32, i32
  }
  func.func @transform_6(%arg0: i32, %arg1: i32) -> (i32, i32) {
    %c0_i32 = arith.constant 0 : i32
    %c0_i32_0 = arith.constant 0 : i32
    %c0_i32_1 = arith.constant 0 : i32
    return %c0_i32, %c0_i32_0 : i32, i32
  }
  func.func @transform_7(%arg0: i32, %arg1: i32) -> (i32, i32) {
    %c0_i32 = arith.constant 0 : i32
    %c0_i32_0 = arith.constant 0 : i32
    %c0_i32_1 = arith.constant 0 : i32
    return %c0_i32, %c0_i32_0 : i32, i32
  }
  func.func @transform_8(%arg0: i32, %arg1: i32) -> (i32, i32) {
    %c0_i32 = arith.constant 0 : i32
    %c0_i32_0 = arith.constant 0 : i32
    %c0_i32_1 = arith.constant 0 : i32
    return %c0_i32, %c0_i32_0 : i32, i32
  }
  func.func @transform_9(%arg0: i32, %arg1: i32) -> (i32, i32) {
    %c0_i32 = arith.constant 0 : i32
    %c0_i32_0 = arith.constant 0 : i32
    %c0_i32_1 = arith.constant 0 : i32
    return %c0_i32, %c0_i32_0 : i32, i32
  }
  func.func @transform_10(%arg0: i32, %arg1: i32) -> (i32, i32, i32) {
    %c0_i32 = arith.constant 0 : i32
    %c0_i32_0 = arith.constant 0 : i32
    %c0_i32_1 = arith.constant 0 : i32
    return %arg0, %c0_i32, %c0_i32_0 : i32, i32, i32
  }
}

</mosaic_0001>

<bundles_post_ra>
// kernel: tile.14
= control target key start
LH: loop header
LB: loop body
LE: loop exit
PB: predicated region body
PF: predicated region fallthrough
CT: control target
= control target key end

     0   :  { %vm7_vm0 = vcmask 130048   ;;  %s37_s8 = smov 16   ;;  %s38_s9 = smov 32   ;;  %vm13_vm1 = vcmask 523648   ;;  %vm19_vm2 = vcmask 392448   ;;  %vm25_vm3 = vcmask 261248   ;;  %s55_s0 = inlined_call_operand.vmem [shape: f32[4,16], index: 0, kind: input, shape index: {}]   ;;  %s56_s1 = inlined_call_operand.vmem [shape: f32[1,64], index: 1, kind: output, shape index: {}]  }
   0x1   :  { %v4_v0 = vld [vmem:[%s55_s0] sm:$0xf]  ;;  %s36_s0 = smov 48  }
   0x2   :  { %5 = vst [vmem:[#allocation1] sm:$0xf] %v4_v0 }
   0x9   :  { %v10_v1 = vld [vmem:[#allocation1 + $0x3] sm:$0x1]   ;;  %v22_v2 = vld [vmem:[#allocation1 + $0x1] sm:$0x1]   ;;  %v6_v3 = vld [vmem:[#allocation1] sm:$0x1]  }
   0xa   :  { %11 = vrot.lane.b32.xlu0 %v10_v1, %s36_s0  ;;  %23 = vrot.lane.b32.xlu1 %v22_v2, %s37_s8  ;;  %v16_v4 = vld [vmem:[#allocation1 + $0x2] sm:$0x1]   ;;  %8 = vst.msk [vmem:[#allocation0] sm:$0x1] %vm7_vm0, %v6_v3  }
   0xe   :  { %17 = vrot.lane.b32.xlu0 %v16_v4, %s38_s9 }
  0x7c   :  { %v12_v5 = vpop.permute.xlu0 %11   ;;  %v24_v6 = vpop.permute.xlu1 %23  }
  0x7d   :  { %14 = vst.msk [vmem:[#allocation0] sm:$0x1] %vm13_vm1, %v12_v5  }
  0x80   :  { %v18_v7 = vpop.permute.xlu0 %17  }
  0x81   :  { %20 = vst.msk [vmem:[#allocation0] sm:$0x1] %vm19_vm2, %v18_v7  }
  0x82   :  { %26 = vst.msk [vmem:[#allocation0] sm:$0x1] %vm25_vm3, %v24_v6  }
  0x89   :  { %v30_v8 = vld [vmem:[#allocation0] sm:$0x1] }
  0x8a   :  { %32 = vst [vmem:[%s56_s1] sm:$0x1] %v30_v8 }

// kernel: tile.19
= control target key start
LH: loop header
LB: loop body
LE: loop exit
PB: predicated region body
PF: predicated region fallthrough
CT: control target
= control target key end

     0   :  { %vm7_vm0 = vcmask 23552   ;;  %s37_s8 = smov 3   ;;  %s38_s9 = smov 6   ;;  %vm13_vm1 = vcmask 97352   ;;  %vm19_vm2 = vcmask 72752   ;;  %vm25_vm3 = vcmask 48152   ;;  %s55_s0 = inlined_call_operand.vmem [shape: f32[4,3], index: 0, kind: input, shape index: {}]   ;;  %s56_s1 = inlined_call_operand.vmem [shape: f32[1,12], index: 1, kind: output, shape index: {}]  }
   0x1   :  { %v4_v0 = vld [vmem:[%s55_s0] sm:$0xf]  ;;  %s36_s0 = smov 9  }
   0x2   :  { %5 = vst [vmem:[#allocation1] sm:$0xf] %v4_v0 }
   0x9   :  { %v10_v1 = vld [vmem:[#allocation1 + $0x3] sm:$0x1]   ;;  %v22_v2 = vld [vmem:[#allocation1 + $0x1] sm:$0x1]   ;;  %v6_v3 = vld [vmem:[#allocation1] sm:$0x1]  }
   0xa   :  { %11 = vrot.lane.b32.xlu0 %v10_v1, %s36_s0  ;;  %23 = vrot.lane.b32.xlu1 %v22_v2, %s37_s8  ;;  %v16_v4 = vld [vmem:[#allocation1 + $0x2] sm:$0x1]   ;;  %8 = vst.msk [vmem:[#allocation0] sm:$0x1] %vm7_vm0, %v6_v3  }
   0xe   :  { %17 = vrot.lane.b32.xlu0 %v16_v4, %s38_s9 }
  0x7c   :  { %v12_v5 = vpop.permute.xlu0 %11   ;;  %v24_v6 = vpop.permute.xlu1 %23  }
  0x7d   :  { %14 = vst.msk [vmem:[#allocation0] sm:$0x1] %vm13_vm1, %v12_v5  }
  0x80   :  { %v18_v7 = vpop.permute.xlu0 %17  }
  0x81   :  { %20 = vst.msk [vmem:[#allocation0] sm:$0x1] %vm19_vm2, %v18_v7  }
  0x82   :  { %26 = vst.msk [vmem:[#allocation0] sm:$0x1] %vm25_vm3, %v24_v6  }
  0x89   :  { %v30_v8 = vld [vmem:[#allocation0] sm:$0x1] }
  0x8a   :  { %32 = vst [vmem:[%s56_s1] sm:$0x1] %v30_v8 }

// kernel: tile.13
= control target key start
LH: loop header
LB: loop body
LE: loop exit
PB: predicated region body
PF: predicated region fallthrough
CT: control target
= control target key end

     0   :  { %2 = vsyncpa [#allocation1], 0  ;;  %s44_s6 = smov [#allocation0]   ;;  %s70_s0 = inlined_call_operand.hbm [shape: f32[16], index: 0, kind: input, shape index: {}]   ;;  %s71_s1 = inlined_call_operand.vmem [shape: f32[4,16], index: 1, kind: output, shape index: {}]  }
   0x1   :  { %s9_s7 = sshll.u32 %s44_s6, 4  ;;  %s20_s10 = scalar_lea.hbm %s70_s0, 16  ;;  %s10_s7 = int_to_ptr.vmem [resolvable:$true] %s9_s7 }
   0x2   :  { %p21_p0 = scmp.ne.s32.totalorder %s70_s0, %s20_s10  ;;  %p24_p1 = scmp.lt.u32.totalorder %s20_s10, %s70_s0 }
   0x4   :  { %p26_p2 = pnand %p24_p1, %p21_p0 }
   0x6   :  { %29 = shalt.err (!%p26_p2)
}
   0x7   :  { %s30_s15 = scalar_lea.vmem %s10_s7, 16  ;;  %s34_s16 = scalar_lea.vmem %s10_s7, 32 }
   0x8   :  { %p31_p3 = scmp.ne.s32.totalorder %s10_s7, %s30_s15  ;;  %p35_p4 = scmp.lt.s32.totalorder %s10_s7, %s10_s7 }
   0x9   :  { %p36_p5 = scmp.lt.s32.totalorder %s34_s16, %s30_s15 }
   0xb   :  { %p37_p6 = por %p36_p5, %p35_p4 }
   0xd   :  { %p38_p7 = pnand %p37_p6, %p31_p3 }
   0xf   :  { %41 = shalt.err (!%p38_p7)
}
  0x10   :  { %12 = dma.hbm_to_vmem [thread:$0]  %s70_s0, 16, %s10_s7, [#allocation1]  }
  0x11   :  { %42 = dma.done.wait [#allocation1], 16  }
  0x12   :  { %43 = vsyncadd [#allocation1], 4294967280  ;;  %v16_v0 = vld [vmem:[#allocation0] ss:$0 sm:$0xff] }
  0x13   :  { %17 = vst [vmem:[%s71_s1] sm:$0xf] %v16_v0 }
  0x14   :  { %18 = vsyncpa [#allocation1], 1 }

// kernel: tile.18
= control target key start
LH: loop header
LB: loop body
LE: loop exit
PB: predicated region body
PF: predicated region fallthrough
CT: control target
= control target key end

     0   :  { %2 = vsyncpa [#allocation1], 0  ;;  %s44_s6 = smov [#allocation0]   ;;  %s70_s0 = inlined_call_operand.hbm [shape: f32[3], index: 0, kind: input, shape index: {}]   ;;  %s71_s1 = inlined_call_operand.vmem [shape: f32[4,3], index: 1, kind: output, shape index: {}]  }
   0x1   :  { %s9_s7 = sshll.u32 %s44_s6, 4  ;;  %s20_s10 = scalar_lea.hbm %s70_s0, 16  ;;  %s10_s7 = int_to_ptr.vmem [resolvable:$true] %s9_s7 }
   0x2   :  { %p21_p0 = scmp.ne.s32.totalorder %s70_s0, %s20_s10  ;;  %p24_p1 = scmp.lt.u32.totalorder %s20_s10, %s70_s0 }
   0x4   :  { %p26_p2 = pnand %p24_p1, %p21_p0 }
   0x6   :  { %29 = shalt.err (!%p26_p2)
}
   0x7   :  { %s30_s15 = scalar_lea.vmem %s10_s7, 16  ;;  %s34_s16 = scalar_lea.vmem %s10_s7, 32 }
   0x8   :  { %p31_p3 = scmp.ne.s32.totalorder %s10_s7, %s30_s15  ;;  %p35_p4 = scmp.lt.s32.totalorder %s10_s7, %s10_s7 }
   0x9   :  { %p36_p5 = scmp.lt.s32.totalorder %s34_s16, %s30_s15 }
   0xb   :  { %p37_p6 = por %p36_p5, %p35_p4 }
   0xd   :  { %p38_p7 = pnand %p37_p6, %p31_p3 }
   0xf   :  { %41 = shalt.err (!%p38_p7)
}
  0x10   :  { %12 = dma.hbm_to_vmem [thread:$0]  %s70_s0, 16, %s10_s7, [#allocation1]  }
  0x11   :  { %42 = dma.done.wait [#allocation1], 16  }
  0x12   :  { %43 = vsyncadd [#allocation1], 4294967280  ;;  %v16_v0 = vld [vmem:[#allocation0] ss:$0 sm:$0xff] }
  0x13   :  { %17 = vst [vmem:[%s71_s1] sm:$0xf] %v16_v0 }
  0x14   :  { %18 = vsyncpa [#allocation1], 1 }

// kernel: renderer_forward.1
= control target key start
LH: loop header
LB: loop body
LE: loop exit
PB: predicated region body
PF: predicated region fallthrough
CT: control target
= control target key end

     0   :  { %s4753_s13 = smov 0   ;;  %s4755_s14 = smov 0   ;;  %s6202_s0 = inlined_call_operand.vmem [shape: f32[2,8,8,11], index: 0, kind: input, shape index: {}]   ;;  %s6203_s1 = inlined_call_operand.vmem [shape: bf16[275,32], index: 1, kind: input, shape index: {}]   ;;  %s6204_s2 = inlined_call_operand.vmem [shape: bf16[200,32], index: 2, kind: input, shape index: {}]   ;;  %s6205_s3 = inlined_call_operand.vmem [shape: f32[1,32], index: 3, kind: input, shape index: {}]   ;;  %s6206_s4 = inlined_call_operand.vmem [shape: bf16[200,8], index: 4, kind: input, shape index: {}]   ;;  %s6207_s5 = inlined_call_operand.vmem [shape: f32[1,8], index: 5, kind: input, shape index: {}]   ;;  %s6208_s6 = inlined_call_operand.vmem [shape: bf16[72,64], index: 6, kind: input, shape index: {}]   ;;  %s6209_s7 = inlined_call_operand.vmem [shape: f32[1,64], index: 7, kind: input, shape index: {}]   ;;  %s6210_s8 = inlined_call_operand.vmem [shape: bf16[144,12], index: 8, kind: input, shape index: {}]   ;;  %s6211_s9 = inlined_call_operand.vmem [shape: f32[1,12], index: 9, kind: input, shape index: {}]   ;;  %s6212_s10 = inlined_call_operand.vmem [shape: f32[2,64,12], index: 10, kind: output, shape index: {}]  }
   0x1   :  { %s4757_s15 = smov 0   ;;  %s4759_s16 = smov 0  }
   0x2   :  { %s4761_s17 = smov 0  }
   0x3 LB: > { %s29_s18 = sadd.s32 1, %s4643_s15  ;;  %s32_s19 = sadd.s32 1, %s4647_s16  ;;  %s4651_s17 = sphi %s4761_s17, %s20_s17   ;;  %s4647_s16 = sphi %s4759_s16, %s6245_s16   ;;  %s4643_s15 = sphi %s4757_s15, %s6244_s15   ;;  %s4639_s14 = sphi %s4755_s14, %s6243_s14   ;;  %s4635_s13 = sphi %s4753_s13, %s6242_s13  }
   0x4   : > { %p30_p0 = scmp.ge.s32.totalorder %s29_s18, 2  ;;  %p4154_p1 = scmp.ge.s32.totalorder %s4651_s17, 1 }
   0x5   : > { %p324_p2 = scmp.lt.s32.totalorder %s4651_s17, 5 }
   0x6   : > { %s6247_s18 = smov (%p30_p0, %s29_s18), 0  ;;  %s6249_s19 = smov (!%p30_p0, %s32_s19), %s4647_s16 }
   0x7   : > { %p325_p3 = pnand %p4154_p1, %p324_p2  ;;  %p34_p4 = scmp.ge.s32.totalorder %s6249_s19, 2 }
   0x8   : > { %p362_p5 = scmp.lt.s32.totalorder (!%p325_p3), %s4639_s14, 1  ;;  %p4159_p6 = scmp.ne.s32.totalorder (!%p325_p3), %s4635_s13, 0 }
   0x9   : > { %s6251_s19 = smov (%p34_p4, %s6249_s19), 0  ;;  %328 = sbr.rel (%p325_p3) target bundleno = 2829 (0xb0d), region = 60 }
  0x10   : > { %s6253_s14 = smov (!%p362_p5, %s4639_s14), 1  ;;  %376 = sbr.rel (%p4159_p6) target bundleno = 550 (0x226), region = 64 }
  0x11   : > { %s4344_s20 = sshll.u32 %s6253_s14, 6  ;;  %s4653_s27 = smov (!%p4159_p6), 11   ;;  %vm440_vm0 = vcmask (!%p4159_p6), 84992   ;;  %vm465_vm1 = vcmask (!%p4159_p6), 175192   ;;  %vm490_vm2 = vcmask (!%p4159_p6), 265392   ;;  %vm515_vm3 = vcmask (!%p4159_p6), 355592  }
  0x12   : > { %s4786_s23 = scalar_lea.vmem %s6202_s0, %s4344_s20  ;;  %s4791_s26 = scalar_lea.vmem %s6212_s10, %s4344_s20  ;;  %vm540_vm4 = vcmask (!%p4159_p6), 445792   ;;  %vm566_vm5 = vcmask (!%p4159_p6), 535992   ;;  %vm591_vm6 = vcmask (!%p4159_p6), 626192   ;;  %vm616_vm7 = vcmask (!%p4159_p6), 716392  }
  0x13   : > { %v447_v0 = vld [vmem:[%s4786_s23 + $0x11] sm:$0xf] (!%p4159_p6)  ;;  %v445_v1 = vld [vmem:[%s4786_s23 + $0x1] sm:$0xf] (!%p4159_p6)  ;;  %v448_v2 = vld [vmem:[%s4786_s23 + $0x19] sm:$0xf] (!%p4159_p6) }
  0x14   : > { %457 = vrot.lane.b32.xlu1 (!%p4159_p6), %v447_v0, %s4653_s27  ;;  %453 = vrot.lane.b32.xlu0 (!%p4159_p6), %v445_v1, %s4653_s27  ;;  %v446_v3 = vld [vmem:[%s4786_s23 + $0x9] sm:$0xf] (!%p4159_p6)  ;;  %v470_v5 = vld [vmem:[%s4786_s23 + $0x2] sm:$0xf] (!%p4159_p6)  ;;  %s4654_s28 = smov (!%p4159_p6), 22   ;;  %s4655_s29 = smov (!%p4159_p6), 33  }
  0x15   : > { %v471_v4 = vld [vmem:[%s4786_s23 + $0xa] sm:$0xf] (!%p4159_p6)  ;;  %v473_v6 = vld [vmem:[%s4786_s23 + $0x1a] sm:$0xf] (!%p4159_p6)  ;;  %v472_v7 = vld [vmem:[%s4786_s23 + $0x12] sm:$0xf] (!%p4159_p6) }
  0x16   : > { %v496_v8 = vld [vmem:[%s4786_s23 + $0xb] sm:$0xf] (!%p4159_p6)  ;;  %v495_v9 = vld [vmem:[%s4786_s23 + $0x3] sm:$0xf] (!%p4159_p6)  ;;  %v498_v10 = vld [vmem:[%s4786_s23 + $0x1b] sm:$0xf] (!%p4159_p6) }
  0x17   : > { %v497_v11 = vld [vmem:[%s4786_s23 + $0x13] sm:$0xf]  ;;  %v521_v12 = vld [vmem:[%s4786_s23 + $0xc] sm:$0xf]  ;;  %v520_v13 = vld [vmem:[%s4786_s23 + $0x4] sm:$0xf] }
  0x18   : > { %459 = vrot.lane.b32.xlu1 %v448_v2, %s4653_s27  ;;  %455 = vrot.lane.b32.xlu0 %v446_v3, %s4653_s27  ;;  %v438_v14 = vld [vmem:[%s4786_s23 + $0x10] sm:$0xf]  ;;  %v436_v15 = vld [vmem:[%s4786_s23] sm:$0xf]  ;;  %s4656_s30 = smov 44   ;;  %s4657_s11 = smov 55  }
  0x19   : > { %443 = vst.msk [vmem:[#allocation3 + $0x18] sm:$0xf] %vm440_vm0, %v438_v14  ;;  %441 = vst.msk [vmem:[#allocation3] sm:$0xf] %vm440_vm0, %v436_v15  ;;  %v439_v16 = vld [vmem:[%s4786_s23 + $0x18] sm:$0xf] }
  0x1a   : > { %444 = vst.msk [vmem:[#allocation3 + $0x24] sm:$0xf] %vm440_vm0, %v439_v16  ;;  %v437_v17 = vld [vmem:[%s4786_s23 + $0x8] sm:$0xf]  ;;  %v523_v18 = vld [vmem:[%s4786_s23 + $0x1c] sm:$0xf] }
  0x1b   : > { %442 = vst.msk [vmem:[#allocation3 + $0xc] sm:$0xf] %vm440_vm0, %v437_v17  ;;  %v522_v19 = vld [vmem:[%s4786_s23 + $0x14] sm:$0xf]  ;;  %v4161_v20 = vld [vmem:[%s4786_s23 + $0x10] sm:$0xf] }
  0x1c   : > { %480 = vrot.lane.b32.xlu1 %v471_v4, %s4654_s28  ;;  %478 = vrot.lane.b32.xlu0 %v470_v5, %s4654_s28  ;;  %v4160_v21 = vld [vmem:[%s4786_s23 + $0x8] sm:$0xf]  ;;  %v4163_v22 = vld [vmem:[%s4786_s23 + $0x20] sm:$0xf]  ;;  %s4658_s12 = smov 66   ;;  %s4659_s13 = smov 77  }
  0x1d   : > { %v4162_v23 = vld [vmem:[%s4786_s23 + $0x18] sm:$0xf]  ;;  %v4165_v24 = vld [vmem:[%s4786_s23 + $0x11] sm:$0xf]  ;;  %v4164_v25 = vld [vmem:[%s4786_s23 + $0x9] sm:$0xf] }
  0x1e   : > { %v4167_v26 = vld [vmem:[%s4786_s23 + $0x21] sm:$0xf]  ;;  %v4166_v27 = vld [vmem:[%s4786_s23 + $0x19] sm:$0xf]  ;;  %v4169_v28 = vld [vmem:[%s4786_s23 + $0x12] sm:$0xf] }
  0x1f   : > { %v4168_v29 = vld [vmem:[%s4786_s23 + $0xa] sm:$0xf]  ;;  %v4171_v30 = vld [vmem:[%s4786_s23 + $0x22] sm:$0xf]  ;;  %v4170_v31 = vld [vmem:[%s4786_s23 + $0x1a] sm:$0xf] }
  0x20   : > { %484 = vrot.lane.b32.xlu1 %v473_v6, %s4654_s28  ;;  %482 = vrot.lane.b32.xlu0 %v472_v7, %s4654_s28  ;;  %v4173_v32 = vld [vmem:[%s4786_s23 + $0x13] sm:$0xf]  ;;  %v4172_v33 = vld [vmem:[%s4786_s23 + $0xb] sm:$0xf]  ;;  %s4660_s14 = smov 88   ;;  %s4661_s20 = smov 121  }
  0x21   : > { %v4175_v34 = vld [vmem:[%s4786_s23 + $0x23] sm:$0xf]  ;;  %v4174_v35 = vld [vmem:[%s4786_s23 + $0x1b] sm:$0xf]  ;;  %v4184_v37 = vld [vmem:[%s4786_s23 + $0x11] sm:$0xf] }
  0x22   : > { %v4185_v36 = vld [vmem:[%s4786_s23 + $0x19] sm:$0xf]  ;;  %v4187_v38 = vld [vmem:[%s4786_s23 + $0x29] sm:$0xf]  ;;  %v4186_v39 = vld [vmem:[%s4786_s23 + $0x21] sm:$0xf] }
  0x23   : > { %v4177_v40 = vld [vmem:[%s4786_s23 + $0x14] sm:$0xf]  ;;  %v4176_v41 = vld [vmem:[%s4786_s23 + $0xc] sm:$0xf]  ;;  %s4662_s21 = smov 99   ;;  %s4663_s22 = smov 110  }
  0x24   : > { %505 = vrot.lane.b32.xlu1 %v496_v8, %s4655_s29  ;;  %503 = vrot.lane.b32.xlu0 %v495_v9, %s4655_s29  ;;  %v4179_v42 = vld [vmem:[%s4786_s23 + $0x24] sm:$0xf]  ;;  %v4178_v43 = vld [vmem:[%s4786_s23 + $0x1c] sm:$0xf]  ;;  %s4664_s24 = smov 4   ;;  %s4665_s25 = smov 15  }
  0x25   : > { %v4181_v44 = vld [vmem:[%s4786_s23 + $0x18] sm:$0xf]  ;;  %v4180_v45 = vld [vmem:[%s4786_s23 + $0x10] sm:$0xf]  ;;  %v4183_v46 = vld [vmem:[%s4786_s23 + $0x28] sm:$0xf] }
  0x26   : > { %v4182_v47 = vld [vmem:[%s4786_s23 + $0x20] sm:$0xf]  ;;  %v4189_v48 = vld [vmem:[%s4786_s23 + $0x1a] sm:$0xf]  ;;  %v4188_v49 = vld [vmem:[%s4786_s23 + $0x12] sm:$0xf] }
  0x27   : > { %v4191_v50 = vld [vmem:[%s4786_s23 + $0x2a] sm:$0xf]  ;;  %v4190_v51 = vld [vmem:[%s4786_s23 + $0x22] sm:$0xf]  ;;  %v4193_v52 = vld [vmem:[%s4786_s23 + $0x1b] sm:$0xf] }
  0x28   : > { %509 = vrot.lane.b32.xlu1 %v498_v10, %s4655_s29  ;;  %507 = vrot.lane.b32.xlu0 %v497_v11, %s4655_s29  ;;  %v4192_v53 = vld [vmem:[%s4786_s23 + $0x13] sm:$0xf]  ;;  %v4195_v54 = vld [vmem:[%s4786_s23 + $0x2b] sm:$0xf]  ;;  %s4666_s27 = smov 26   ;;  %s4667_s28 = smov 37  }
  0x29   : > { %v4194_v55 = vld [vmem:[%s4786_s23 + $0x23] sm:$0xf]  ;;  %v4197_v56 = vld [vmem:[%s4786_s23 + $0x1c] sm:$0xf]  ;;  %v4196_v57 = vld [vmem:[%s4786_s23 + $0x14] sm:$0xf] }
  0x2a   : > { %v4199_v58 = vld [vmem:[%s4786_s23 + $0x2c] sm:$0xf]  ;;  %v4198_v59 = vld [vmem:[%s4786_s23 + $0x24] sm:$0xf]  ;;  %v4201_v60 = vld [vmem:[%s4786_s23 + $0x20] sm:$0xf] }
  0x2b   : > { %v4200_v61 = vld [vmem:[%s4786_s23 + $0x18] sm:$0xf]  ;;  %v4203_v62 = vld [vmem:[%s4786_s23 + $0x30] sm:$0xf]  ;;  %v4202_v63 = vld [vmem:[%s4786_s23 + $0x28] sm:$0xf] }
  0x2c   : > { %530 = vrot.lane.b32.xlu1 %v521_v12, %s4656_s30  ;;  %528 = vrot.lane.b32.xlu0 %v520_v13, %s4656_s30  ;;  %v4205_v2 = vld [vmem:[%s4786_s23 + $0x21] sm:$0xf]  ;;  %v4204_v3 = vld [vmem:[%s4786_s23 + $0x19] sm:$0xf]  ;;  %s4668_s29 = smov 48   ;;  %vm641_vm8 = vcmask 806592  }
  0x2d   : > { %v4207_v6 = vld [vmem:[%s4786_s23 + $0x31] sm:$0xf]  ;;  %v4206_v7 = vld [vmem:[%s4786_s23 + $0x29] sm:$0xf]  ;;  %v4209_v10 = vld [vmem:[%s4786_s23 + $0x22] sm:$0xf] }
  0x2e   : > { %v4208_v11 = vld [vmem:[%s4786_s23 + $0x1a] sm:$0xf]  ;;  %v4211_v14 = vld [vmem:[%s4786_s23 + $0x32] sm:$0xf]  ;;  %v4210_v15 = vld [vmem:[%s4786_s23 + $0x2a] sm:$0xf] }
  0x2f   : > { %vm377_vm9 = vcmask 64512   ;;  %vm380_vm10 = vcmask 1043456   ;;  %vm381_vm11 = vcmask 588804   ;;  %vm387_vm13 = vcmask 97280  }
  0x30   : > { %534 = vrot.lane.b32.xlu1 %v523_v18, %s4656_s30  ;;  %532 = vrot.lane.b32.xlu0 %v522_v19, %s4656_s30  ;;  %s4669_s30 = smov 59   ;;  %v4213_v18 = vld [vmem:[%s4786_s23 + $0x23] sm:$0xf]  ;;  %v4212_v19 = vld [vmem:[%s4786_s23 + $0x1b] sm:$0xf]  ;;  %vm4959_vm12 = vmor %vm381_vm11, %vm380_vm10  ;;  %vm404_vm14 = vcmask 62464  }
  0x31   : > { %vm411_vm15 = vcmask 128000   ;;  %vm1253_vm0 = vcmask 1040384   ;;  %vm778_vm10 = vcmask 207992   ;;  %vm803_vm11 = vcmask 298192  }
  0x34   : > { %556 = vrot.lane.b32.xlu1 %v4161_v20, %s4657_s11  ;;  %554 = vrot.lane.b32.xlu0 %v4160_v21, %s4657_s11 }
  0x38   : > { %560 = vrot.lane.b32.xlu1 %v4163_v22, %s4657_s11  ;;  %558 = vrot.lane.b32.xlu0 %v4162_v23, %s4657_s11  ;;  %s4670_s11 = smov 70   ;;  %v4215_v22 = vld [vmem:[%s4786_s23 + $0x33] sm:$0xf]  ;;  %v4214_v23 = vld [vmem:[%s4786_s23 + $0x2b] sm:$0xf] }
  0x3c   : > { %581 = vrot.lane.b32.xlu1 %v4165_v24, %s4658_s12  ;;  %579 = vrot.lane.b32.xlu0 %v4164_v25, %s4658_s12 }
  0x40   : > { %585 = vrot.lane.b32.xlu1 %v4167_v26, %s4658_s12  ;;  %583 = vrot.lane.b32.xlu0 %v4166_v27, %s4658_s12  ;;  %v4217_v26 = vld [vmem:[%s4786_s23 + $0x24] sm:$0xf]  ;;  %v4216_v27 = vld [vmem:[%s4786_s23 + $0x1c] sm:$0xf]  ;;  %s4671_s12 = smov 81  }
  0x44   : > { %606 = vrot.lane.b32.xlu1 %v4169_v28, %s4659_s13  ;;  %604 = vrot.lane.b32.xlu0 %v4168_v29, %s4659_s13 }
  0x48   : > { %610 = vrot.lane.b32.xlu1 %v4171_v30, %s4659_s13  ;;  %608 = vrot.lane.b32.xlu0 %v4170_v31, %s4659_s13  ;;  %v4219_v30 = vld [vmem:[%s4786_s23 + $0x34] sm:$0xf]  ;;  %v4218_v31 = vld [vmem:[%s4786_s23 + $0x2c] sm:$0xf]  ;;  %s4674_s13 = smov 103  }
  0x4c   : > { %631 = vrot.lane.b32.xlu1 %v4173_v32, %s4660_s14  ;;  %629 = vrot.lane.b32.xlu0 %v4172_v33, %s4660_s14 }
  0x50   : > { %635 = vrot.lane.b32.xlu1 %v4175_v34, %s4660_s14  ;;  %633 = vrot.lane.b32.xlu0 %v4174_v35, %s4660_s14  ;;  %v4484_v34 = vld [vmem:[%s6203_s1 + $0x40] sm:$0xff]   ;;  %s4679_s14 = smov 8  }
  0x51   : > { %v4485_v35 = vld [vmem:[%s6203_s1] sm:$0xff]   ;;  %4346 = vmatprep.subr.bf16.mxu0 %v4484_v34 }
  0x52   : > { %4347 = vmatpush3.bf16.msra.mxu0 %v4485_v35 }
  0x54   : > { %707 = vrot.lane.b32.xlu1 %v4185_v36, %s4661_s20  ;;  %705 = vrot.lane.b32.xlu0 %v4184_v37, %s4661_s20  ;;  %v4221_v36 = vld [vmem:[%s4786_s23 + $0x28] sm:$0xf]  ;;  %v4220_v37 = vld [vmem:[%s4786_s23 + $0x20] sm:$0xf] }
  0x58   : > { %711 = vrot.lane.b32.xlu1 %v4187_v38, %s4661_s20  ;;  %709 = vrot.lane.b32.xlu0 %v4186_v39, %s4661_s20 }
  0x5c   : > { %656 = vrot.lane.b32.xlu1 %v4177_v40, %s4662_s21  ;;  %654 = vrot.lane.b32.xlu0 %v4176_v41, %s4662_s21  ;;  %v4486_v40 = vld [vmem:[%s6203_s1 + $0x48] sm:$0xff]  }
  0x5d   : > { %v4487_v41 = vld [vmem:[%s6203_s1 + $0x8] sm:$0xff]   ;;  %4348 = vmatprep.subr.bf16.mxu0 %v4486_v40 }
  0x5e   : > { %4349 = vmatpush3.bf16.msra.mxu0 %v4487_v41 }
  0x60   : > { %660 = vrot.lane.b32.xlu1 %v4179_v42, %s4662_s21  ;;  %658 = vrot.lane.b32.xlu0 %v4178_v43, %s4662_s21  ;;  %v4223_v42 = vld [vmem:[%s4786_s23 + $0x38] sm:$0xf]  ;;  %v4222_v43 = vld [vmem:[%s4786_s23 + $0x30] sm:$0xf] }
  0x64   : > { %682 = vrot.lane.b32.xlu1 %v4181_v44, %s4663_s22  ;;  %680 = vrot.lane.b32.xlu0 %v4180_v45, %s4663_s22 }
  0x68   : > { %686 = vrot.lane.b32.xlu1 %v4183_v46, %s4663_s22  ;;  %684 = vrot.lane.b32.xlu0 %v4182_v47, %s4663_s22  ;;  %v4488_v46 = vld [vmem:[%s6203_s1 + $0x50] sm:$0xff]   ;;  %s4673_s22 = smov 125  }
  0x69   : > { %v4489_v47 = vld [vmem:[%s6203_s1 + $0x10] sm:$0xff]   ;;  %4350 = vmatprep.subr.bf16.mxu0 %v4488_v46 }
  0x6a   : > { %4351 = vmatpush3.bf16.msra.mxu0 %v4489_v47 }
  0x6c   : > { %743 = vrot.lane.b32.xlu1 %v4189_v48, %s4664_s24  ;;  %741 = vrot.lane.b32.xlu0 %v4188_v49, %s4664_s24  ;;  %v4233_v48 = vld [vmem:[%s4786_s23 + $0x2b] sm:$0xf]  ;;  %v4232_v49 = vld [vmem:[%s4786_s23 + $0x23] sm:$0xf] }
  0x70   : > { %747 = vrot.lane.b32.xlu1 %v4191_v50, %s4664_s24  ;;  %745 = vrot.lane.b32.xlu0 %v4190_v51, %s4664_s24 }
  0x74   : > { %768 = vrot.lane.b32.xlu1 %v4193_v52, %s4665_s25  ;;  %766 = vrot.lane.b32.xlu0 %v4192_v53, %s4665_s25  ;;  %v4490_v52 = vld [vmem:[%s6203_s1 + $0x58] sm:$0xff]  }
  0x75   : > { %v4491_v53 = vld [vmem:[%s6203_s1 + $0x18] sm:$0xff]   ;;  %4352 = vmatprep.subr.bf16.mxu0 %v4490_v52 }
  0x76   : > { %4353 = vmatpush3.bf16.msra.mxu0 %v4491_v53 }
  0x78   : > { %772 = vrot.lane.b32.xlu1 %v4195_v54, %s4665_s25  ;;  %770 = vrot.lane.b32.xlu0 %v4194_v55, %s4665_s25  ;;  %v4235_v54 = vld [vmem:[%s4786_s23 + $0x3b] sm:$0xf]  ;;  %v4234_v55 = vld [vmem:[%s4786_s23 + $0x33] sm:$0xf] }
  0x7c   : > { %793 = vrot.lane.b32.xlu1 %v4197_v56, %s4666_s27  ;;  %791 = vrot.lane.b32.xlu0 %v4196_v57, %s4666_s27 }
  0x80   : > { %797 = vrot.lane.b32.xlu1 %v4199_v58, %s4666_s27  ;;  %795 = vrot.lane.b32.xlu0 %v4198_v59, %s4666_s27  ;;  %v4492_v58 = vld [vmem:[%s6203_s1 + $0x60] sm:$0xff]  }
  0x81   : > { %v4493_v59 = vld [vmem:[%s6203_s1 + $0x20] sm:$0xff]   ;;  %4354 = vmatprep.subr.bf16.mxu0 %v4492_v58 }
  0x82   : > { %4355 = vmatpush3.bf16.msra.mxu0 %v4493_v59 }
  0x84   : > { %819 = vrot.lane.b32.xlu1 %v4201_v60, %s4667_s28  ;;  %817 = vrot.lane.b32.xlu0 %v4200_v61, %s4667_s28  ;;  %v4225_v60 = vld [vmem:[%s4786_s23 + $0x29] sm:$0xf]  ;;  %v4224_v61 = vld [vmem:[%s4786_s23 + $0x21] sm:$0xf] }
  0x86   : > { %v458_v0 = vpop.permute.xlu1 %457  ;;  %v454_v1 = vpop.permute.xlu0 %453 }
  0x87   : > { %468 = vst.msk [vmem:[#allocation3 + $0x18] sm:$0xf] %vm465_vm1, %v458_v0  ;;  %466 = vst.msk [vmem:[#allocation3] sm:$0xf] %vm465_vm1, %v454_v1  ;;  %v4494_v0 = vld [vmem:[%s6203_s1 + $0x68] sm:$0xff]  }
  0x88   : > { %823 = vrot.lane.b32.xlu1 %v4203_v62, %s4667_s28  ;;  %821 = vrot.lane.b32.xlu0 %v4202_v63, %s4667_s28  ;;  %s4672_s28 = smov 92   ;;  %v4495_v1 = vld [vmem:[%s6203_s1 + $0x28] sm:$0xff]  }
  0x89   : > { %4356 = vmatprep.subr.bf16.mxu0 %v4494_v0 }
  0x8a   : > { %v460_v4 = vpop.permute.xlu1 %459  ;;  %v456_v5 = vpop.permute.xlu0 %455  ;;  %4357 = vmatpush3.bf16.msra.mxu0 %v4495_v1 }
  0x8b   : > { %469 = vst.msk [vmem:[#allocation3 + $0x24] sm:$0xf] %vm465_vm1, %v460_v4  ;;  %467 = vst.msk [vmem:[#allocation3 + $0xc] sm:$0xf] %vm465_vm1, %v456_v5  ;;  %vm1254_vm1 = vcmask 1041408  }
  0x8c   : > { %844 = vrot.lane.b32.xlu1 %v4205_v2, %s4668_s29  ;;  %842 = vrot.lane.b32.xlu0 %v4204_v3, %s4668_s29  ;;  %v4227_v2 = vld [vmem:[%s4786_s23 + $0x39] sm:$0xf]  ;;  %v4226_v3 = vld [vmem:[%s4786_s23 + $0x31] sm:$0xf] }
  0x8e   : > { %v481_v8 = vpop.permute.xlu1 %480  ;;  %v479_v9 = vpop.permute.xlu0 %478 }
  0x8f   : > { %492 = vst.msk [vmem:[#allocation3 + $0xc] sm:$0xf] %vm490_vm2, %v481_v8  ;;  %491 = vst.msk [vmem:[#allocation3] sm:$0xf] %vm490_vm2, %v479_v9  ;;  %v4229_v8 = vld [vmem:[%s4786_s23 + $0x2a] sm:$0xf] }
  0x90   : > { %848 = vrot.lane.b32.xlu1 %v4207_v6, %s4668_s29  ;;  %846 = vrot.lane.b32.xlu0 %v4206_v7, %s4668_s29  ;;  %v4496_v6 = vld [vmem:[%s6203_s1 + $0x70] sm:$0xff]   ;;  %v4228_v9 = vld [vmem:[%s4786_s23 + $0x22] sm:$0xf]  ;;  %s4675_s29 = smov 114  }
  0x91   : > { %v4497_v7 = vld [vmem:[%s6203_s1 + $0x30] sm:$0xff]   ;;  %4358 = vmatprep.subr.bf16.mxu0 %v4496_v6 }
  0x92   : > { %v485_v12 = vpop.permute.xlu1 %484  ;;  %v483_v13 = vpop.permute.xlu0 %482  ;;  %4359 = vmatpush3.bf16.msra.mxu0 %v4497_v7 }
  0x93   : > { %494 = vst.msk [vmem:[#allocation3 + $0x24] sm:$0xf] %vm490_vm2, %v485_v12  ;;  %493 = vst.msk [vmem:[#allocation3 + $0x18] sm:$0xf] %vm490_vm2, %v483_v13  ;;  %v4498_v12 = vld [vmem:[%s6203_s1 + $0x78] sm:$0xff]   ;;  %vm4678_vm2 = vmmov 0  }
  0x94   : > { %869 = vrot.lane.b32.xlu1 %v4209_v10, %s4669_s30  ;;  %867 = vrot.lane.b32.xlu0 %v4208_v11, %s4669_s30  ;;  %v4951_v13 = vld [vmem:[%s6203_s1 + $0x38] sm:$0xff]  }
  0x95   : > { %4360 = vmatprep.subr.bf16.mxu0 %v4498_v12 }
  0x96   : > { %v506_v16 = vpop.permute.xlu1 %505  ;;  %v504_v17 = vpop.permute.xlu0 %503  ;;  %4361 = vmatpush3.bf16.msra.mxu0 %v4951_v13 }
  0x97   : > { %517 = vst.msk [vmem:[#allocation3 + $0xc] sm:$0xf] %vm515_vm3, %v506_v16  ;;  %516 = vst.msk [vmem:[#allocation3] sm:$0xf] %vm515_vm3, %v504_v17  ;;  %v4231_v16 = vld [vmem:[%s4786_s23 + $0x3a] sm:$0xf] }
  0x98   : > { %873 = vrot.lane.b32.xlu1 %v4211_v14, %s4669_s30  ;;  %871 = vrot.lane.b32.xlu0 %v4210_v15, %s4669_s30  ;;  %v4676_v14 = vmov 0.0   ;;  %v4230_v17 = vld [vmem:[%s4786_s23 + $0x32] sm:$0xf] }
  0x99   : > { %378 = vst.msk [vmem:[#allocation5] sm:$0xff] %vm377_vm9, %v4676_v14  ;;  %379 = vst.msk [vmem:[#allocation5 + $0x8] sm:$0xff] %vm377_vm9, %v4676_v14  ;;  %4377 = vmatprep.subr.bf16.mxu1 %v4676_v14  ;;  %4381 = vmatprep.mubr.msk.bf16.mxu1 %vm4678_vm2, %v4676_v14  ;;  %vm980_vm2 = vcmask 929592  }
  0x9a   : > { %v510_v20 = vpop.permute.xlu1 %509  ;;  %v508_v21 = vpop.permute.xlu0 %507  ;;  %396 = vst.msk [vmem:[#allocation6] sm:$0xff] %vm377_vm9, %v4676_v14  ;;  %397 = vst.msk [vmem:[#allocation6 + $0x8] sm:$0xff] %vm377_vm9, %v4676_v14 }
  0x9b   : > { %519 = vst.msk [vmem:[#allocation3 + $0x24] sm:$0xf] %vm515_vm3, %v510_v20  ;;  %518 = vst.msk [vmem:[#allocation3 + $0x18] sm:$0xf] %vm515_vm3, %v508_v21  ;;  %v4506_v20 = vld [vmem:[%s6203_s1 + $0x80] sm:$0xff]   ;;  %vm666_vm3 = vcmask 896792  }
  0x9c   : > { %894 = vrot.lane.b32.xlu1 %v4213_v18, %s4670_s11  ;;  %892 = vrot.lane.b32.xlu0 %v4212_v19, %s4670_s11  ;;  %398 = vst.msk [vmem:[#allocation6 + $0x10] sm:$0xff] %vm377_vm9, %v4676_v14  ;;  %399 = vst.msk [vmem:[#allocation6 + $0x18] sm:$0xff] %vm377_vm9, %v4676_v14  ;;  %v4237_v21 = vld [vmem:[%s4786_s23 + $0x2c] sm:$0xf] }
  0x9d   : > { %400 = vst.msk [vmem:[#allocation6 + $0x20] sm:$0xff] %vm377_vm9, %v4676_v14  ;;  %401 = vst.msk [vmem:[#allocation6 + $0x28] sm:$0xff] %vm377_vm9, %v4676_v14  ;;  %4378 = vmatpush3.bf16.msra.mxu1 %v4506_v20 }
  0x9e   : > { %v531_v24 = vpop.permute.xlu1 %530  ;;  %v529_v25 = vpop.permute.xlu0 %528  ;;  %402 = vst.msk [vmem:[#allocation6 + $0x30] sm:$0xff] %vm377_vm9, %v4676_v14  ;;  %403 = vst.msk [vmem:[#allocation6 + $0x38] sm:$0xff] %vm377_vm9, %v4676_v14  ;;  %4379 = vmatprep.subr.bf16.mxu1 %v4676_v14  ;;  %vm753_vm9 = vcmask 117792  }
  0x9f   : > { %542 = vst.msk [vmem:[#allocation3 + $0xc] sm:$0xf] %vm540_vm4, %v531_v24  ;;  %541 = vst.msk [vmem:[#allocation3] sm:$0xf] %vm540_vm4, %v529_v25  ;;  %v4236_v25 = vld [vmem:[%s4786_s23 + $0x24] sm:$0xf] }
  0xa0   : > { %898 = vrot.lane.b32.xlu1 %v4215_v22, %s4670_s11  ;;  %896 = vrot.lane.b32.xlu0 %v4214_v23, %s4670_s11  ;;  %383 = vst.msk [vmem:[#allocation4] sm:$0xff] %vm4959_vm12, %v4676_v14  ;;  %384 = vst.msk [vmem:[#allocation4 + $0x8] sm:$0xff] %vm4959_vm12, %v4676_v14  ;;  %v4507_v22 = vld [vmem:[%s6203_s1 + $0x88] ss:$0 sps:$4 sm:$0x33]   ;;  %v4677_v23 = vmov 65535  }
  0xa1   : > { %385 = vst.msk [vmem:[#allocation4 + $0x10] sm:$0xff] %vm4959_vm12, %v4676_v14  ;;  %386 = vst.msk [vmem:[#allocation4 + $0x18] sm:$0xff] %vm4959_vm12, %v4676_v14  ;;  %v1255_v24 = vsel %vm1253_vm0, 4294967295, %v4677_v23  ;;  %vm829_vm12 = vcmask 388392   ;;  %vm929_vm0 = vcmask 749192  }
  0xa2   : > { %v535_v28 = vpop.permute.xlu1 %534  ;;  %v533_v29 = vpop.permute.xlu0 %532  ;;  %388 = vst.msk [vmem:[%s4791_s26] sm:$0xff] %vm387_vm13, %v4676_v14  ;;  %389 = vst.msk [vmem:[%s4791_s26 + $0x8] sm:$0xff] %vm387_vm13, %v4676_v14 }
  0xa3   : > { %544 = vst.msk [vmem:[#allocation3 + $0x24] sm:$0xf] %vm540_vm4, %v535_v28  ;;  %543 = vst.msk [vmem:[#allocation3 + $0x18] sm:$0xf] %vm540_vm4, %v533_v29  ;;  %vm726_vm4 = vcmask 1044424  }
  0xa4   : > { %919 = vrot.lane.b32.xlu1 %v4217_v26, %s4671_s12  ;;  %917 = vrot.lane.b32.xlu0 %v4216_v27, %s4671_s12  ;;  %390 = vst.msk [vmem:[%s4791_s26 + $0x10] sm:$0xff] %vm387_vm13, %v4676_v14  ;;  %391 = vst.msk [vmem:[%s4791_s26 + $0x18] sm:$0xff] %vm387_vm13, %v4676_v14  ;;  %v1256_v26 = vsel %vm1254_vm1, %v1255_v24, 0  ;;  %vm955_vm1 = vcmask 839392  }
  0xa5   : > { %392 = vst.msk [vmem:[%s4791_s26 + $0x20] sm:$0xff] %vm387_vm13, %v4676_v14  ;;  %393 = vst.msk [vmem:[%s4791_s26 + $0x28] sm:$0xff] %vm387_vm13, %v4676_v14  ;;  %v1258_v29 = vand.u32 %v4507_v22, %v1256_v26 }
  0xa6   : > { %v557_v32 = vpop.permute.xlu1 %556  ;;  %v555_v33 = vpop.permute.xlu0 %554  ;;  %394 = vst.msk [vmem:[%s4791_s26 + $0x30] sm:$0xff] %vm387_vm13, %v4676_v14  ;;  %395 = vst.msk [vmem:[%s4791_s26 + $0x38] sm:$0xff] %vm387_vm13, %v4676_v14  ;;  %vm854_vm13 = vcmask 478592  }
  0xa7   : > { %568 = vst.msk [vmem:[#allocation3 + $0xc] sm:$0xf] %vm566_vm5, %v557_v32  ;;  %567 = vst.msk [vmem:[#allocation3] sm:$0xf] %vm566_vm5, %v555_v33  ;;  %4380 = vmatpush3.bf16.msra.mxu1 %v1258_v29 }
  0xa8   : > { %923 = vrot.lane.b32.xlu1 %v4219_v30, %s4671_s12  ;;  %921 = vrot.lane.b32.xlu0 %v4218_v31, %s4671_s12  ;;  %405 = vst.msk [vmem:[#allocation7] sm:$0x3f] %vm404_vm14, %v4676_v14  ;;  %406 = vst.msk [vmem:[#allocation7 + $0x8] sm:$0x3f] %vm404_vm14, %v4676_v14  ;;  %v4239_v30 = vld [vmem:[%s4786_s23 + $0x3c] sm:$0xf] }
  0xa9   : > { %407 = vst.msk [vmem:[#allocation7 + $0x10] sm:$0x3f] %vm404_vm14, %v4676_v14  ;;  %408 = vst.msk [vmem:[#allocation7 + $0x18] sm:$0x3f] %vm404_vm14, %v4676_v14  ;;  %v4238_v31 = vld [vmem:[%s4786_s23 + $0x34] sm:$0xf] }
  0xaa   : > { %v561_v38 = vpop.permute.xlu1 %560  ;;  %v559_v39 = vpop.permute.xlu0 %558  ;;  %409 = vst.msk [vmem:[#allocation7 + $0x20] sm:$0x3f] %vm404_vm14, %v4676_v14  ;;  %410 = vst.msk [vmem:[#allocation7 + $0x28] sm:$0x3f] %vm404_vm14, %v4676_v14  ;;  %vm879_vm14 = vcmask 568792  }
  0xab   : > { %570 = vst.msk [vmem:[#allocation3 + $0x24] sm:$0xf] %vm566_vm5, %v561_v38  ;;  %569 = vst.msk [vmem:[#allocation3 + $0x18] sm:$0xf] %vm566_vm5, %v559_v39  ;;  %vm727_vm5 = vcmask 31748  }
  0xac   : > { %945 = vrot.lane.b32.xlu1 %v4221_v36, %s4672_s28  ;;  %943 = vrot.lane.b32.xlu0 %v4220_v37, %s4672_s28  ;;  %413 = vst.msk [vmem:[#allocation9 + $0x8] sm:$0x3f] %vm411_vm15, %v4676_v14  ;;  %414 = vst.msk [vmem:[#allocation9 + $0x10] sm:$0x3f] %vm411_vm15, %v4676_v14 }
  0xad   : > { %415 = vst.msk [vmem:[#allocation9 + $0x18] sm:$0x3f] %vm411_vm15, %v4676_v14  ;;  %416 = vst.msk [vmem:[#allocation9 + $0x20] sm:$0x3f] %vm411_vm15, %v4676_v14 }
  0xae   : > { %v582_v44 = vpop.permute.xlu1 %581  ;;  %v580_v45 = vpop.permute.xlu0 %579  ;;  %417 = vst.msk [vmem:[#allocation9 + $0x28] sm:$0x3f] %vm411_vm15, %v4676_v14  ;;  %419 = vst.msk [vmem:[#allocation9 + $0x38] sm:$0x3f] %vm411_vm15, %v4676_v14 }
  0xaf   : > { %593 = vst.msk [vmem:[#allocation3 + $0xc] sm:$0xf] %vm591_vm6, %v582_v44  ;;  %592 = vst.msk [vmem:[#allocation3] sm:$0xf] %vm591_vm6, %v580_v45 }
  0xb0   : > { %949 = vrot.lane.b32.xlu1 %v4223_v42, %s4672_s28  ;;  %947 = vrot.lane.b32.xlu0 %v4222_v43, %s4672_s28  ;;  %420 = vst.msk [vmem:[#allocation9 + $0x40] sm:$0x3f] %vm411_vm15, %v4676_v14  ;;  %421 = vst.msk [vmem:[#allocation9 + $0x48] sm:$0x3f] %vm411_vm15, %v4676_v14 }
  0xb1   : > { %422 = vst.msk [vmem:[#allocation9 + $0x50] sm:$0x3f] %vm411_vm15, %v4676_v14  ;;  %423 = vst.msk [vmem:[#allocation9 + $0x58] sm:$0x3f] %vm411_vm15, %v4676_v14 }
  0xb2   : > { %v586_v50 = vpop.permute.xlu1 %585  ;;  %v584_v51 = vpop.permute.xlu0 %583  ;;  %424 = vst.msk [vmem:[#allocation9 + $0x60] sm:$0x3f] %vm411_vm15, %v4676_v14  ;;  %425 = vst.msk [vmem:[#allocation9 + $0x68] sm:$0x3f] %vm411_vm15, %v4676_v14 }
  0xb3   : > { %595 = vst.msk [vmem:[#allocation3 + $0x24] sm:$0xf] %vm591_vm6, %v586_v50  ;;  %594 = vst.msk [vmem:[#allocation3 + $0x18] sm:$0xf] %vm591_vm6, %v584_v51  ;;  %vm717_vm6 = vcmask 990208  }
  0xb4   : > { %1020 = vrot.lane.b32.xlu1 %v4233_v48, %s4673_s22  ;;  %1018 = vrot.lane.b32.xlu0 %v4232_v49, %s4673_s22  ;;  %426 = vst.msk [vmem:[#allocation9 + $0x70] sm:$0x3f] %vm411_vm15, %v4676_v14  ;;  %427 = vst.msk [vmem:[#allocation9 + $0x78] sm:$0x3f] %vm411_vm15, %v4676_v14 }
  0xb5   : > { %428 = vst.msk [vmem:[#allocation9 + $0x80] sm:$0x3f] %vm411_vm15, %v4676_v14  ;;  %430 = vst.msk [vmem:[#allocation9 + $0x90] sm:$0x3f] %vm411_vm15, %v4676_v14 }
  0xb6   : > { %v607_v56 = vpop.permute.xlu1 %606  ;;  %v605_v57 = vpop.permute.xlu0 %604  ;;  %431 = vst.msk [vmem:[#allocation9 + $0x98] sm:$0x3f] %vm411_vm15, %v4676_v14  ;;  %432 = vst.msk [vmem:[#allocation9 + $0xa0] sm:$0x3f] %vm411_vm15, %v4676_v14 }
  0xb7   : > { %618 = vst.msk [vmem:[#allocation3 + $0xc] sm:$0xf] %vm616_vm7, %v607_v56  ;;  %617 = vst.msk [vmem:[#allocation3] sm:$0xf] %vm616_vm7, %v605_v57 }
  0xb8   : > { %1024 = vrot.lane.b32.xlu1 %v4235_v54, %s4673_s22  ;;  %1022 = vrot.lane.b32.xlu0 %v4234_v55, %s4673_s22  ;;  %433 = vst.msk [vmem:[#allocation9 + $0xa8] sm:$0x3f] %vm411_vm15, %v4676_v14  ;;  %434 = vst.msk [vmem:[#allocation9 + $0xb0] sm:$0x3f] %vm411_vm15, %v4676_v14  ;;  %vm904_vm15 = vcmask 658992  }
  0xba   : > { %v611_v62 = vpop.permute.xlu1 %610  ;;  %v609_v63 = vpop.permute.xlu0 %608 }
  0xbb   : > { %620 = vst.msk [vmem:[#allocation3 + $0x24] sm:$0xf] %vm616_vm7, %v611_v62  ;;  %619 = vst.msk [vmem:[#allocation3 + $0x18] sm:$0xf] %vm616_vm7, %v609_v63  ;;  %vm692_vm7 = vcmask 986992  }
  0xbc   : > { %970 = vrot.lane.b32.xlu1 %v4225_v60, %s4674_s13  ;;  %968 = vrot.lane.b32.xlu0 %v4224_v61, %s4674_s13 }
  0xbe   : > { %v632_v4 = vpop.permute.xlu1 %631  ;;  %v630_v5 = vpop.permute.xlu0 %629 }
  0xbf   : > { %643 = vst.msk [vmem:[#allocation3 + $0xc] sm:$0xf] %vm641_vm8, %v632_v4  ;;  %642 = vst.msk [vmem:[#allocation3] sm:$0xf] %vm641_vm8, %v630_v5 }
  0xc0   : > { %974 = vrot.lane.b32.xlu1 %v4227_v2, %s4674_s13  ;;  %972 = vrot.lane.b32.xlu0 %v4226_v3, %s4674_s13 }
  0xc2   : > { %v636_v10 = vpop.permute.xlu1 %635  ;;  %v634_v11 = vpop.permute.xlu0 %633 }
  0xc3   : > { %645 = vst.msk [vmem:[#allocation3 + $0x24] sm:$0xf] %vm641_vm8, %v636_v10  ;;  %644 = vst.msk [vmem:[#allocation3 + $0x18] sm:$0xf] %vm641_vm8, %v634_v11 }
  0xc4   : > { %995 = vrot.lane.b32.xlu1 %v4229_v8, %s4675_s29  ;;  %993 = vrot.lane.b32.xlu0 %v4228_v9, %s4675_s29  ;;  %vm5089_vm8 = vmor %vm727_vm5, %vm726_vm4  ;;  %vm1040_vm4 = vcmask 64516   ;;  %vm1030_vm5 = vcmask 1022976  }
  0xc6   : > { %v708_v18 = vpop.permute.xlu1 %707  ;;  %v706_v19 = vpop.permute.xlu0 %705 }
  0xc7   : > { %v714_v36 = vrot.slane %v708_v18, 4  ;;  %v713_v37 = vrot.slane %v706_v19, 4 }
  0xc8   : > { %999 = vrot.lane.b32.xlu1 %v4231_v16, %s4675_s29  ;;  %997 = vrot.lane.b32.xlu0 %v4230_v17, %s4675_s29 }
  0xc9   : > { %v719_v41 = vsel %vm717_vm6, %v714_v36, %v708_v18  ;;  %v718_v42 = vsel %vm717_vm6, %v713_v37, %v706_v19 }
  0xca   : > { %v712_v27 = vpop.permute.xlu1 %711  ;;  %v710_v28 = vpop.permute.xlu0 %709 }
  0xcb   : > { %v716_v43 = vrot.slane %v712_v27, 4  ;;  %v715_v44 = vrot.slane %v710_v28, 4 }
  0xcc   : > { %1056 = vrot.lane.b32.xlu1 %v4237_v21, %s4679_s14  ;;  %1054 = vrot.lane.b32.xlu0 %v4236_v25, %s4679_s14 }
  0xcd   : > { %v721_v47 = vsel %vm717_vm6, %v716_v43, %v712_v27  ;;  %v720_v48 = vsel %vm717_vm6, %v715_v44, %v710_v28  ;;  %vm1005_vm6 = vcmask 1019792  }
  0xce   : > { %v657_v32 = vpop.permute.xlu1 %656  ;;  %v655_v33 = vpop.permute.xlu0 %654 }
  0xcf   : > { %668 = vst.msk [vmem:[#allocation3 + $0xc] sm:$0xf] %vm666_vm3, %v657_v32  ;;  %667 = vst.msk [vmem:[#allocation3] sm:$0xf] %vm666_vm3, %v655_v33 }
  0xd0   : > { %1060 = vrot.lane.b32.xlu1 %v4239_v30, %s4679_s14  ;;  %1058 = vrot.lane.b32.xlu0 %v4238_v31, %s4679_s14 }
  0xd2   : > { %v661_v34 = vpop.permute.xlu1 %660  ;;  %v659_v35 = vpop.permute.xlu0 %658 }
  0xd3   : > { %670 = vst.msk [vmem:[#allocation3 + $0x24] sm:$0xf] %vm666_vm3, %v661_v34  ;;  %669 = vst.msk [vmem:[#allocation3 + $0x18] sm:$0xf] %vm666_vm3, %v659_v35  ;;  %vm1039_vm3 = vcmask 1044456  }
  0xd6   : > { %v683_v39 = vpop.permute.xlu1 %682  ;;  %v681_v40 = vpop.permute.xlu0 %680 }
  0xd7   : > { %694 = vst.msk [vmem:[#allocation3 + $0xc] sm:$0xf] %vm692_vm7, %v683_v39  ;;  %693 = vst.msk [vmem:[#allocation3] sm:$0xf] %vm692_vm7, %v681_v40 }
  0xd8   : > { %730 = vst.msk [vmem:[#allocation3 + $0xc] sm:$0xff] %vm5089_vm8, %v719_v41  ;;  %729 = vst.msk [vmem:[#allocation3] sm:$0xff] %vm5089_vm8, %v718_v42 }
  0xda   : > { %v687_v45 = vpop.permute.xlu1 %686  ;;  %v685_v46 = vpop.permute.xlu0 %684 }
  0xdb   : > { %696 = vst.msk [vmem:[#allocation3 + $0x24] sm:$0xf] %vm692_vm7, %v687_v45  ;;  %695 = vst.msk [vmem:[#allocation3 + $0x18] sm:$0xf] %vm692_vm7, %v685_v46 }
  0xdc   : > { %731 = vst.msk [vmem:[#allocation3 + $0x18] sm:$0xff] %vm5089_vm8, %v720_v48  ;;  %732 = vst.msk [vmem:[#allocation3 + $0x24] sm:$0xff] %vm5089_vm8, %v721_v47  ;;  %vm1066_vm8 = vcmask 150592  }
  0xdd   : > { %vm5109_vm7 = vmor %vm1040_vm4, %vm1039_vm3 }
  0xde   : > { %v744_v49 = vpop.permute.xlu1 %743  ;;  %v742_v50 = vpop.permute.xlu0 %741 }
  0xdf   : > { %755 = vst.msk [vmem:[#allocation3 + $0x10] sm:$0xf] %vm753_vm9, %v744_v49  ;;  %754 = vst.msk [vmem:[#allocation3 + $0x4] sm:$0xf] %vm753_vm9, %v742_v50  ;;  %v4500_v46 = vld [vmem:[#allocation3] ss:$12 sps:$4 sm:$0xff]  }
  0xe2   : > { %v748_v51 = vpop.permute.xlu1 %747  ;;  %v746_v52 = vpop.permute.xlu0 %745 }
  0xe3   : > { %757 = vst.msk [vmem:[#allocation3 + $0x28] sm:$0xf] %vm753_vm9, %v748_v51  ;;  %756 = vst.msk [vmem:[#allocation3 + $0x1c] sm:$0xf] %vm753_vm9, %v746_v52  ;;  %v4503_v47 = vld [vmem:[#allocation3 + $0x18] ss:$12 sps:$4 sm:$0xff]  }
  0xe4   : > { %v1099_v50 = vpack.c.bf16 %v4503_v47, %v4500_v46  ;;  %vm1249_vm9 = vcmask 154624  }
  0xe6   : > { %v769_v53 = vpop.permute.xlu1 %768  ;;  %v767_v54 = vpop.permute.xlu0 %766 }
  0xe7   : > { %780 = vst.msk [vmem:[#allocation3 + $0x10] sm:$0xf] %vm778_vm10, %v769_v53  ;;  %779 = vst.msk [vmem:[#allocation3 + $0x4] sm:$0xf] %vm778_vm10, %v767_v54 }
  0xea   : > { %v773_v55 = vpop.permute.xlu1 %772  ;;  %v771_v56 = vpop.permute.xlu0 %770 }
  0xeb   : > { %782 = vst.msk [vmem:[#allocation3 + $0x28] sm:$0xf] %vm778_vm10, %v773_v55  ;;  %781 = vst.msk [vmem:[#allocation3 + $0x1c] sm:$0xf] %vm778_vm10, %v771_v56  ;;  %vm1342_vm10 = vcmask 261120  }
  0xee   : > { %v794_v57 = vpop.permute.xlu1 %793  ;;  %v792_v58 = vpop.permute.xlu0 %791 }
  0xef   : > { %805 = vst.msk [vmem:[#allocation3 + $0x10] sm:$0xf] %vm803_vm11, %v794_v57  ;;  %804 = vst.msk [vmem:[#allocation3 + $0x4] sm:$0xf] %vm803_vm11, %v792_v58  ;;  %v4240_v57 = vld [vmem:[%s6205_s3] ss:$0 sm:$0xff] }
  0xf2   : > { %v798_v59 = vpop.permute.xlu1 %797  ;;  %v796_v60 = vpop.permute.xlu0 %795 }
  0xf3   : > { %807 = vst.msk [vmem:[#allocation3 + $0x28] sm:$0xf] %vm803_vm11, %v798_v59  ;;  %806 = vst.msk [vmem:[#allocation3 + $0x1c] sm:$0xf] %vm803_vm11, %v796_v60 }
  0xf6   : > { %v820_v61 = vpop.permute.xlu1 %819  ;;  %v818_v62 = vpop.permute.xlu0 %817 }
  0xf7   : > { %831 = vst.msk [vmem:[#allocation3 + $0x10] sm:$0xf] %vm829_vm12, %v820_v61  ;;  %830 = vst.msk [vmem:[#allocation3 + $0x4] sm:$0xf] %vm829_vm12, %v818_v62 }
  0xfa   : > { %v824_v63 = vpop.permute.xlu1 %823  ;;  %v822_v0 = vpop.permute.xlu0 %821 }
  0xfb   : > { %833 = vst.msk [vmem:[#allocation3 + $0x28] sm:$0xf] %vm829_vm12, %v824_v63  ;;  %832 = vst.msk [vmem:[#allocation3 + $0x1c] sm:$0xf] %vm829_vm12, %v822_v0 }
  0xfe   : > { %v845_v1 = vpop.permute.xlu1 %844  ;;  %v843_v2 = vpop.permute.xlu0 %842 }
  0xff   : > { %856 = vst.msk [vmem:[#allocation3 + $0x10] sm:$0xf] %vm854_vm13, %v845_v1  ;;  %855 = vst.msk [vmem:[#allocation3 + $0x4] sm:$0xf] %vm854_vm13, %v843_v2 }
 0x102   : > { %v849_v3 = vpop.permute.xlu1 %848  ;;  %v847_v4 = vpop.permute.xlu0 %846 }
 0x103   : > { %858 = vst.msk [vmem:[#allocation3 + $0x28] sm:$0xf] %vm854_vm13, %v849_v3  ;;  %857 = vst.msk [vmem:[#allocation3 + $0x1c] sm:$0xf] %vm854_vm13, %v847_v4 }
 0x106   : > { %v870_v5 = vpop.permute.xlu1 %869  ;;  %v868_v6 = vpop.permute.xlu0 %867 }
 0x107   : > { %881 = vst.msk [vmem:[#allocation3 + $0x10] sm:$0xf] %vm879_vm14, %v870_v5  ;;  %880 = vst.msk [vmem:[#allocation3 + $0x4] sm:$0xf] %vm879_vm14, %v868_v6 }
 0x10a   : > { %v874_v7 = vpop.permute.xlu1 %873  ;;  %v872_v8 = vpop.permute.xlu0 %871 }
 0x10b   : > { %883 = vst.msk [vmem:[#allocation3 + $0x28] sm:$0xf] %vm879_vm14, %v874_v7  ;;  %882 = vst.msk [vmem:[#allocation3 + $0x1c] sm:$0xf] %vm879_vm14, %v872_v8 }
 0x10e   : > { %v895_v9 = vpop.permute.xlu1 %894  ;;  %v893_v10 = vpop.permute.xlu0 %892 }
 0x10f   : > { %906 = vst.msk [vmem:[#allocation3 + $0x10] sm:$0xf] %vm904_vm15, %v895_v9  ;;  %905 = vst.msk [vmem:[#allocation3 + $0x4] sm:$0xf] %vm904_vm15, %v893_v10 }
 0x112   : > { %v899_v11 = vpop.permute.xlu1 %898  ;;  %v897_v12 = vpop.permute.xlu0 %896 }
 0x113   : > { %908 = vst.msk [vmem:[#allocation3 + $0x28] sm:$0xf] %vm904_vm15, %v899_v11  ;;  %907 = vst.msk [vmem:[#allocation3 + $0x1c] sm:$0xf] %vm904_vm15, %v897_v12 }
 0x116   : > { %v920_v13 = vpop.permute.xlu1 %919  ;;  %v918_v14 = vpop.permute.xlu0 %917 }
 0x117   : > { %931 = vst.msk [vmem:[#allocation3 + $0x10] sm:$0xf] %vm929_vm0, %v920_v13  ;;  %930 = vst.msk [vmem:[#allocation3 + $0x4] sm:$0xf] %vm929_vm0, %v918_v14 }
 0x11a   : > { %v924_v15 = vpop.permute.xlu1 %923  ;;  %v922_v16 = vpop.permute.xlu0 %921 }
 0x11b   : > { %933 = vst.msk [vmem:[#allocation3 + $0x28] sm:$0xf] %vm929_vm0, %v924_v15  ;;  %932 = vst.msk [vmem:[#allocation3 + $0x1c] sm:$0xf] %vm929_vm0, %v922_v16 }
 0x11e   : > { %v946_v17 = vpop.permute.xlu1 %945  ;;  %v944_v18 = vpop.permute.xlu0 %943 }
 0x11f   : > { %957 = vst.msk [vmem:[#allocation3 + $0x10] sm:$0xf] %vm955_vm1, %v946_v17  ;;  %956 = vst.msk [vmem:[#allocation3 + $0x4] sm:$0xf] %vm955_vm1, %v944_v18 }
 0x122   : > { %v950_v19 = vpop.permute.xlu1 %949  ;;  %v948_v20 = vpop.permute.xlu0 %947 }
 0x123   : > { %959 = vst.msk [vmem:[#allocation3 + $0x28] sm:$0xf] %vm955_vm1, %v950_v19  ;;  %958 = vst.msk [vmem:[#allocation3 + $0x1c] sm:$0xf] %vm955_vm1, %v948_v20 }
 0x126   : > { %v1021_v21 = vpop.permute.xlu1 %1020  ;;  %v1019_v22 = vpop.permute.xlu0 %1018 }
 0x127   : > { %v1027_v29 = vrot.slane %v1021_v21, 4  ;;  %v1026_v30 = vrot.slane %v1019_v22, 4 }
 0x129   : > { %v1032_v34 = vsel %vm1030_vm5, %v1027_v29, %v1021_v21  ;;  %v1031_v35 = vsel %vm1030_vm5, %v1026_v30, %v1019_v22 }
 0x12a   : > { %v1025_v23 = vpop.permute.xlu1 %1024  ;;  %v1023_v24 = vpop.permute.xlu0 %1022 }
 0x12b   : > { %v1029_v36 = vrot.slane %v1025_v23, 4  ;;  %v1028_v37 = vrot.slane %v1023_v24, 4 }
 0x12d   : > { %v1034_v40 = vsel %vm1030_vm5, %v1029_v36, %v1025_v23  ;;  %v1033_v41 = vsel %vm1030_vm5, %v1028_v37, %v1023_v24 }
 0x12e   : > { %v971_v25 = vpop.permute.xlu1 %970  ;;  %v969_v26 = vpop.permute.xlu0 %968 }
 0x12f   : > { %982 = vst.msk [vmem:[#allocation3 + $0x10] sm:$0xf] %vm980_vm2, %v971_v25  ;;  %981 = vst.msk [vmem:[#allocation3 + $0x4] sm:$0xf] %vm980_vm2, %v969_v26 }
 0x132   : > { %v975_v27 = vpop.permute.xlu1 %974  ;;  %v973_v28 = vpop.permute.xlu0 %972 }
 0x133   : > { %984 = vst.msk [vmem:[#allocation3 + $0x28] sm:$0xf] %vm980_vm2, %v975_v27  ;;  %983 = vst.msk [vmem:[#allocation3 + $0x1c] sm:$0xf] %vm980_vm2, %v973_v28 }
 0x136   : > { %v996_v32 = vpop.permute.xlu1 %995  ;;  %v994_v33 = vpop.permute.xlu0 %993 }
 0x137   : > { %1007 = vst.msk [vmem:[#allocation3 + $0x10] sm:$0xf] %vm1005_vm6, %v996_v32  ;;  %1006 = vst.msk [vmem:[#allocation3 + $0x4] sm:$0xf] %vm1005_vm6, %v994_v33 }
 0x138   : > { %1043 = vst.msk [vmem:[#allocation3 + $0x10] sm:$0xff] %vm5109_vm7, %v1032_v34  ;;  %1042 = vst.msk [vmem:[#allocation3 + $0x4] sm:$0xff] %vm5109_vm7, %v1031_v35 }
 0x13a   : > { %v1000_v38 = vpop.permute.xlu1 %999  ;;  %v998_v39 = vpop.permute.xlu0 %997 }
 0x13b   : > { %1009 = vst.msk [vmem:[#allocation3 + $0x28] sm:$0xf] %vm1005_vm6, %v1000_v38  ;;  %1008 = vst.msk [vmem:[#allocation3 + $0x1c] sm:$0xf] %vm1005_vm6, %v998_v39 }
 0x13c   : > { %1044 = vst.msk [vmem:[#allocation3 + $0x1c] sm:$0xff] %vm5109_vm7, %v1033_v41  ;;  %1045 = vst.msk [vmem:[#allocation3 + $0x28] sm:$0xff] %vm5109_vm7, %v1034_v40 }
 0x13e   : > { %v1057_v42 = vpop.permute.xlu1 %1056  ;;  %v1055_v43 = vpop.permute.xlu0 %1054 }
 0x13f   : > { %1068 = vst.msk [vmem:[#allocation3 + $0x14] sm:$0xf] %vm1066_vm8, %v1057_v42  ;;  %1067 = vst.msk [vmem:[#allocation3 + $0x8] sm:$0xf] %vm1066_vm8, %v1055_v43  ;;  %v4502_v48 = vld [vmem:[#allocation3 + $0x4] ss:$12 sps:$4 sm:$0xff]  }
 0x142   : > { %v1061_v44 = vpop.permute.xlu1 %1060  ;;  %v1059_v45 = vpop.permute.xlu0 %1058 }
 0x143   : > { %1070 = vst.msk [vmem:[#allocation3 + $0x2c] sm:$0xf] %vm1066_vm8, %v1061_v44  ;;  %1069 = vst.msk [vmem:[#allocation3 + $0x20] sm:$0xf] %vm1066_vm8, %v1059_v45  ;;  %v4505_v49 = vld [vmem:[#allocation3 + $0x1c] ss:$12 sps:$4 sm:$0xff]  }
 0x144   : > { %v1100_v51 = vpack.c.bf16 %v4505_v49, %v4502_v48 }
 0x146   : > { %1292 = vmatprep.mubr.bf16.mxu0 %v1100_v51  ;;  %v4508_v52 = vld [vmem:[#allocation3 + $0x8] ss:$12 sps:$4 sm:$0xff]  }
 0x147   : > { %1293 = vmatmul.mubr.bf16.vlgmr.msra.gmra.mrb[0].mxu0 %v1099_v50 }
 0x14a   : > { %v4509_v53 = vld [vmem:[#allocation3 + $0x20] ss:$12 sps:$4 sm:$0xff]  }
 0x14b   : > { %v1101_v54 = vpack.c.bf16 %v4509_v53, %v4508_v52 }
 0x14d   : > { %4382 = vmatmul.mubr.msk.bf16.vlgmr.msra.gmra.mrb[0].mxu1 %vm1249_vm9, %v1101_v54 }
 0x21a   : > { %v4362_v55 = vpop.f32.mrb[0].mxu0 }
 0x21b   : > { %v4363_v56 = vpop.f32.mrb[1].mxu0 }
 0x21c   : > { %v4364_v58 = vadd.f32 %v4363_v56, %v4362_v55  ;;  %v4365_v59 = vpop.f32.mrb[2].mxu0 }
 0x21d   : > { %v4366_v60 = vpop.f32.mrb[3].mxu0 }
 0x21e   : > { %v4367_v61 = vadd.f32 %v4366_v60, %v4365_v59  ;;  %v1295_v62 = vadd.f32 %v4364_v58, %v4240_v57 }
 0x220   : > { %v1335_v63 = vpop.f32.mrb[0].mxu1  ;;  %v1298_v2 = vadd.f32 %v4367_v61, %v4240_v57 }
 0x221   : > { %v1336_v0 = vadd.f32 %v1335_v63, %v1295_v62  ;;  %v4383_v1 = vpop.f32.mrb[1].mxu1 }
 0x222   : > { %v1338_v3 = vpop.f32.mrb[2].mxu1 }
 0x223   : > { %1343 = vst.msk [vmem:[#allocation2] sm:$0xff] %vm1342_vm10, %v1336_v0  ;;  %v1339_v4 = vadd.f32 %v1338_v3, %v1298_v2  ;;  %v4384_v5 = vpop.f32.mrb[3].mxu1 }
 0x225   : > { %1344 = vst.msk [vmem:[#allocation2 + $0x8] sm:$0xff] %vm1342_vm10, %v1339_v4 }
 0x226 PF: > { %v4510_v6 = vld [vmem:[%s6204_s2] sm:$0xff]   ;;  %v4680_v7 = vmov 0   ;;  %v4511_v8 = vld [vmem:[%s6204_s2 + $0x8] sm:$0xff]   ;;  %v4512_v9 = vld [vmem:[%s6204_s2 + $0x10] sm:$0xff]   ;;  %vm6227_vm11 = vcmask 1043456   ;;  %vm1465_vm12 = vcmask 588800  }
 0x227   : > { %1473 = vmatprep.subr.bf16.mxu0 %v4680_v7  ;;  %2324 = vmatprep.subr.bf16.mxu1 %v4680_v7  ;;  %v4513_v10 = vld [vmem:[%s6204_s2 + $0x18] sm:$0xff]   ;;  %v4514_v11 = vld [vmem:[%s6204_s2 + $0x20] sm:$0xff]   ;;  %s6219_s23 = smov 8   ;;  %v4515_v17 = vld [vmem:[%s6204_s2 + $0x28] sm:$0xff]   ;;  %s4682_s21 = smov 104   ;;  %vm1602_vm13 = vcmask 60416  }
 0x228   : > { %1474 = vmatpush1.bf16.msra.mxu0 %v4510_v6  ;;  %v4522_v12 = vld [vmem:[%s6204_s2 + $0x60] ss:$0 sps:$4 sm:$0xff]   ;;  %v4523_v13 = vld [vmem:[#allocation4 + $0x4] ss:$8 sps:$4 sm:$0xff]   ;;  %v4525_v14 = vld [vmem:[#allocation4 + $0x14] ss:$8 sps:$4 sm:$0xff]  }
 0x229   : > { %1475 = vmatprep.subr.bf16.mxu0 %v4680_v7  ;;  %v1530_v15 = vld [vmem:[#allocation5] sm:$0xff]  ;;  %v1471_v16 = vsel %vm6227_vm11, %v4522_v12, 0  ;;  %v1362_v18 = vpack.c.bf16 %v4525_v14, %v4523_v13  ;;  %v4516_v19 = vld [vmem:[%s6204_s2 + $0x30] sm:$0xff]   ;;  %v4517_v20 = vld [vmem:[%s6204_s2 + $0x38] sm:$0xff]   ;;  %s6215_s22 = smov 16   ;;  %s6217_s24 = smov 24  }
 0x22a   : > { %1534 = vrot.lane.b32.xlu1 %v1530_v15, %s6219_s23  ;;  %v4518_v21 = vld [vmem:[%s6204_s2 + $0x40] sm:$0xff]   ;;  %v4519_v22 = vld [vmem:[%s6204_s2 + $0x48] sm:$0xff]   ;;  %v4520_v23 = vld [vmem:[%s6204_s2 + $0x50] sm:$0xff]   ;;  %s4685_s25 = smov 32   ;;  %s4686_s27 = smov 40   ;;  %vm1635_vm14 = vcmask 126016  }
 0x22b   : > { %4273 = vmatprep.mubr.msk.bf16.mxu0 %vm1465_vm12, %v1362_v18  ;;  %v4521_v24 = vld [vmem:[%s6204_s2 + $0x58] sm:$0xff]   ;;  %v4527_v25 = vld [vmem:[#allocation4] ss:$8 sps:$4 sm:$0xff]   ;;  %v1615_v39 = vld [vmem:[#allocation6 + $0x1] sm:$0xf]  ;;  %s4687_s28 = smov 48  }
 0x22c   : > { %1476 = vmatpush1.bf16.msra.mxu0 %v4511_v8  ;;  %v4528_v26 = vld [vmem:[#allocation4 + $0x10] ss:$8 sps:$4 sm:$0xff]   ;;  %v1363_v28 = vld [vmem:[#allocation2] sm:$0xff]  ;;  %v1364_v30 = vld [vmem:[#allocation2 + $0x8] sm:$0xff]  ;;  %s4688_s29 = smov 56   ;;  %s6221_s30 = smov 64  }
 0x22d   : > { %1477 = vmatprep.subr.bf16.mxu0 %v4680_v7  ;;  %v1361_v27 = vpack.c.bf16 %v4528_v26, %v4527_v25  ;;  %v1531_v38 = vld [vmem:[#allocation5 + $0x8] sm:$0xff]  ;;  %v1640_v40 = vld [vmem:[#allocation6 + $0x2] sm:$0xf]  ;;  %v1716_v43 = vld [vmem:[#allocation6 + $0x8] sm:$0xf]  ;;  %s4690_s11 = smov 72  }
 0x22e   : > { %v1665_v41 = vld [vmem:[#allocation6 + $0x3] sm:$0xf]  ;;  %v1741_v44 = vld [vmem:[#allocation6 + $0x9] sm:$0xf]  ;;  %v2075_v54 = vld [vmem:[#allocation6 + $0x30] sm:$0xf] }
 0x22f   : > { %v1690_v42 = vld [vmem:[#allocation6 + $0x4] sm:$0xf]  ;;  %v1766_v45 = vld [vmem:[#allocation6 + $0xa] sm:$0xf]  ;;  %v2099_v55 = vld [vmem:[#allocation6 + $0x31] sm:$0xf] }
 0x230   : > { %1478 = vmatpush1.bf16.msra.mxu0 %v4512_v9  ;;  %v1791_v46 = vld [vmem:[#allocation6 + $0xb] sm:$0xf]  ;;  %v2123_v56 = vld [vmem:[#allocation6 + $0x32] sm:$0xf]  ;;  %v1607_v63 = vld [vmem:[#allocation6] sm:$0xf] }
 0x231   : > { %1479 = vmatprep.subr.bf16.mxu0 %v4680_v7  ;;  %v1816_v47 = vld [vmem:[#allocation6 + $0xc] sm:$0xf]  ;;  %1611 = vst.msk [vmem:[#allocation4] sm:$0xf] %vm1602_vm13, %v1607_v63  ;;  %v1608_v2 = vld [vmem:[#allocation6 + $0x8] sm:$0xf] }
 0x232   : > { %v1616_v1 = vld [vmem:[#allocation6 + $0x9] sm:$0xf]  ;;  %1612 = vst.msk [vmem:[#allocation4 + $0x8] sm:$0xf] %vm1602_vm13, %v1608_v2  ;;  %v1995_v3 = vld [vmem:[#allocation6 + $0x31] sm:$0xf] }
 0x233   : > { %1999 = vst.msk [vmem:[#allocation4 + $0x1c] sm:$0xf] %vm1602_vm13, %v1995_v3  ;;  %v1641_v4 = vld [vmem:[#allocation6 + $0xa] sm:$0xf]  ;;  %vm1660_vm15 = vcmask 191616   ;;  %vm1685_vm0 = vcmask 257216  }
 0x234   : > { %1480 = vmatpush1.bf16.msra.mxu0 %v4513_v10  ;;  %v1666_v6 = vld [vmem:[#allocation6 + $0xb] sm:$0xf]  ;;  %vm1710_vm1 = vcmask 322816   ;;  %vm1736_vm2 = vcmask 388416   ;;  %v2027_v13 = vld [vmem:[#allocation6 + $0x33] sm:$0xf] }
 0x235   : > { %1481 = vmatprep.subr.bf16.mxu0 %v4680_v7  ;;  %v1691_v9 = vld [vmem:[#allocation6 + $0xc] sm:$0xf]  ;;  %vm1761_vm3 = vcmask 454016   ;;  %v2051_v15 = vld [vmem:[#allocation6 + $0x34] sm:$0xf]  ;;  %vm1786_vm4 = vcmask 519616  }
 0x236   : > { %vm1811_vm5 = vcmask 585216   ;;  %vm1836_vm6 = vcmask 650816   ;;  %s6213_s12 = smov 120   ;;  %s4692_s13 = smov 112   ;;  %vm1861_vm7 = vcmask 716416   ;;  %vm1886_vm8 = vcmask 782016  }
 0x237   : > { %s6223_s14 = smov 80   ;;  %s4694_s20 = smov 88   ;;  %vm1911_vm9 = vcmask 847616   ;;  %vm1936_vm10 = vcmask 913216  }
 0x238   : > { %1482 = vmatpush1.bf16.msra.mxu0 %v4514_v11  ;;  %v2003_v11 = vld [vmem:[#allocation6 + $0x32] sm:$0xf] }
 0x239   : > { %1483 = vmatprep.subr.bf16.mxu0 %v4680_v7 }
 0x23c   : > { %1484 = vmatpush1.bf16.msra.mxu0 %v4515_v17  ;;  %v2076_v17 = vld [vmem:[#allocation6 + $0x38] sm:$0xf] }
 0x23d   : > { %1485 = vmatprep.subr.bf16.mxu0 %v4680_v7 }
 0x240   : > { %1486 = vmatpush1.bf16.msra.mxu0 %v4516_v19  ;;  %v2100_v19 = vld [vmem:[#allocation6 + $0x39] sm:$0xf] }
 0x241   : > { %1487 = vmatprep.subr.bf16.mxu0 %v4680_v7 }
 0x244   : > { %1488 = vmatpush1.bf16.msra.mxu0 %v4517_v20 }
 0x245   : > { %1489 = vmatprep.subr.bf16.mxu0 %v4680_v7 }
 0x248   : > { %1490 = vmatpush1.bf16.msra.mxu0 %v4518_v21  ;;  %v2124_v21 = vld [vmem:[#allocation6 + $0x3a] sm:$0xf] }
 0x249   : > { %1491 = vmatprep.subr.bf16.mxu0 %v4680_v7 }
 0x24c   : > { %1492 = vmatpush1.bf16.msra.mxu0 %v4519_v22 }
 0x24d   : > { %1493 = vmatprep.subr.bf16.mxu0 %v4680_v7 }
 0x250   : > { %1494 = vmatpush1.bf16.msra.mxu0 %v4520_v23  ;;  %v2148_v23 = vld [vmem:[#allocation6 + $0x3b] sm:$0xf] }
 0x251   : > { %1495 = vmatprep.subr.bf16.mxu0 %v4680_v7 }
 0x254   : > { %1496 = vmatpush1.bf16.msra.mxu0 %v4521_v24  ;;  %v1970_v24 = vld [vmem:[#allocation6 + $0x30] sm:$0xf] }
 0x255   : > { %1497 = vmatprep.subr.bf16.mxu0 %v4680_v7 }
 0x258   : > { %1498 = vmatpush1.bf16.msra.mxu0 %v1471_v16 }
 0x25b   : > { %1506 = vmatmul.mubr.bf16.vlgmr.msra.gmra.mrb[0].mxu0 %v1361_v27 }
 0x29c   : > { %v1535_v25 = vpop.permute.xlu1 %1534 }
 0x32e   : > { %v1507_v29 = vpop.f32.mrb[0].mxu0 }
 0x32f   : > { %v1514_v31 = vadd.f32 %v1507_v29, %v1363_v28  ;;  %v1509_v32 = vpop.f32.mrb[1].mxu0 }
 0x330   : > { %v1510_v33 = vpop.f32.mrb[2].mxu0 }
 0x331   : > { %4597 = vtanh.f32 %v1514_v31  ;;  %v1515_v34 = vadd.f32 %v1510_v33, %v1364_v30  ;;  %v1512_v35 = vpop.f32.mrb[3].mxu0  ;;  %v4274_v48 = vmul.f32 -1.442695, %v1514_v31 }
 0x332   : > { %v2147_v35 = vld [vmem:[#allocation6 + $0x33] sm:$0xf] }
 0x333   : > { %4599 = vtanh.f32 %v1515_v34  ;;  %v4275_v49 = vmul.f32 -1.442695, %v1515_v34 }
 0x334   : > { %4601 = vpow2.f32 %v4274_v48 }
 0x335   : > { %4603 = vpow2.f32 %v4275_v49 }
 0x33b   : > { %v4598_v36 = vpop.eup %4597 }
 0x33c   : > { %1544 = vrot.lane.b32.xlu0 %v4598_v36, %s4682_s21 }
 0x33d   : > { %v4600_v37 = vpop.eup %4599 }
 0x33e   : > { %v4602_v50 = vpop.eup %4601 }
 0x33f   : > { %v1522_v51 = vadd.f32 1.0, %v4602_v50  ;;  %v4604_v52 = vpop.eup %4603 }
 0x340   : > { %1546 = vrot.lane.b32.xlu0 %v4600_v37, %s4682_s21  ;;  %v1523_v53 = vadd.f32 1.0, %v4604_v52 }
 0x341   : > { %4605 = vrcp.f32 %v1522_v51 }
 0x342   : > { %4607 = vrcp.f32 %v1523_v53 }
 0x344   : > { %1536 = vrot.lane.b32.xlu0 %v1531_v38, %s6219_s23 }
 0x348   : > { %1623 = vrot.lane.b32.xlu0 %v1615_v39, %s6219_s23 }
 0x34b   : > { %v5202_v57 = vpop.eup %4605 }
 0x34c   : > { %1648 = vrot.lane.b32.xlu0 %v1640_v40, %s6215_s22  ;;  %v5207_v60 = vpop.eup %4607  ;;  %v1540_v26 = vmul.f32 %v5202_v57, %v1535_v25 }
 0x350   : > { %1673 = vrot.lane.b32.xlu0 %v1665_v41, %s6217_s24 }
 0x354   : > { %1698 = vrot.lane.b32.xlu0 %v1690_v42, %s4685_s25 }
 0x358   : > { %1724 = vrot.lane.b32.xlu0 %v1716_v43, %s4686_s27 }
 0x35c   : > { %1749 = vrot.lane.b32.xlu0 %v1741_v44, %s4687_s28 }
 0x360   : > { %1774 = vrot.lane.b32.xlu0 %v1766_v45, %s4688_s29 }
 0x364   : > { %1799 = vrot.lane.b32.xlu0 %v1791_v46, %s6221_s30 }
 0x368   : > { %1824 = vrot.lane.b32.xlu0 %v1816_v47, %s4690_s11 }
 0x36c   : > { %2085 = vrot.lane.b32.xlu0 %v2075_v54, %s4685_s25 }
 0x370   : > { %2109 = vrot.lane.b32.xlu0 %v2099_v55, %s4686_s27 }
 0x374   : > { %2133 = vrot.lane.b32.xlu0 %v2123_v56, %s4687_s28 }
 0x3ae   : > { %v1545_v58 = vpop.permute.xlu0 %1544 }
 0x3af   : > { %v1550_v59 = vmul.f32 %v5202_v57, %v1545_v58 }
 0x3b1   : > { %1554 = vrot.lane.b32.xlu1 %v1550_v59, %s6219_s23 }
 0x3b2   : > { %v1547_v61 = vpop.permute.xlu0 %1546 }
 0x3b3   : > { %v1551_v62 = vmul.f32 %v5207_v60, %v1547_v61 }
 0x3b5   : > { %1556 = vrot.lane.b32.xlu1 %v1551_v62, %s6219_s23 }
 0x3b6   : > { %v1537_v0 = vpop.permute.xlu0 %1536 }
 0x3b7   : > { %v1541_v29 = vmul.f32 %v5207_v60, %v1537_v0 }
 0x3b9   : > { %1625 = vrot.lane.b32.xlu1 %v1616_v1, %s6219_s23 }
 0x3ba   : > { %v1624_v5 = vpop.permute.xlu0 %1623 }
 0x3bb   : > { %1636 = vst.msk [vmem:[#allocation4] sm:$0xf] %vm1635_vm14, %v1624_v5 }
 0x3bd   : > { %1650 = vrot.lane.b32.xlu1 %v1641_v4, %s6215_s22 }
 0x3be   : > { %v1649_v8 = vpop.permute.xlu0 %1648 }
 0x3bf   : > { %1661 = vst.msk [vmem:[#allocation4] sm:$0xf] %vm1660_vm15, %v1649_v8 }
 0x3c1   : > { %1675 = vrot.lane.b32.xlu1 %v1666_v6, %s6217_s24 }
 0x3c2   : > { %v1674_v10 = vpop.permute.xlu0 %1673 }
 0x3c3   : > { %1686 = vst.msk [vmem:[#allocation4] sm:$0xf] %vm1685_vm0, %v1674_v10 }
 0x3c5   : > { %1700 = vrot.lane.b32.xlu1 %v1691_v9, %s4685_s25 }
 0x3c6   : > { %v1699_v12 = vpop.permute.xlu0 %1698 }
 0x3c7   : > { %1711 = vst.msk [vmem:[#allocation4] sm:$0xf] %vm1710_vm1, %v1699_v12 }
 0x3c9   : > { %2014 = vrot.lane.b32.xlu1 %v2003_v11, %s6219_s23 }
 0x3ca   : > { %v1725_v14 = vpop.permute.xlu0 %1724 }
 0x3cb   : > { %1737 = vst.msk [vmem:[#allocation4] sm:$0xf] %vm1736_vm2, %v1725_v14 }
 0x3cd   : > { %2038 = vrot.lane.b32.xlu1 %v2027_v13, %s6215_s22 }
 0x3ce   : > { %v1750_v16 = vpop.permute.xlu0 %1749 }
 0x3cf   : > { %1762 = vst.msk [vmem:[#allocation4] sm:$0xf] %vm1761_vm3, %v1750_v16 }
 0x3d1   : > { %2062 = vrot.lane.b32.xlu1 %v2051_v15, %s6217_s24 }
 0x3d2   : > { %v1775_v18 = vpop.permute.xlu0 %1774 }
 0x3d3   : > { %1787 = vst.msk [vmem:[#allocation4] sm:$0xf] %vm1786_vm4, %v1775_v18 }
 0x3d5   : > { %2087 = vrot.lane.b32.xlu1 %v2076_v17, %s4685_s25 }
 0x3d6   : > { %v1800_v20 = vpop.permute.xlu0 %1799 }
 0x3d7   : > { %1812 = vst.msk [vmem:[#allocation4] sm:$0xf] %vm1811_vm5, %v1800_v20 }
 0x3d9   : > { %2111 = vrot.lane.b32.xlu1 %v2100_v19, %s4686_s27 }
 0x3da   : > { %v1825_v22 = vpop.permute.xlu0 %1824 }
 0x3db   : > { %1837 = vst.msk [vmem:[#allocation4] sm:$0xf] %vm1836_vm6, %v1825_v22 }
 0x3dd   : > { %2135 = vrot.lane.b32.xlu1 %v2124_v21, %s4687_s28 }
 0x3de   : > { %v5257_v46 = vpop.permute.xlu0 %2085 }
 0x3e1   : > { %2159 = vrot.lane.b32.xlu1 %v2148_v23, %s4688_s29 }
 0x3e2   : > { %v5259_v47 = vpop.permute.xlu0 %2109 }
 0x3e5   : > { %1981 = vrot.lane.b32.xlu1 %v1970_v24, %s6213_s12  ;;  %s6225_s12 = smov 96  }
 0x3e6   : > { %v5261_v48 = vpop.permute.xlu0 %2133 }
 0x423   : > { %v1555_v27 = vpop.permute.xlu1 %1554 }
 0x424   : > { %v5236_v28 = vadd.f32 %v1555_v27, %v1540_v26 }
 0x426   : > { %4609 = vtanh.f32 %v5236_v28 }
 0x427   : > { %v1557_v30 = vpop.permute.xlu1 %1556 }
 0x428   : > { %v5240_v31 = vadd.f32 %v1557_v30, %v1541_v29 }
 0x42a   : > { %4611 = vtanh.f32 %v5240_v31 }
 0x42b   : > { %v1626_v32 = vpop.permute.xlu1 %1625 }
 0x42c   : > { %1637 = vst.msk [vmem:[#allocation4 + $0x8] sm:$0xf] %vm1635_vm14, %v1626_v32 }
 0x42f   : > { %v1651_v33 = vpop.permute.xlu1 %1650 }
 0x430   : > { %v4610_v34 = vpop.eup %4609  ;;  %1662 = vst.msk [vmem:[#allocation4 + $0x8] sm:$0xf] %vm1660_vm15, %v1651_v33 }
 0x431   : > { %1566 = vrot.lane.b32.xlu0 %v4610_v34, %s6219_s23 }
 0x433   : > { %v1676_v36 = vpop.permute.xlu1 %1675 }
 0x434   : > { %v4612_v37 = vpop.eup %4611  ;;  %1687 = vst.msk [vmem:[#allocation4 + $0x8] sm:$0xf] %vm1685_vm0, %v1676_v36 }
 0x435   : > { %1568 = vrot.lane.b32.xlu1 %v4612_v37, %s6219_s23  ;;  %2157 = vrot.lane.b32.xlu0 %v2147_v35, %s4688_s29 }
 0x437   : > { %v1701_v38 = vpop.permute.xlu1 %1700 }
 0x438   : > { %1712 = vst.msk [vmem:[#allocation4 + $0x8] sm:$0xf] %vm1710_vm1, %v1701_v38 }
 0x43b   : > { %v2015_v39 = vpop.permute.xlu1 %2014 }
 0x43c   : > { %2023 = vst.msk [vmem:[#allocation4 + $0x1c] sm:$0xf] %vm1635_vm14, %v2015_v39 }
 0x43f   : > { %v2039_v40 = vpop.permute.xlu1 %2038 }
 0x440   : > { %2047 = vst.msk [vmem:[#allocation4 + $0x1c] sm:$0xf] %vm1660_vm15, %v2039_v40 }
 0x443   : > { %v2063_v41 = vpop.permute.xlu1 %2062 }
 0x444   : > { %2071 = vst.msk [vmem:[#allocation4 + $0x1c] sm:$0xf] %vm1685_vm0, %v2063_v41 }
 0x447   : > { %v2088_v42 = vpop.permute.xlu1 %2087 }
 0x448   : > { %2096 = vst.msk [vmem:[#allocation4 + $0x1c] sm:$0xf] %vm1710_vm1, %v2088_v42 }
 0x44b   : > { %v2112_v43 = vpop.permute.xlu1 %2111 }
 0x44c   : > { %2120 = vst.msk [vmem:[#allocation4 + $0x1c] sm:$0xf] %vm1736_vm2, %v2112_v43 }
 0x44f   : > { %v2136_v44 = vpop.permute.xlu1 %2135 }
 0x450   : > { %2144 = vst.msk [vmem:[#allocation4 + $0x1c] sm:$0xf] %vm1761_vm3, %v2136_v44 }
 0x453   : > { %v2160_v45 = vpop.permute.xlu1 %2159 }
 0x454   : > { %2168 = vst.msk [vmem:[#allocation4 + $0x1c] sm:$0xf] %vm1786_vm4, %v2160_v45 }
 0x457   : > { %v5263_v49 = vpop.permute.xlu1 %1981 }
 0x4a3   : > { %v1567_v50 = vpop.permute.xlu0 %1566 }
 0x4a4   : > { %v1572_v51 = vmul.f32 %v5202_v57, %v1567_v50 }
 0x4a6   : > { %v1587_v52 = vcombine.high %v1572_v51, %v1572_v51  ;;  %1589 = vrot.lane.b32.xlu0 %v1572_v51, %s4692_s13  ;;  %v4529_v51 = vld [vmem:[%s6206_s4] sm:$0xff]  }
 0x4a7   : > { %v1569_v53 = vpop.permute.xlu1 %1568  ;;  %v5271_v56 = vpop.permute.xlu0 %2157  ;;  %2325 = vmatpush1.bf16.msra.mxu1 %v4529_v51 }
 0x4a8   : > { %v1573_v54 = vmul.f32 %v5207_v60, %v1569_v53  ;;  %1591 = vrot.lane.b32.xlu1 %v1587_v52, %s4692_s13  ;;  %2326 = vmatprep.subr.bf16.mxu1 %v4680_v7 }
 0x4aa   : > { %v1588_v55 = vcombine.high %v1573_v54, %v1573_v54  ;;  %1593 = vrot.lane.b32.xlu0 %v1573_v54, %s4692_s13  ;;  %v4530_v54 = vld [vmem:[%s6206_s4 + $0x8] sm:$0xff]  }
 0x4ab   : > { %2327 = vmatpush1.bf16.msra.mxu1 %v4530_v54 }
 0x4ac   : > { %1595 = vrot.lane.b32.xlu1 %v1588_v55, %s4692_s13  ;;  %2328 = vmatprep.subr.bf16.mxu1 %v4680_v7 }
 0x518   : > { %v1590_v58 = vpop.permute.xlu0 %1589 }
 0x519   : > { %1603 = vst.msk [vmem:[#allocation6 + $0x12] sm:$0xf] %vm1602_vm13, %v1590_v58 }
 0x51a   : > { %v1592_v57 = vpop.permute.xlu1 %1591 }
 0x51b   : > { %1604 = vst.msk [vmem:[#allocation6 + $0x1a] sm:$0xf] %vm1602_vm13, %v1592_v57  ;;  %v4531_v57 = vld [vmem:[%s6206_s4 + $0x10] sm:$0xff]  }
 0x51c   : > { %v1594_v59 = vpop.permute.xlu0 %1593  ;;  %2329 = vmatpush1.bf16.msra.mxu1 %v4531_v57 }
 0x51d   : > { %1605 = vst.msk [vmem:[#allocation6 + $0x22] sm:$0xf] %vm1602_vm13, %v1594_v59  ;;  %2330 = vmatprep.subr.bf16.mxu1 %v4680_v7 }
 0x51e   : > { %v1596_v61 = vpop.permute.xlu1 %1595 }
 0x51f   : > { %1606 = vst.msk [vmem:[#allocation6 + $0x2a] sm:$0xf] %vm1602_vm13, %v1596_v61 }
 0x520   : > { %v1617_v60 = vld [vmem:[#allocation6 + $0x11] sm:$0xf] }
 0x521   : > { %v1717_v62 = vld [vmem:[#allocation6 + $0x10] sm:$0xf]  ;;  %1627 = vrot.lane.b32.xlu0 %v1617_v60, %s6219_s23  ;;  %v1692_v3 = vld [vmem:[#allocation6 + $0x14] sm:$0xf]  ;;  %v4532_v60 = vld [vmem:[%s6206_s4 + $0x18] sm:$0xff]  }
 0x522   : > { %1726 = vrot.lane.b32.xlu1 %v1717_v62, %s4686_s27  ;;  %v1642_v63 = vld [vmem:[#allocation6 + $0x12] sm:$0xf]  ;;  %v1618_v10 = vld [vmem:[#allocation6 + $0x19] sm:$0xf]  ;;  %2331 = vmatpush1.bf16.msra.mxu1 %v4532_v60 }
 0x523   : > { %v1742_v0 = vld [vmem:[#allocation6 + $0x11] sm:$0xf]  ;;  %v1643_v12 = vld [vmem:[#allocation6 + $0x1a] sm:$0xf]  ;;  %2332 = vmatprep.subr.bf16.mxu1 %v4680_v7 }
 0x524   : > { %v1667_v1 = vld [vmem:[#allocation6 + $0x13] sm:$0xf]  ;;  %v1610_v13 = vld [vmem:[#allocation6 + $0x18] sm:$0xf]  ;;  %v1993_v15 = vld [vmem:[#allocation6 + $0x21] sm:$0xf] }
 0x525   : > { %1652 = vrot.lane.b32.xlu0 %v1642_v63, %s6215_s22  ;;  %v1767_v2 = vld [vmem:[#allocation6 + $0x12] sm:$0xf]  ;;  %1614 = vst.msk [vmem:[#allocation4 + $0x18] sm:$0xf] %vm1602_vm13, %v1610_v13  ;;  %v1992_v14 = vld [vmem:[#allocation6 + $0x19] sm:$0xf] }
 0x526   : > { %1751 = vrot.lane.b32.xlu1 %v1742_v0, %s4687_s28  ;;  %v1792_v4 = vld [vmem:[#allocation6 + $0x13] sm:$0xf]  ;;  %v1994_v16 = vld [vmem:[#allocation6 + $0x29] sm:$0xf]  ;;  %1996 = vst.msk [vmem:[#allocation4 + $0x4] sm:$0xf] %vm1602_vm13, %v1992_v14 }
 0x527   : > { %v1841_v5 = vld [vmem:[#allocation6 + $0x10] sm:$0xf]  ;;  %v1817_v6 = vld [vmem:[#allocation6 + $0x14] sm:$0xf]  ;;  %1997 = vst.msk [vmem:[#allocation4 + $0xc] sm:$0xf] %vm1602_vm13, %v1993_v15 }
 0x528   : > { %v1609_v8 = vld [vmem:[#allocation6 + $0x10] sm:$0xf]  ;;  %1998 = vst.msk [vmem:[#allocation4 + $0x14] sm:$0xf] %vm1602_vm13, %v1994_v16  ;;  %v1668_v18 = vld [vmem:[#allocation6 + $0x1b] sm:$0xf] }
 0x529   : > { %1677 = vrot.lane.b32.xlu0 %v1667_v1, %s6217_s24  ;;  %v1866_v9 = vld [vmem:[#allocation6 + $0x11] sm:$0xf]  ;;  %1613 = vst.msk [vmem:[#allocation4 + $0x10] sm:$0xf] %vm1602_vm13, %v1609_v8  ;;  %v1693_v20 = vld [vmem:[#allocation6 + $0x1c] sm:$0xf] }
 0x52a   : > { %1776 = vrot.lane.b32.xlu1 %v1767_v2, %s4688_s29  ;;  %v1891_v11 = vld [vmem:[#allocation6 + $0x12] sm:$0xf]  ;;  %v1718_v21 = vld [vmem:[#allocation6 + $0x18] sm:$0xf]  ;;  %v1719_v22 = vld [vmem:[#allocation6 + $0x20] sm:$0xf] }
 0x52b   : > { %v1916_v17 = vld [vmem:[#allocation6 + $0x13] sm:$0xf]  ;;  %v1743_v23 = vld [vmem:[#allocation6 + $0x19] sm:$0xf]  ;;  %v1744_v24 = vld [vmem:[#allocation6 + $0x21] sm:$0xf] }
 0x52c   : > { %v1941_v19 = vld [vmem:[#allocation6 + $0x14] sm:$0xf]  ;;  %v1768_v25 = vld [vmem:[#allocation6 + $0x1a] sm:$0xf]  ;;  %v1769_v26 = vld [vmem:[#allocation6 + $0x22] sm:$0xf] }
 0x52d   : > { %1702 = vrot.lane.b32.xlu0 %v1692_v3, %s4685_s25  ;;  %v1793_v27 = vld [vmem:[#allocation6 + $0x1b] sm:$0xf]  ;;  %v1794_v29 = vld [vmem:[#allocation6 + $0x23] sm:$0xf]  ;;  %v1844_v61 = vld [vmem:[#allocation6 + $0x28] sm:$0xf] }
 0x52e   : > { %1801 = vrot.lane.b32.xlu1 %v1792_v4, %s6221_s30  ;;  %v2000_v30 = vld [vmem:[#allocation6 + $0x1a] sm:$0xf]  ;;  %v2001_v32 = vld [vmem:[#allocation6 + $0x22] sm:$0xf]  ;;  %v1869_v63 = vld [vmem:[#allocation6 + $0x29] sm:$0xf] }
 0x52f   : > { %v1818_v33 = vld [vmem:[#allocation6 + $0x1c] sm:$0xf]  ;;  %v1819_v34 = vld [vmem:[#allocation6 + $0x24] sm:$0xf]  ;;  %v1843_v37 = vld [vmem:[#allocation6 + $0x20] sm:$0xf] }
 0x530   : > { %v2024_v35 = vld [vmem:[#allocation6 + $0x1b] sm:$0xf]  ;;  %v2025_v36 = vld [vmem:[#allocation6 + $0x23] sm:$0xf]  ;;  %v4533_v0 = vld [vmem:[%s6206_s4 + $0x20] sm:$0xff]  }
 0x531   : > { %1849 = vrot.lane.b32.xlu0 %v1841_v5, %s6223_s14  ;;  %v1842_v38 = vld [vmem:[#allocation6 + $0x18] sm:$0xf]  ;;  %v2048_v39 = vld [vmem:[#allocation6 + $0x1c] sm:$0xf]  ;;  %v2049_v40 = vld [vmem:[#allocation6 + $0x24] sm:$0xf]  ;;  %2333 = vmatpush1.bf16.msra.mxu1 %v4533_v0 }
 0x532   : > { %1826 = vrot.lane.b32.xlu1 %v1817_v6, %s4690_s11  ;;  %v1868_v41 = vld [vmem:[#allocation6 + $0x21] sm:$0xf]  ;;  %v1867_v42 = vld [vmem:[#allocation6 + $0x19] sm:$0xf]  ;;  %2334 = vmatprep.subr.bf16.mxu1 %v4680_v7  ;;  %v2074_v2 = vld [vmem:[#allocation6 + $0x28] sm:$0xf] }
 0x533   : > { %v2073_v43 = vld [vmem:[#allocation6 + $0x20] sm:$0xf]  ;;  %v1892_v44 = vld [vmem:[#allocation6 + $0x1a] sm:$0xf]  ;;  %v1943_v62 = vld [vmem:[#allocation6 + $0x24] sm:$0xf] }
 0x534   : > { %v1893_v45 = vld [vmem:[#allocation6 + $0x22] sm:$0xf]  ;;  %v1917_v50 = vld [vmem:[#allocation6 + $0x1b] sm:$0xf]  ;;  %v1894_v5 = vld [vmem:[#allocation6 + $0x2a] sm:$0xf] }
 0x535   : > { %1874 = vrot.lane.b32.xlu0 %v1866_v9, %s4694_s20  ;;  %v2097_v52 = vld [vmem:[#allocation6 + $0x21] sm:$0xf]  ;;  %v1942_v53 = vld [vmem:[#allocation6 + $0x1c] sm:$0xf]  ;;  %v1967_v4 = vld [vmem:[#allocation6 + $0x18] sm:$0xf] }
 0x536   : > { %1629 = vrot.lane.b32.xlu1 %v1618_v10, %s6219_s23  ;;  %v1918_v55 = vld [vmem:[#allocation6 + $0x23] sm:$0xf]  ;;  %v4534_v3 = vld [vmem:[%s6206_s4 + $0x28] sm:$0xff]   ;;  %v2098_v9 = vld [vmem:[#allocation6 + $0x29] sm:$0xf] }
 0x537   : > { %v1968_v58 = vld [vmem:[#allocation6 + $0x20] sm:$0xf]  ;;  %2335 = vmatpush1.bf16.msra.mxu1 %v4534_v3  ;;  %v2169_v8 = vld [vmem:[#allocation6 + $0x24] sm:$0xf]  ;;  %v2002_v10 = vld [vmem:[#allocation6 + $0x2a] sm:$0xf] }
 0x538   : > { %v2121_v59 = vld [vmem:[#allocation6 + $0x22] sm:$0xf]  ;;  %2336 = vmatprep.subr.bf16.mxu1 %v4680_v7  ;;  %v4537_v13 = vld [vmem:[%s6206_s4 + $0x40] sm:$0xff]   ;;  %v2026_v16 = vld [vmem:[#allocation6 + $0x2b] sm:$0xf] }
 0x539   : > { %1899 = vrot.lane.b32.xlu0 %v1891_v11, %s6225_s12  ;;  %v2145_v1 = vld [vmem:[#allocation6 + $0x23] sm:$0xf]  ;;  %v1919_v11 = vld [vmem:[#allocation6 + $0x2b] sm:$0xf] }
 0x53a   : > { %1654 = vrot.lane.b32.xlu1 %v1643_v12, %s6215_s22  ;;  %v4535_v6 = vld [vmem:[%s6206_s4 + $0x30] sm:$0xff]   ;;  %v4536_v12 = vld [vmem:[%s6206_s4 + $0x38] sm:$0xff]  }
 0x53b   : > { %2337 = vmatpush1.bf16.msra.mxu1 %v4535_v6 }
 0x53c   : > { %2338 = vmatprep.subr.bf16.mxu1 %v4680_v7 }
 0x53d   : > { %1924 = vrot.lane.b32.xlu0 %v1916_v17, %s4682_s21  ;;  %v2122_v17 = vld [vmem:[#allocation6 + $0x2a] sm:$0xf] }
 0x53e   : > { %1679 = vrot.lane.b32.xlu1 %v1668_v18, %s6217_s24  ;;  %v4538_v18 = vld [vmem:[%s6206_s4 + $0x48] sm:$0xff]  }
 0x53f   : > { %2339 = vmatpush1.bf16.msra.mxu1 %v4536_v12 }
 0x540   : > { %2340 = vmatprep.subr.bf16.mxu1 %v4680_v7 }
 0x541   : > { %1949 = vrot.lane.b32.xlu0 %v1941_v19, %s4692_s13 }
 0x542   : > { %1704 = vrot.lane.b32.xlu1 %v1693_v20, %s4685_s25 }
 0x543   : > { %2341 = vmatpush1.bf16.msra.mxu1 %v4537_v13 }
 0x544   : > { %2342 = vmatprep.subr.bf16.mxu1 %v4680_v7 }
 0x545   : > { %1728 = vrot.lane.b32.xlu0 %v1718_v21, %s4686_s27  ;;  %v2050_v21 = vld [vmem:[#allocation6 + $0x2c] sm:$0xf] }
 0x546   : > { %1730 = vrot.lane.b32.xlu1 %v1719_v22, %s4686_s27  ;;  %v1944_v22 = vld [vmem:[#allocation6 + $0x2c] sm:$0xf] }
 0x547   : > { %2343 = vmatpush1.bf16.msra.mxu1 %v4538_v18 }
 0x548   : > { %2344 = vmatprep.subr.bf16.mxu1 %v4680_v7 }
 0x549   : > { %1753 = vrot.lane.b32.xlu0 %v1743_v23, %s4687_s28  ;;  %v4539_v23 = vld [vmem:[%s6206_s4 + $0x50] sm:$0xff]  }
 0x54a   : > { %1755 = vrot.lane.b32.xlu1 %v1744_v24, %s4687_s28 }
 0x54b   : > { %2345 = vmatpush1.bf16.msra.mxu1 %v4539_v23 }
 0x54c   : > { %2346 = vmatprep.subr.bf16.mxu1 %v4680_v7 }
 0x54d   : > { %1778 = vrot.lane.b32.xlu0 %v1768_v25, %s4688_s29 }
 0x54e   : > { %1780 = vrot.lane.b32.xlu1 %v1769_v26, %s4688_s29  ;;  %v1969_v26 = vld [vmem:[#allocation6 + $0x28] sm:$0xf] }
 0x551   : > { %1803 = vrot.lane.b32.xlu0 %v1793_v27, %s6221_s30  ;;  %v2146_v27 = vld [vmem:[#allocation6 + $0x2b] sm:$0xf] }
 0x552   : > { %1805 = vrot.lane.b32.xlu1 %v1794_v29, %s6221_s30  ;;  %s6234_s30 = smov 120   ;;  %v2171_v29 = vld [vmem:[#allocation6 + $0x34] sm:$0xf] }
 0x555   : > { %2008 = vrot.lane.b32.xlu0 %v2000_v30, %s6219_s23  ;;  %v4540_v30 = vld [vmem:[%s6206_s4 + $0x58] sm:$0xff]  }
 0x556   : > { %2010 = vrot.lane.b32.xlu1 %v2001_v32, %s6219_s23  ;;  %s6237_s23 = smov 16   ;;  %2347 = vmatpush1.bf16.msra.mxu1 %v4540_v30 }
 0x557   : > { %2348 = vmatprep.subr.bf16.mxu1 %v4680_v7 }
 0x559   : > { %1828 = vrot.lane.b32.xlu0 %v1818_v33, %s4690_s11 }
 0x55a   : > { %1830 = vrot.lane.b32.xlu1 %v1819_v34, %s4690_s11  ;;  %s6235_s11 = smov 64   ;;  %v4541_v34 = vld [vmem:[%s6206_s4 + $0x60] ss:$0 sps:$4 sm:$0xff]  }
 0x55d   : > { %2032 = vrot.lane.b32.xlu0 %v2024_v35, %s6215_s22  ;;  %v2170_v35 = vld [vmem:[#allocation6 + $0x2c] sm:$0xf] }
 0x55e   : > { %2034 = vrot.lane.b32.xlu1 %v2025_v36, %s6215_s22  ;;  %s6236_s22 = smov 8   ;;  %v2172_v36 = vld [vmem:[#allocation6 + $0x3c] sm:$0xf] }
 0x561   : > { %1853 = vrot.lane.b32.xlu0 %v1843_v37, %s6223_s14 }
 0x562   : > { %1851 = vrot.lane.b32.xlu1 %v1842_v38, %s6223_s14 }
 0x565   : > { %2056 = vrot.lane.b32.xlu0 %v2048_v39, %s6217_s24  ;;  %v2322_v39 = vsel %vm6227_vm11, %v4541_v34, 0  ;;  %vm1961_vm11 = vcmask 978816  }
 0x566   : > { %2058 = vrot.lane.b32.xlu1 %v2049_v40, %s6217_s24  ;;  %2349 = vmatpush1.bf16.msra.mxu1 %v2322_v39 }
 0x567   : > { %3041 = vmatprep.subr.bf16.mxu1 %v4680_v7 }
 0x569   : > { %1878 = vrot.lane.b32.xlu0 %v1868_v41, %s4694_s20 }
 0x56a   : > { %1876 = vrot.lane.b32.xlu1 %v1867_v42, %s4694_s20 }
 0x56d   : > { %2081 = vrot.lane.b32.xlu0 %v2073_v43, %s4685_s25 }
 0x56e   : > { %1901 = vrot.lane.b32.xlu1 %v1892_v44, %s6225_s12 }
 0x571   : > { %1903 = vrot.lane.b32.xlu0 %v1893_v45, %s6225_s12 }
 0x572   : > { %1926 = vrot.lane.b32.xlu1 %v1917_v50, %s4682_s21 }
 0x575   : > { %2105 = vrot.lane.b32.xlu0 %v2097_v52, %s4686_s27 }
 0x576   : > { %1951 = vrot.lane.b32.xlu1 %v1942_v53, %s4692_s13 }
 0x579   : > { %1928 = vrot.lane.b32.xlu0 %v1918_v55, %s4682_s21 }
 0x57a   : > { %1977 = vrot.lane.b32.xlu1 %v1968_v58, %s6234_s30 }
 0x57d   : > { %2129 = vrot.lane.b32.xlu0 %v2121_v59, %s4687_s28 }
 0x57e   : > { %1855 = vrot.lane.b32.xlu1 %v1844_v61, %s6223_s14  ;;  %s6238_s14 = smov 24  }
 0x581   : > { %1953 = vrot.lane.b32.xlu0 %v1943_v62, %s4692_s13 }
 0x582   : > { %1880 = vrot.lane.b32.xlu1 %v1869_v63, %s4694_s20 }
 0x585   : > { %2153 = vrot.lane.b32.xlu0 %v2145_v1, %s4688_s29 }
 0x586   : > { %2083 = vrot.lane.b32.xlu1 %v2074_v2, %s4685_s25 }
 0x589   : > { %1975 = vrot.lane.b32.xlu0 %v1967_v4, %s6234_s30 }
 0x58a   : > { %1905 = vrot.lane.b32.xlu1 %v1894_v5, %s6225_s12 }
 0x58d   : > { %2177 = vrot.lane.b32.xlu0 %v2169_v8, %s6235_s11 }
 0x58e   : > { %2107 = vrot.lane.b32.xlu1 %v2098_v9, %s4686_s27 }
 0x591   : > { %2012 = vrot.lane.b32.xlu0 %v2002_v10, %s6236_s22 }
 0x592   : > { %1930 = vrot.lane.b32.xlu1 %v1919_v11, %s4682_s21 }
 0x593   : > { %v1628_v14 = vpop.permute.xlu0 %1627 }
 0x594   : > { %v1727_v15 = vpop.permute.xlu1 %1726  ;;  %1638 = vst.msk [vmem:[#allocation4 + $0x10] sm:$0xf] %vm1635_vm14, %v1628_v14 }
 0x595   : > { %1738 = vst.msk [vmem:[#allocation4 + $0x8] sm:$0xf] %vm1736_vm2, %v1727_v15  ;;  %2036 = vrot.lane.b32.xlu0 %v2026_v16, %s6237_s23 }
 0x596   : > { %2131 = vrot.lane.b32.xlu1 %v2122_v17, %s4687_s28 }
 0x597   : > { %v1653_v19 = vpop.permute.xlu0 %1652 }
 0x598   : > { %v1752_v20 = vpop.permute.xlu1 %1751  ;;  %1663 = vst.msk [vmem:[#allocation4 + $0x10] sm:$0xf] %vm1660_vm15, %v1653_v19 }
 0x599   : > { %1763 = vst.msk [vmem:[#allocation4 + $0x8] sm:$0xf] %vm1761_vm3, %v1752_v20  ;;  %2060 = vrot.lane.b32.xlu0 %v2050_v21, %s6238_s14 }
 0x59a   : > { %1955 = vrot.lane.b32.xlu1 %v1944_v22, %s4692_s13 }
 0x59b   : > { %v1678_v24 = vpop.permute.xlu0 %1677 }
 0x59c   : > { %v1777_v25 = vpop.permute.xlu1 %1776  ;;  %1688 = vst.msk [vmem:[#allocation4 + $0x10] sm:$0xf] %vm1685_vm0, %v1678_v24 }
 0x59d   : > { %1788 = vst.msk [vmem:[#allocation4 + $0x8] sm:$0xf] %vm1786_vm4, %v1777_v25  ;;  %1979 = vrot.lane.b32.xlu0 %v1969_v26, %s6234_s30 }
 0x59e   : > { %2155 = vrot.lane.b32.xlu1 %v2146_v27, %s4688_s29 }
 0x59f   : > { %v1703_v32 = vpop.permute.xlu0 %1702 }
 0x5a0   : > { %v1802_v33 = vpop.permute.xlu1 %1801  ;;  %1713 = vst.msk [vmem:[#allocation4 + $0x10] sm:$0xf] %vm1710_vm1, %v1703_v32 }
 0x5a1   : > { %1813 = vst.msk [vmem:[#allocation4 + $0x8] sm:$0xf] %vm1811_vm5, %v1802_v33  ;;  %2181 = vrot.lane.b32.xlu0 %v2171_v29, %s6235_s11 }
 0x5a2   : > { %2179 = vrot.lane.b32.xlu1 %v2170_v35, %s6235_s11 }
 0x5a3   : > { %v1850_v37 = vpop.permute.xlu0 %1849 }
 0x5a4   : > { %v1827_v38 = vpop.permute.xlu1 %1826  ;;  %1862 = vst.msk [vmem:[#allocation4] sm:$0xf] %vm1861_vm7, %v1850_v37 }
 0x5a5   : > { %1838 = vst.msk [vmem:[#allocation4 + $0x8] sm:$0xf] %vm1836_vm6, %v1827_v38 }
 0x5a6   : > { %2183 = vrot.lane.b32.xlu1 %v2172_v36, %s6235_s11 }
 0x5a7   : > { %v1875_v40 = vpop.permute.xlu0 %1874 }
 0x5a8   : > { %v1630_v41 = vpop.permute.xlu1 %1629  ;;  %1887 = vst.msk [vmem:[#allocation4] sm:$0xf] %vm1886_vm8, %v1875_v40 }
 0x5a9   : > { %1639 = vst.msk [vmem:[#allocation4 + $0x18] sm:$0xf] %vm1635_vm14, %v1630_v41 }
 0x5ab   : > { %v1900_v42 = vpop.permute.xlu0 %1899 }
 0x5ac   : > { %v1655_v43 = vpop.permute.xlu1 %1654  ;;  %1912 = vst.msk [vmem:[#allocation4] sm:$0xf] %vm1911_vm9, %v1900_v42 }
 0x5ad   : > { %1664 = vst.msk [vmem:[#allocation4 + $0x18] sm:$0xf] %vm1660_vm15, %v1655_v43  ;;  %v2510_v43 = vld [vmem:[#allocation7 + $0x28] sm:$0xf] }
 0x5ae   : > { %2521 = vrot.lane.b32.xlu1 %v2510_v43, %s4687_s28 }
 0x5af   : > { %v1925_v44 = vpop.permute.xlu0 %1924 }
 0x5b0   : > { %v1680_v45 = vpop.permute.xlu1 %1679  ;;  %1937 = vst.msk [vmem:[#allocation4] sm:$0xf] %vm1936_vm10, %v1925_v44  ;;  %v2410_v44 = vld [vmem:[#allocation7 + $0x2] sm:$0xf] }
 0x5b1   : > { %1689 = vst.msk [vmem:[#allocation4 + $0x18] sm:$0xf] %vm1685_vm0, %v1680_v45  ;;  %v2534_v45 = vld [vmem:[#allocation7 + $0x29] sm:$0xf] }
 0x5b2   : > { %2545 = vrot.lane.b32.xlu1 %v2534_v45, %s4688_s29 }
 0x5b3   : > { %v1950_v50 = vpop.permute.xlu0 %1949 }
 0x5b4   : > { %v1705_v51 = vpop.permute.xlu1 %1704  ;;  %1962 = vst.msk [vmem:[#allocation4] sm:$0xf] %vm1961_vm11, %v1950_v50  ;;  %v2378_v50 = vld [vmem:[#allocation7] sm:$0xf] }
 0x5b5   : > { %1714 = vst.msk [vmem:[#allocation4 + $0x18] sm:$0xf] %vm1710_vm1, %v1705_v51 }
 0x5b6   : > { %2382 = vst.msk [vmem:[#allocation8] sm:$0xf] %vm1602_vm13, %v2378_v50 }
 0x5b7   : > { %v1729_v52 = vpop.permute.xlu0 %1728 }
 0x5b8   : > { %v1731_v53 = vpop.permute.xlu1 %1730  ;;  %1739 = vst.msk [vmem:[#allocation4 + $0x10] sm:$0xf] %vm1736_vm2, %v1729_v52  ;;  %v4276_v52 = vld [vmem:[%s6207_s5] ss:$0 sm:$0xff] }
 0x5b9   : > { %1740 = vst.msk [vmem:[#allocation4 + $0x18] sm:$0xf] %vm1736_vm2, %v1731_v53 }
 0x5bb   : > { %v1754_v54 = vpop.permute.xlu0 %1753 }
 0x5bc   : > { %v1756_v55 = vpop.permute.xlu1 %1755  ;;  %1764 = vst.msk [vmem:[#allocation4 + $0x10] sm:$0xf] %vm1761_vm3, %v1754_v54 }
 0x5bd   : > { %1765 = vst.msk [vmem:[#allocation4 + $0x18] sm:$0xf] %vm1761_vm3, %v1756_v55 }
 0x5bf   : > { %v1779_v58 = vpop.permute.xlu0 %1778 }
 0x5c0   : > { %v1781_v57 = vpop.permute.xlu1 %1780  ;;  %1789 = vst.msk [vmem:[#allocation4 + $0x10] sm:$0xf] %vm1786_vm4, %v1779_v58 }
 0x5c1   : > { %1790 = vst.msk [vmem:[#allocation4 + $0x18] sm:$0xf] %vm1786_vm4, %v1781_v57 }
 0x5c3   : > { %v1804_v59 = vpop.permute.xlu0 %1803 }
 0x5c4   : > { %v1806_v61 = vpop.permute.xlu1 %1805  ;;  %1814 = vst.msk [vmem:[#allocation4 + $0x10] sm:$0xf] %vm1811_vm5, %v1804_v59 }
 0x5c5   : > { %1815 = vst.msk [vmem:[#allocation4 + $0x18] sm:$0xf] %vm1811_vm5, %v1806_v61 }
 0x5c7   : > { %v2009_v60 = vpop.permute.xlu0 %2008 }
 0x5c8   : > { %v2011_v62 = vpop.permute.xlu1 %2010  ;;  %2020 = vst.msk [vmem:[#allocation4 + $0x4] sm:$0xf] %vm1635_vm14, %v2009_v60 }
 0x5c9   : > { %2021 = vst.msk [vmem:[#allocation4 + $0xc] sm:$0xf] %vm1635_vm14, %v2011_v62 }
 0x5cb   : > { %v1829_v63 = vpop.permute.xlu0 %1828 }
 0x5cc   : > { %v1831_v0 = vpop.permute.xlu1 %1830  ;;  %1839 = vst.msk [vmem:[#allocation4 + $0x10] sm:$0xf] %vm1836_vm6, %v1829_v63 }
 0x5cd   : > { %1840 = vst.msk [vmem:[#allocation4 + $0x18] sm:$0xf] %vm1836_vm6, %v1831_v0  ;;  %vm1987_vm6 = vcmask 1044416  }
 0x5cf   : > { %v2033_v1 = vpop.permute.xlu0 %2032 }
 0x5d0   : > { %v2035_v2 = vpop.permute.xlu1 %2034  ;;  %2044 = vst.msk [vmem:[#allocation4 + $0x4] sm:$0xf] %vm1660_vm15, %v2033_v1 }
 0x5d1   : > { %2045 = vst.msk [vmem:[#allocation4 + $0xc] sm:$0xf] %vm1660_vm15, %v2035_v2 }
 0x5d3   : > { %v1854_v3 = vpop.permute.xlu0 %1853 }
 0x5d4   : > { %v1852_v4 = vpop.permute.xlu1 %1851  ;;  %1864 = vst.msk [vmem:[#allocation4 + $0x10] sm:$0xf] %vm1861_vm7, %v1854_v3 }
 0x5d5   : > { %1863 = vst.msk [vmem:[#allocation4 + $0x8] sm:$0xf] %vm1861_vm7, %v1852_v4 }
 0x5d7   : > { %v2057_v5 = vpop.permute.xlu0 %2056 }
 0x5d8   : > { %v2059_v6 = vpop.permute.xlu1 %2058  ;;  %2068 = vst.msk [vmem:[#allocation4 + $0x4] sm:$0xf] %vm1685_vm0, %v2057_v5 }
 0x5d9   : > { %2069 = vst.msk [vmem:[#allocation4 + $0xc] sm:$0xf] %vm1685_vm0, %v2059_v6 }
 0x5db   : > { %v1879_v8 = vpop.permute.xlu0 %1878 }
 0x5dc   : > { %v1877_v9 = vpop.permute.xlu1 %1876  ;;  %1889 = vst.msk [vmem:[#allocation4 + $0x10] sm:$0xf] %vm1886_vm8, %v1879_v8 }
 0x5dd   : > { %1888 = vst.msk [vmem:[#allocation4 + $0x8] sm:$0xf] %vm1886_vm8, %v1877_v9 }
 0x5df   : > { %v2082_v10 = vpop.permute.xlu0 %2081 }
 0x5e0   : > { %v1902_v11 = vpop.permute.xlu1 %1901  ;;  %2093 = vst.msk [vmem:[#allocation4 + $0x4] sm:$0xf] %vm1710_vm1, %v2082_v10 }
 0x5e1   : > { %1913 = vst.msk [vmem:[#allocation4 + $0x8] sm:$0xf] %vm1911_vm9, %v1902_v11 }
 0x5e3   : > { %v1904_v12 = vpop.permute.xlu0 %1903 }
 0x5e4   : > { %v1927_v13 = vpop.permute.xlu1 %1926  ;;  %1914 = vst.msk [vmem:[#allocation4 + $0x10] sm:$0xf] %vm1911_vm9, %v1904_v12 }
 0x5e5   : > { %1938 = vst.msk [vmem:[#allocation4 + $0x8] sm:$0xf] %vm1936_vm10, %v1927_v13 }
 0x5e7   : > { %v2106_v14 = vpop.permute.xlu0 %2105 }
 0x5e8   : > { %v1952_v15 = vpop.permute.xlu1 %1951  ;;  %2117 = vst.msk [vmem:[#allocation4 + $0x4] sm:$0xf] %vm1736_vm2, %v2106_v14 }
 0x5e9   : > { %1963 = vst.msk [vmem:[#allocation4 + $0x8] sm:$0xf] %vm1961_vm11, %v1952_v15 }
 0x5eb   : > { %v1929_v16 = vpop.permute.xlu0 %1928 }
 0x5ec   : > { %v1978_v17 = vpop.permute.xlu1 %1977  ;;  %1939 = vst.msk [vmem:[#allocation4 + $0x10] sm:$0xf] %vm1936_vm10, %v1929_v16 }
 0x5ed   : > { %1989 = vst.msk [vmem:[#allocation4 + $0x8] sm:$0xf] %vm1987_vm6, %v1978_v17 }
 0x5ef   : > { %v2130_v18 = vpop.permute.xlu0 %2129 }
 0x5f0   : > { %v1856_v19 = vpop.permute.xlu1 %1855  ;;  %2141 = vst.msk [vmem:[#allocation4 + $0x4] sm:$0xf] %vm1761_vm3, %v2130_v18 }
 0x5f1   : > { %1865 = vst.msk [vmem:[#allocation4 + $0x18] sm:$0xf] %vm1861_vm7, %v1856_v19  ;;  %vm1582_vm7 = vcmask 64512  }
 0x5f3   : > { %v1954_v20 = vpop.permute.xlu0 %1953 }
 0x5f4   : > { %v1881_v21 = vpop.permute.xlu1 %1880  ;;  %1964 = vst.msk [vmem:[#allocation4 + $0x10] sm:$0xf] %vm1961_vm11, %v1954_v20 }
 0x5f5   : > { %1890 = vst.msk [vmem:[#allocation4 + $0x18] sm:$0xf] %vm1886_vm8, %v1881_v21  ;;  %vm3086_vm8 = vcmask 97280  }
 0x5f7   : > { %v2154_v22 = vpop.permute.xlu0 %2153 }
 0x5f8   : > { %v2084_v23 = vpop.permute.xlu1 %2083  ;;  %2165 = vst.msk [vmem:[#allocation4 + $0x4] sm:$0xf] %vm1786_vm4, %v2154_v22 }
 0x5f9   : > { %2094 = vst.msk [vmem:[#allocation4 + $0xc] sm:$0xf] %vm1710_vm1, %v2084_v23  ;;  %v4548_v23 = vld [vmem:[%s6208_s6] sm:$0xff]  }
 0x5fb   : > { %v1976_v24 = vpop.permute.xlu0 %1975 }
 0x5fc   : > { %v1906_v25 = vpop.permute.xlu1 %1905  ;;  %1988 = vst.msk [vmem:[#allocation4] sm:$0xf] %vm1987_vm6, %v1976_v24  ;;  %v4696_v24 = vmov 0.0  }
 0x5fd   : > { %1915 = vst.msk [vmem:[#allocation4 + $0x18] sm:$0xf] %vm1911_vm9, %v1906_v25  ;;  %4385 = vmatprep.subr.bf16.mxu0 %v4696_v24 }
 0x5fe   : > { %4386 = vmatpush3.bf16.msra.mxu0 %v4548_v23 }
 0x5ff   : > { %v2178_v26 = vpop.permute.xlu0 %2177  ;;  %4387 = vmatprep.subr.bf16.mxu0 %v4696_v24 }
 0x600   : > { %v2108_v27 = vpop.permute.xlu1 %2107  ;;  %2189 = vst.msk [vmem:[#allocation4 + $0x4] sm:$0xf] %vm1811_vm5, %v2178_v26 }
 0x601   : > { %2118 = vst.msk [vmem:[#allocation4 + $0xc] sm:$0xf] %vm1736_vm2, %v2108_v27  ;;  %v4549_v27 = vld [vmem:[%s6208_s6 + $0x8] sm:$0xff]  }
 0x602   : > { %4388 = vmatpush3.bf16.msra.mxu0 %v4549_v27 }
 0x603   : > { %v2013_v29 = vpop.permute.xlu0 %2012  ;;  %4389 = vmatprep.subr.bf16.mxu0 %v4696_v24 }
 0x604   : > { %v1931_v30 = vpop.permute.xlu1 %1930  ;;  %2022 = vst.msk [vmem:[#allocation4 + $0x14] sm:$0xf] %vm1635_vm14, %v2013_v29 }
 0x605   : > { %1940 = vst.msk [vmem:[#allocation4 + $0x18] sm:$0xf] %vm1936_vm10, %v1931_v30 }
 0x607   : > { %v2037_v32 = vpop.permute.xlu0 %2036 }
 0x608   : > { %v2132_v33 = vpop.permute.xlu1 %2131  ;;  %2046 = vst.msk [vmem:[#allocation4 + $0x14] sm:$0xf] %vm1660_vm15, %v2037_v32  ;;  %v4550_v32 = vld [vmem:[%s6208_s6 + $0x10] sm:$0xff]  }
 0x609   : > { %2142 = vst.msk [vmem:[#allocation4 + $0xc] sm:$0xf] %vm1761_vm3, %v2132_v33  ;;  %4390 = vmatpush3.bf16.msra.mxu0 %v4550_v32 }
 0x60a   : > { %4391 = vmatprep.subr.bf16.mxu0 %v4696_v24 }
 0x60b   : > { %v2061_v34 = vpop.permute.xlu0 %2060 }
 0x60c   : > { %v1956_v35 = vpop.permute.xlu1 %1955  ;;  %2070 = vst.msk [vmem:[#allocation4 + $0x14] sm:$0xf] %vm1685_vm0, %v2061_v34 }
 0x60d   : > { %1965 = vst.msk [vmem:[#allocation4 + $0x18] sm:$0xf] %vm1961_vm11, %v1956_v35  ;;  %vm4697_vm11 = vmmov 0   ;;  %v4551_v35 = vld [vmem:[%s6208_s6 + $0x18] sm:$0xff]  }
 0x60e   : > { %2095 = vst.msk [vmem:[#allocation4 + $0x14] sm:$0xf] %vm1710_vm1, %v5257_v46  ;;  %4395 = vmatprep.mubr.msk.bf16.mxu0 %vm4697_vm11, %v4696_v24  ;;  %4392 = vmatpush3.bf16.msra.mxu0 %v4551_v35 }
 0x60f   : > { %1991 = vst.msk [vmem:[#allocation4 + $0x18] sm:$0xf] %vm1987_vm6, %v5263_v49  ;;  %v1980_v36 = vpop.permute.xlu0 %1979  ;;  %4393 = vmatprep.subr.bf16.mxu0 %v4696_v24 }
 0x610   : > { %2119 = vst.msk [vmem:[#allocation4 + $0x14] sm:$0xf] %vm1736_vm2, %v5259_v47  ;;  %v2156_v37 = vpop.permute.xlu1 %2155  ;;  %v4542_v47 = vld [vmem:[#allocation4] ss:$8 sps:$4 sm:$0xff]  }
 0x611   : > { %2143 = vst.msk [vmem:[#allocation4 + $0x14] sm:$0xf] %vm1761_vm3, %v5261_v48 }
 0x612   : > { %2167 = vst.msk [vmem:[#allocation4 + $0x14] sm:$0xf] %vm1786_vm4, %v5271_v56  ;;  %2166 = vst.msk [vmem:[#allocation4 + $0xc] sm:$0xf] %vm1786_vm4, %v2156_v37  ;;  %v2386_v56 = vld [vmem:[#allocation7 + $0x1] sm:$0xf] }
 0x613   : > { %1990 = vst.msk [vmem:[#allocation4 + $0x10] sm:$0xf] %vm1987_vm6, %v1980_v36  ;;  %v2182_v38 = vpop.permute.xlu0 %2181  ;;  %2394 = vrot.lane.b32.xlu0 %v2386_v56, %s6236_s22  ;;  %v4552_v36 = vld [vmem:[%s6208_s6 + $0x20] ss:$0 sps:$4 sm:$0xff]  }
 0x614   : > { %v2180_v46 = vpop.permute.xlu1 %2179  ;;  %2191 = vst.msk [vmem:[#allocation4 + $0x14] sm:$0xf] %vm1811_vm5, %v2182_v38 }
 0x615   : > { %2190 = vst.msk [vmem:[#allocation4 + $0xc] sm:$0xf] %vm1811_vm5, %v2180_v46 }
 0x617   : > { %2418 = vrot.lane.b32.xlu0 %v2410_v44, %s6237_s23 }
 0x618   : > { %v2184_v49 = vpop.permute.xlu1 %2183 }
 0x619   : > { %2192 = vst.msk [vmem:[#allocation4 + $0x1c] sm:$0xf] %vm1811_vm5, %v2184_v49  ;;  %v2558_v49 = vld [vmem:[#allocation7 + $0x2a] sm:$0xf] }
 0x61a   : > { %v4545_v39 = vld [vmem:[#allocation4 + $0x10] ss:$8 sps:$4 sm:$0xff]  }
 0x61b   : > { %v2209_v42 = vpack.c.bf16 %v4545_v39, %v4542_v47  ;;  %v3552_v39 = vld [vmem:[#allocation9 + $0x58] sm:$0xf] }
 0x61c   : > { %v4544_v48 = vld [vmem:[#allocation4 + $0x4] ss:$8 sps:$4 sm:$0xff]  }
 0x620   : > { %v4547_v40 = vld [vmem:[#allocation4 + $0x14] ss:$8 sps:$4 sm:$0xff]  }
 0x621   : > { %v2210_v41 = vpack.c.bf16 %v4547_v40, %v4544_v48  ;;  %v2757_v48 = vld [vmem:[#allocation9 + $0x61] sm:$0xf]  ;;  %v2782_v40 = vld [vmem:[#allocation9 + $0x91] sm:$0xf] }
 0x623   : > { %4290 = vmatprep.mubr.msk.bf16.mxu1 %vm1465_vm12, %v2210_v41  ;;  %v3097_v41 = vld [vmem:[#allocation9 + $0x91] sm:$0xf] }
 0x624   : > { %2357 = vmatmul.mubr.bf16.vlgmr.msra.gmra.mrb[0].mxu1 %v2209_v42  ;;  %v2522_v42 = vpop.permute.xlu1 %2521 }
 0x628   : > { %v2546_v56 = vpop.permute.xlu1 %2545 }
 0x685   : > { %v2395_v51 = vpop.permute.xlu0 %2394 }
 0x686   : > { %2406 = vst.msk [vmem:[#allocation8] sm:$0xf] %vm1635_vm14, %v2395_v51 }
 0x689   : > { %v2419_v54 = vpop.permute.xlu0 %2418 }
 0x68a   : > { %2430 = vst.msk [vmem:[#allocation8] sm:$0xf] %vm1660_vm15, %v2419_v54 }
 0x6f7   : > { %v2358_v53 = vpop.f32.mrb[0].mxu1 }
 0x6f8   : > { %v2359_v55 = vadd.f32 %v4276_v52, %v2358_v53  ;;  %v2360_v58 = vpop.f32.mrb[1].mxu1 }
 0x6f9   : > { %v2361_v57 = vpop.f32.mrb[2].mxu1 }
 0x6fa   : > { %v2365_v59 = vmax.f32 %v2359_v55, 0.0  ;;  %v2362_v61 = vadd.f32 %v4276_v52, %v2361_v57  ;;  %v2363_v60 = vpop.f32.mrb[3].mxu1 }
 0x6fc   : > { %v2369_v62 = vcombine.high %v2365_v59, %v2365_v59  ;;  %2374 = vst.msk [vmem:[#allocation7 + $0x9] sm:$0xf] %vm1602_vm13, %v2365_v59  ;;  %v2366_v63 = vmax.f32 %v2362_v61, 0.0 }
 0x6fe   : > { %2375 = vst.msk [vmem:[#allocation7 + $0x11] sm:$0xf] %vm1602_vm13, %v2369_v62  ;;  %v2370_v0 = vcombine.high %v2366_v63, %v2366_v63  ;;  %2376 = vst.msk [vmem:[#allocation7 + $0x19] sm:$0xf] %vm1602_vm13, %v2366_v63 }
 0x700   : > { %2377 = vst.msk [vmem:[#allocation7 + $0x21] sm:$0xf] %vm1602_vm13, %v2370_v0 }
 0x703   : > { %v2434_v1 = vld [vmem:[#allocation7 + $0x8] sm:$0xf] }
 0x704   : > { %v2387_v2 = vld [vmem:[#allocation7 + $0x9] sm:$0xf]  ;;  %2442 = vrot.lane.b32.xlu0 %v2434_v1, %s6238_s14 }
 0x705   : > { %2396 = vrot.lane.b32.xlu1 %v2387_v2, %s6236_s22  ;;  %v2379_v3 = vld [vmem:[#allocation7 + $0x8] sm:$0xf]  ;;  %v2389_v8 = vld [vmem:[#allocation7 + $0x19] sm:$0xf]  ;;  %v2380_v10 = vld [vmem:[#allocation7 + $0x10] sm:$0xf] }
 0x706   : > { %2383 = vst.msk [vmem:[#allocation8 + $0x4] sm:$0xf] %vm1602_vm13, %v2379_v3  ;;  %v2458_v4 = vld [vmem:[#allocation7 + $0x9] sm:$0xf]  ;;  %v2381_v9 = vld [vmem:[#allocation7 + $0x18] sm:$0xf] }
 0x707   : > { %v2411_v5 = vld [vmem:[#allocation7 + $0xa] sm:$0xf]  ;;  %2385 = vst.msk [vmem:[#allocation8 + $0xc] sm:$0xf] %vm1602_vm13, %v2381_v9  ;;  %2384 = vst.msk [vmem:[#allocation8 + $0x8] sm:$0xf] %vm1602_vm13, %v2380_v10 }
 0x708   : > { %2466 = vrot.lane.b32.xlu0 %v2458_v4, %s4685_s25  ;;  %v2482_v6 = vld [vmem:[#allocation7 + $0xa] sm:$0xf]  ;;  %v2413_v11 = vld [vmem:[#allocation7 + $0x1a] sm:$0xf]  ;;  %v2388_v12 = vld [vmem:[#allocation7 + $0x11] sm:$0xf] }
 0x709   : > { %2420 = vrot.lane.b32.xlu1 %v2411_v5, %s6237_s23  ;;  %v2435_v13 = vld [vmem:[#allocation7 + $0x10] sm:$0xf]  ;;  %v2436_v16 = vld [vmem:[#allocation7 + $0x18] sm:$0xf]  ;;  %v2437_v29 = vld [vmem:[#allocation7 + $0x20] sm:$0xf] }
 0x70a   : > { %v2412_v14 = vld [vmem:[#allocation7 + $0x12] sm:$0xf]  ;;  %v2460_v18 = vld [vmem:[#allocation7 + $0x19] sm:$0xf]  ;;  %v2461_v33 = vld [vmem:[#allocation7 + $0x21] sm:$0xf] }
 0x70b   : > { %v2459_v15 = vld [vmem:[#allocation7 + $0x11] sm:$0xf]  ;;  %v2508_v19 = vld [vmem:[#allocation7 + $0x18] sm:$0xf]  ;;  %v2509_v34 = vld [vmem:[#allocation7 + $0x20] sm:$0xf] }
 0x70c   : > { %2490 = vrot.lane.b32.xlu0 %v2482_v6, %s4686_s27  ;;  %v2483_v17 = vld [vmem:[#allocation7 + $0x12] sm:$0xf]  ;;  %v2484_v20 = vld [vmem:[#allocation7 + $0x1a] sm:$0xf]  ;;  %v2485_v37 = vld [vmem:[#allocation7 + $0x22] sm:$0xf] }
 0x70d   : > { %2400 = vrot.lane.b32.xlu1 %v2389_v8, %s6236_s22  ;;  %v2532_v21 = vld [vmem:[#allocation7 + $0x19] sm:$0xf]  ;;  %v2507_v22 = vld [vmem:[#allocation7 + $0x10] sm:$0xf]  ;;  %v2533_v38 = vld [vmem:[#allocation7 + $0x21] sm:$0xf] }
 0x70e   : > { %v2556_v25 = vld [vmem:[#allocation7 + $0x1a] sm:$0xf]  ;;  %v2531_v26 = vld [vmem:[#allocation7 + $0x11] sm:$0xf]  ;;  %vm6239_vm13 = vcmask 1043456  }
 0x70f   : > { %v2555_v30 = vld [vmem:[#allocation7 + $0x12] sm:$0xf]  ;;  %v2639_v46 = vsel %vm6239_vm13, %v4552_v36, 0  ;;  %v2557_v47 = vld [vmem:[#allocation7 + $0x22] sm:$0xf] }
 0x710   : > { %2398 = vrot.lane.b32.xlu0 %v2388_v12, %s6236_s22  ;;  %4394 = vmatpush3.bf16.msra.mxu0 %v2639_v46  ;;  %s6241_s22 = smov 80  }
 0x711   : > { %2424 = vrot.lane.b32.xlu1 %v2413_v11, %s6237_s23  ;;  %3373 = vmatprep.subr.bf16.mxu0 %v4680_v7 }
 0x714   : > { %2422 = vrot.lane.b32.xlu0 %v2412_v14, %s6237_s23 }
 0x715   : > { %2444 = vrot.lane.b32.xlu1 %v2435_v13, %s6238_s14 }
 0x718   : > { %2446 = vrot.lane.b32.xlu0 %v2436_v16, %s6238_s14  ;;  %v3577_v16 = vld [vmem:[#allocation9 + $0x29] sm:$0xf] }
 0x719   : > { %2468 = vrot.lane.b32.xlu1 %v2459_v15, %s4685_s25 }
 0x71c   : > { %2470 = vrot.lane.b32.xlu0 %v2460_v18, %s4685_s25  ;;  %v2748_v18 = vld [vmem:[#allocation9 + $0x90] sm:$0xf] }
 0x71d   : > { %2492 = vrot.lane.b32.xlu1 %v2483_v17, %s4686_s27  ;;  %v3121_v17 = vld [vmem:[#allocation9 + $0x62] sm:$0xf] }
 0x720   : > { %2494 = vrot.lane.b32.xlu0 %v2484_v20, %s4686_s27 }
 0x721   : > { %2517 = vrot.lane.b32.xlu1 %v2508_v19, %s4687_s28 }
 0x724   : > { %2515 = vrot.lane.b32.xlu0 %v2507_v22, %s4687_s28 }
 0x725   : > { %2541 = vrot.lane.b32.xlu1 %v2532_v21, %s4688_s29  ;;  %v4291_v21 = vld [vmem:[%s6209_s7] ss:$0 sm:$0xff] }
 0x728   : > { %2539 = vrot.lane.b32.xlu0 %v2531_v26, %s4688_s29 }
 0x729   : > { %2565 = vrot.lane.b32.xlu1 %v2556_v25, %s6235_s11 }
 0x72c   : > { %2563 = vrot.lane.b32.xlu0 %v2555_v30, %s6235_s11 }
 0x72d   : > { %2448 = vrot.lane.b32.xlu1 %v2437_v29, %s6238_s14  ;;  %s6240_s14 = smov 96  }
 0x730   : > { %2519 = vrot.lane.b32.xlu0 %v2509_v34, %s4687_s28 }
 0x731   : > { %2472 = vrot.lane.b32.xlu1 %v2461_v33, %s4685_s25 }
 0x734   : > { %2543 = vrot.lane.b32.xlu0 %v2533_v38, %s4688_s29 }
 0x735   : > { %2496 = vrot.lane.b32.xlu1 %v2485_v37, %s4686_s27 }
 0x738   : > { %2567 = vrot.lane.b32.xlu0 %v2557_v47, %s6235_s11 }
 0x739   : > { %2569 = vrot.lane.b32.xlu1 %v2558_v49, %s6235_s11 }
 0x73c   : > { %2765 = vrot.lane.b32.xlu0 %v2757_v48, %s6237_s23 }
 0x73d   : > { %3563 = vrot.lane.b32.xlu1 %v3552_v39, %s6240_s14 }
 0x740   : > { %2790 = vrot.lane.b32.xlu0 %v2782_v40, %s4685_s25 }
 0x741   : > { %3588 = vrot.lane.b32.xlu1 %v3577_v16, %s4692_s13 }
 0x744   : > { %3105 = vrot.lane.b32.xlu0 %v3097_v41, %s6237_s23 }
 0x748   : > { %3129 = vrot.lane.b32.xlu0 %v3121_v17, %s4685_s25 }
 0x776   : > { %v2443_v43 = vpop.permute.xlu0 %2442 }
 0x777   : > { %v2397_v44 = vpop.permute.xlu1 %2396  ;;  %2454 = vst.msk [vmem:[#allocation8] sm:$0xf] %vm1685_vm0, %v2443_v43 }
 0x778   : > { %2407 = vst.msk [vmem:[#allocation8 + $0x4] sm:$0xf] %vm1635_vm14, %v2397_v44 }
 0x77a   : > { %v2467_v45 = vpop.permute.xlu0 %2466 }
 0x77b   : > { %v2421_v50 = vpop.permute.xlu1 %2420  ;;  %2478 = vst.msk [vmem:[#allocation8] sm:$0xf] %vm1710_vm1, %v2467_v45 }
 0x77c   : > { %2431 = vst.msk [vmem:[#allocation8 + $0x4] sm:$0xf] %vm1660_vm15, %v2421_v50 }
 0x77e   : > { %v2491_v51 = vpop.permute.xlu0 %2490 }
 0x77f   : > { %v2401_v52 = vpop.permute.xlu1 %2400  ;;  %2502 = vst.msk [vmem:[#allocation8] sm:$0xf] %vm1736_vm2, %v2491_v51 }
 0x780   : > { %2409 = vst.msk [vmem:[#allocation8 + $0xc] sm:$0xf] %vm1635_vm14, %v2401_v52 }
 0x782   : > { %v2399_v53 = vpop.permute.xlu0 %2398 }
 0x783   : > { %v2425_v54 = vpop.permute.xlu1 %2424  ;;  %2408 = vst.msk [vmem:[#allocation8 + $0x8] sm:$0xf] %vm1635_vm14, %v2399_v53  ;;  %vm2691_vm14 = vcmask 125952  }
 0x784   : > { %2433 = vst.msk [vmem:[#allocation8 + $0xc] sm:$0xf] %vm1660_vm15, %v2425_v54 }
 0x785   : > { %2752 = vst.msk [vmem:[#allocation10] sm:$0xf] %vm2691_vm14, %v2748_v18 }
 0x786   : > { %v2423_v55 = vpop.permute.xlu0 %2422 }
 0x787   : > { %v2445_v58 = vpop.permute.xlu1 %2444  ;;  %2432 = vst.msk [vmem:[#allocation8 + $0x8] sm:$0xf] %vm1660_vm15, %v2423_v55  ;;  %vm2777_vm15 = vcmask 257152  }
 0x788   : > { %2455 = vst.msk [vmem:[#allocation8 + $0x4] sm:$0xf] %vm1685_vm0, %v2445_v58 }
 0x78a   : > { %v2447_v57 = vpop.permute.xlu0 %2446 }
 0x78b   : > { %v2469_v59 = vpop.permute.xlu1 %2468  ;;  %2456 = vst.msk [vmem:[#allocation8 + $0x8] sm:$0xf] %vm1685_vm0, %v2447_v57 }
 0x78c   : > { %2479 = vst.msk [vmem:[#allocation8 + $0x4] sm:$0xf] %vm1710_vm1, %v2469_v59 }
 0x78e   : > { %v2471_v61 = vpop.permute.xlu0 %2470 }
 0x78f   : > { %v2493_v60 = vpop.permute.xlu1 %2492  ;;  %2480 = vst.msk [vmem:[#allocation8 + $0x8] sm:$0xf] %vm1710_vm1, %v2471_v61 }
 0x790   : > { %2503 = vst.msk [vmem:[#allocation8 + $0x4] sm:$0xf] %vm1736_vm2, %v2493_v60 }
 0x792   : > { %v2495_v62 = vpop.permute.xlu0 %2494 }
 0x793   : > { %v2518_v63 = vpop.permute.xlu1 %2517  ;;  %2504 = vst.msk [vmem:[#allocation8 + $0x8] sm:$0xf] %vm1736_vm2, %v2495_v62 }
 0x794   : > { %2528 = vst.msk [vmem:[#allocation8 + $0x4] sm:$0xf] %vm1761_vm3, %v2518_v63 }
 0x796   : > { %v2516_v0 = vpop.permute.xlu0 %2515 }
 0x797   : > { %v2542_v1 = vpop.permute.xlu1 %2541  ;;  %2527 = vst.msk [vmem:[#allocation8] sm:$0xf] %vm1761_vm3, %v2516_v0 }
 0x798   : > { %2552 = vst.msk [vmem:[#allocation8 + $0x4] sm:$0xf] %vm1786_vm4, %v2542_v1 }
 0x79a   : > { %v2540_v2 = vpop.permute.xlu0 %2539 }
 0x79b   : > { %v2566_v3 = vpop.permute.xlu1 %2565  ;;  %2551 = vst.msk [vmem:[#allocation8] sm:$0xf] %vm1786_vm4, %v2540_v2 }
 0x79c   : > { %2576 = vst.msk [vmem:[#allocation8 + $0x4] sm:$0xf] %vm1811_vm5, %v2566_v3 }
 0x79e   : > { %v2564_v4 = vpop.permute.xlu0 %2563 }
 0x79f   : > { %v2449_v5 = vpop.permute.xlu1 %2448  ;;  %2575 = vst.msk [vmem:[#allocation8] sm:$0xf] %vm1811_vm5, %v2564_v4 }
 0x7a0   : > { %2457 = vst.msk [vmem:[#allocation8 + $0xc] sm:$0xf] %vm1685_vm0, %v2449_v5  ;;  %vm2802_vm0 = vcmask 388352  }
 0x7a2   : > { %v2520_v6 = vpop.permute.xlu0 %2519 }
 0x7a3   : > { %v2473_v8 = vpop.permute.xlu1 %2472  ;;  %2529 = vst.msk [vmem:[#allocation8 + $0x8] sm:$0xf] %vm1761_vm3, %v2520_v6 }
 0x7a4   : > { %2481 = vst.msk [vmem:[#allocation8 + $0xc] sm:$0xf] %vm1710_vm1, %v2473_v8  ;;  %vm2852_vm1 = vcmask 650752  }
 0x7a6   : > { %v2544_v9 = vpop.permute.xlu0 %2543  ;;  %v4553_v13 = vld [vmem:[#allocation8] sm:$0xff]  }
 0x7a7   : > { %v2497_v10 = vpop.permute.xlu1 %2496  ;;  %2553 = vst.msk [vmem:[#allocation8 + $0x8] sm:$0xf] %vm1786_vm4, %v2544_v9 }
 0x7a8   : > { %2505 = vst.msk [vmem:[#allocation8 + $0xc] sm:$0xf] %vm1736_vm2, %v2497_v10  ;;  %vm2877_vm2 = vcmask 781952  }
 0x7a9   : > { %2530 = vst.msk [vmem:[#allocation8 + $0xc] sm:$0xf] %vm1761_vm3, %v2522_v42  ;;  %vm2902_vm3 = vcmask 913152  }
 0x7aa   : > { %2554 = vst.msk [vmem:[#allocation8 + $0xc] sm:$0xf] %vm1786_vm4, %v2546_v56  ;;  %v2568_v11 = vpop.permute.xlu0 %2567  ;;  %vm2927_vm4 = vcmask 1044352  }
 0x7ab   : > { %v2570_v12 = vpop.permute.xlu1 %2569  ;;  %2577 = vst.msk [vmem:[#allocation8 + $0x8] sm:$0xf] %vm1811_vm5, %v2568_v11 }
 0x7ac   : > { %2578 = vst.msk [vmem:[#allocation8 + $0xc] sm:$0xf] %vm1811_vm5, %v2570_v12  ;;  %vm3037_vm5 = vcmask 130048  }
 0x7ae   : > { %v2766_v19 = vpop.permute.xlu0 %2765 }
 0x7af   : > { %2778 = vst.msk [vmem:[#allocation10] sm:$0xf] %vm2777_vm15, %v2766_v19  ;;  %v5626_v57 = vpop.permute.xlu1 %3563 }
 0x7b2   : > { %v2791_v20 = vpop.permute.xlu0 %2790 }
 0x7b3   : > { %v4554_v14 = vld [vmem:[#allocation8 + $0x8] sm:$0xff]   ;;  %2803 = vst.msk [vmem:[#allocation10] sm:$0xf] %vm2802_vm0, %v2791_v20  ;;  %v5630_v61 = vpop.permute.xlu1 %3588 }
 0x7b4   : > { %v2591_v15 = vpack.c.bf16 %v4554_v14, %v4553_v13 }
 0x7b6   : > { %4396 = vmatmul.mubr.msk.bf16.vlgmr.msra.gmra.mrb[4].mxu0 %vm1465_vm12, %v2591_v15  ;;  %v5624_v58 = vpop.permute.xlu0 %3105  ;;  %vm2827_vm12 = vcmask 519552  }
 0x7ba   : > { %v5628_v59 = vpop.permute.xlu0 %3129 }
 0x889   : > { %v2675_v22 = vpop.f32.mrb[4].mxu0 }
 0x88a   : > { %v2676_v23 = vadd.f32 %v4291_v21, %v2675_v22  ;;  %v4397_v24 = vpop.f32.mrb[5].mxu0 }
 0x88b   : > { %v2678_v25 = vpop.f32.mrb[6].mxu0 }
 0x88c   : > { %v2682_v26 = vmax.f32 %v2676_v23, 0.0  ;;  %v2679_v27 = vadd.f32 %v4291_v21, %v2678_v25  ;;  %v4398_v29 = vpop.f32.mrb[7].mxu0 }
 0x88e   : > { %2692 = vst.msk [vmem:[#allocation9 + $0x9] sm:$0xf] %vm2691_vm14, %v2682_v26  ;;  %v2683_v30 = vmax.f32 %v2679_v27, 0.0  ;;  %2730 = vrot.lane.b32.xlu1 %v2682_v26, %s6241_s22  ;;  %2713 = vrot.lane.b32.xlu0 %v2682_v26, %s6240_s14  ;;  %v2686_v32 = vcombine.high %v2682_v26, %v2682_v26 }
 0x890   : > { %2694 = vst.msk [vmem:[#allocation9 + $0x19] sm:$0xf] %vm2691_vm14, %v2683_v30  ;;  %2693 = vst.msk [vmem:[#allocation9 + $0x11] sm:$0xf] %vm2691_vm14, %v2686_v32  ;;  %v2687_v33 = vcombine.high %v2683_v30, %v2683_v30 }
 0x892   : > { %2696 = vrot.lane.b32.xlu0 %v2682_v26, %s4692_s13  ;;  %2715 = vrot.lane.b32.xlu1 %v2686_v32, %s6240_s14  ;;  %2695 = vst.msk [vmem:[#allocation9 + $0x21] sm:$0xf] %vm2691_vm14, %v2687_v33 }
 0x895   : > { %v2832_v34 = vld [vmem:[#allocation9 + $0x9] sm:$0xf] }
 0x896   : > { %2734 = vrot.lane.b32.xlu1 %v2683_v30, %s6241_s22  ;;  %2717 = vrot.lane.b32.xlu0 %v2683_v30, %s6240_s14  ;;  %v3145_v36 = vld [vmem:[#allocation9 + $0x9] sm:$0xf] }
 0x897   : > { %v2833_v35 = vld [vmem:[#allocation9 + $0x11] sm:$0xf]  ;;  %v3193_v38 = vld [vmem:[#allocation9 + $0xa] sm:$0xf]  ;;  %v3575_v39 = vld [vmem:[#allocation9 + $0x19] sm:$0xf] }
 0x898   : > { %v3146_v37 = vld [vmem:[#allocation9 + $0x11] sm:$0xf]  ;;  %v3428_v49 = vld [vmem:[#allocation9 + $0x9] sm:$0xf]  ;;  %v2834_v40 = vld [vmem:[#allocation9 + $0x19] sm:$0xf] }
 0x899   : > { %v3194_v46 = vld [vmem:[#allocation9 + $0x12] sm:$0xf]  ;;  %v3785_v48 = vld [vmem:[#allocation9 + $0xa] sm:$0xf]  ;;  %v3147_v42 = vld [vmem:[#allocation9 + $0x19] sm:$0xf] }
 0x89a   : > { %2698 = vrot.lane.b32.xlu1 %v2686_v32, %s4692_s13  ;;  %2732 = vrot.lane.b32.xlu0 %v2686_v32, %s6241_s22  ;;  %v3429_v47 = vld [vmem:[#allocation9 + $0x11] sm:$0xf]  ;;  %v2835_v56 = vld [vmem:[#allocation9 + $0x21] sm:$0xf]  ;;  %v3195_v43 = vld [vmem:[#allocation9 + $0x1a] sm:$0xf] }
 0x89b   : > { %v3786_v41 = vld [vmem:[#allocation9 + $0x12] sm:$0xf]  ;;  %v3148_v44 = vld [vmem:[#allocation9 + $0x21] sm:$0xf]  ;;  %v3430_v45 = vld [vmem:[#allocation9 + $0x19] sm:$0xf] }
 0x89c   : > { %v3196_v50 = vld [vmem:[#allocation9 + $0x22] sm:$0xf]  ;;  %v3574_v51 = vld [vmem:[#allocation9 + $0x11] sm:$0xf]  ;;  %v3787_v53 = vld [vmem:[#allocation9 + $0x1a] sm:$0xf] }
 0x89d   : > { %v3431_v52 = vld [vmem:[#allocation9 + $0x21] sm:$0xf] }
 0x89e   : > { %2700 = vrot.lane.b32.xlu0 %v2683_v30, %s4692_s13  ;;  %2702 = vrot.lane.b32.xlu1 %v2687_v33, %s4692_s13  ;;  %v3788_v54 = vld [vmem:[#allocation9 + $0x22] sm:$0xf] }
 0x89f   : > { %v3576_v55 = vld [vmem:[#allocation9 + $0x21] sm:$0xf] }
 0x8a2   : > { %2736 = vrot.lane.b32.xlu0 %v2687_v33, %s6241_s22  ;;  %2719 = vrot.lane.b32.xlu1 %v2687_v33, %s6240_s14 }
 0x8a6   : > { %2840 = vrot.lane.b32.xlu0 %v2832_v34, %s6235_s11  ;;  %2842 = vrot.lane.b32.xlu1 %v2833_v35, %s6235_s11 }
 0x8aa   : > { %3153 = vrot.lane.b32.xlu0 %v3145_v36, %s4687_s28  ;;  %3155 = vrot.lane.b32.xlu1 %v3146_v37, %s4687_s28 }
 0x8ae   : > { %3201 = vrot.lane.b32.xlu0 %v3193_v38, %s6241_s22  ;;  %3203 = vrot.lane.b32.xlu1 %v3194_v46, %s6241_s22 }
 0x8b2   : > { %3436 = vrot.lane.b32.xlu0 %v3428_v49, %s6237_s23  ;;  %3438 = vrot.lane.b32.xlu1 %v3429_v47, %s6237_s23 }
 0x8b6   : > { %3793 = vrot.lane.b32.xlu0 %v3785_v48, %s4685_s25  ;;  %3584 = vrot.lane.b32.xlu1 %v3575_v39, %s4692_s13 }
 0x8ba   : > { %2844 = vrot.lane.b32.xlu0 %v2834_v40, %s6235_s11  ;;  %3795 = vrot.lane.b32.xlu1 %v3786_v41, %s4685_s25 }
 0x8be   : > { %3157 = vrot.lane.b32.xlu0 %v3147_v42, %s4687_s28  ;;  %2846 = vrot.lane.b32.xlu1 %v2835_v56, %s6235_s11 }
 0x8c2   : > { %3205 = vrot.lane.b32.xlu0 %v3195_v43, %s6241_s22  ;;  %3159 = vrot.lane.b32.xlu1 %v3148_v44, %s4687_s28 }
 0x8c6   : > { %3440 = vrot.lane.b32.xlu0 %v3430_v45, %s6237_s23  ;;  %3207 = vrot.lane.b32.xlu1 %v3196_v50, %s6241_s22 }
 0x8ca   : > { %3582 = vrot.lane.b32.xlu0 %v3574_v51, %s4692_s13  ;;  %3442 = vrot.lane.b32.xlu1 %v3431_v52, %s6237_s23 }
 0x8ce   : > { %3797 = vrot.lane.b32.xlu0 %v3787_v53, %s4685_s25  ;;  %3799 = vrot.lane.b32.xlu1 %v3788_v54, %s4685_s25 }
 0x8d2   : > { %3586 = vrot.lane.b32.xlu0 %v3576_v55, %s4692_s13 }
 0x900   : > { %v2731_v60 = vpop.permute.xlu1 %2730  ;;  %v2714_v62 = vpop.permute.xlu0 %2713 }
 0x901   : > { %2743 = vst.msk [vmem:[#allocation9 + $0x99] sm:$0xf] %vm2691_vm14, %v2731_v60  ;;  %2726 = vst.msk [vmem:[#allocation9 + $0x69] sm:$0xf] %vm2691_vm14, %v2714_v62 }
 0x904   : > { %v2697_v63 = vpop.permute.xlu0 %2696  ;;  %v2716_v0 = vpop.permute.xlu1 %2715 }
 0x905   : > { %2709 = vst.msk [vmem:[#allocation9 + $0x39] sm:$0xf] %vm2691_vm14, %v2697_v63  ;;  %2727 = vst.msk [vmem:[#allocation9 + $0x71] sm:$0xf] %vm2691_vm14, %v2716_v0 }
 0x908   : > { %v2932_v1 = vld [vmem:[#allocation9 + $0x99] sm:$0xf]  ;;  %v2735_v2 = vpop.permute.xlu1 %2734  ;;  %v2718_v3 = vpop.permute.xlu0 %2717  ;;  %v2758_v4 = vld [vmem:[#allocation9 + $0x69] sm:$0xf] }
 0x909   : > { %2936 = vst.msk [vmem:[#allocation10 + $0x4] sm:$0xf] %vm2691_vm14, %v2932_v1  ;;  %2745 = vst.msk [vmem:[#allocation9 + $0xa9] sm:$0xf] %vm2691_vm14, %v2735_v2  ;;  %2767 = vrot.lane.b32.xlu1 %v2758_v4, %s6237_s23  ;;  %v2783_v9 = vld [vmem:[#allocation9 + $0x99] sm:$0xf] }
 0x90a   : > { %2728 = vst.msk [vmem:[#allocation9 + $0x79] sm:$0xf] %vm2691_vm14, %v2718_v3  ;;  %v3098_v14 = vld [vmem:[#allocation9 + $0x99] sm:$0xf]  ;;  %v3122_v19 = vld [vmem:[#allocation9 + $0x6a] sm:$0xf] }
 0x90b   : > { %v2882_v18 = vld [vmem:[#allocation9 + $0x98] sm:$0xf]  ;;  %v2907_v20 = vld [vmem:[#allocation9 + $0x69] sm:$0xf] }
 0x90c   : > { %v2699_v5 = vpop.permute.xlu1 %2698  ;;  %v2733_v6 = vpop.permute.xlu0 %2732  ;;  %v2807_v8 = vld [vmem:[#allocation9 + $0x38] sm:$0xf]  ;;  %v3217_v26 = vld [vmem:[#allocation9 + $0x69] sm:$0xf]  ;;  %v2908_v37 = vld [vmem:[#allocation9 + $0x71] sm:$0xf] }
 0x90d   : > { %2710 = vst.msk [vmem:[#allocation9 + $0x41] sm:$0xf] %vm2691_vm14, %v2699_v5  ;;  %2744 = vst.msk [vmem:[#allocation9 + $0xa1] sm:$0xf] %vm2691_vm14, %v2733_v6  ;;  %2815 = vrot.lane.b32.xlu0 %v2807_v8, %s4687_s28  ;;  %2792 = vrot.lane.b32.xlu1 %v2783_v9, %s4685_s25  ;;  %v2857_v13 = vld [vmem:[#allocation9 + $0x39] sm:$0xf] }
 0x90e   : > { %v3169_v23 = vld [vmem:[#allocation9 + $0x39] sm:$0xf]  ;;  %v3500_v38 = vld [vmem:[#allocation9 + $0x69] sm:$0xf]  ;;  %v3218_v56 = vld [vmem:[#allocation9 + $0x71] sm:$0xf] }
 0x90f   : > { %v2749_v25 = vld [vmem:[#allocation9 + $0x98] sm:$0xf]  ;;  %v3809_v42 = vld [vmem:[#allocation9 + $0x69] sm:$0xf]  ;;  %v2759_v55 = vld [vmem:[#allocation9 + $0x71] sm:$0xf] }
 0x910   : > { %v2934_v10 = vld [vmem:[#allocation9 + $0xa9] sm:$0xf]  ;;  %v2701_v11 = vpop.permute.xlu0 %2700  ;;  %v2703_v12 = vpop.permute.xlu1 %2702  ;;  %2753 = vst.msk [vmem:[#allocation10 + $0x8] sm:$0xf] %vm2691_vm14, %v2749_v25  ;;  %v3241_v30 = vld [vmem:[#allocation9 + $0x99] sm:$0xf] }
 0x911   : > { %2938 = vst.msk [vmem:[#allocation10 + $0x14] sm:$0xf] %vm2691_vm14, %v2934_v10  ;;  %2711 = vst.msk [vmem:[#allocation9 + $0x49] sm:$0xf] %vm2691_vm14, %v2701_v11  ;;  %2865 = vrot.lane.b32.xlu0 %v2857_v13, %s6241_s22  ;;  %3107 = vrot.lane.b32.xlu1 %v3098_v14, %s6237_s23  ;;  %v2760_v21 = vld [vmem:[#allocation9 + $0x79] sm:$0xf] }
 0x912   : > { %2712 = vst.msk [vmem:[#allocation9 + $0x51] sm:$0xf] %vm2691_vm14, %v2703_v12  ;;  %v2785_v24 = vld [vmem:[#allocation9 + $0xa9] sm:$0xf]  ;;  %v3452_v33 = vld [vmem:[#allocation9 + $0x39] sm:$0xf] }
 0x913   : > { %v2751_v29 = vld [vmem:[#allocation9 + $0xa8] sm:$0xf]  ;;  %v3476_v36 = vld [vmem:[#allocation9 + $0x98] sm:$0xf]  ;;  %v3501_v0 = vld [vmem:[#allocation9 + $0x71] sm:$0xf] }
 0x914   : > { %v2933_v15 = vld [vmem:[#allocation9 + $0xa1] sm:$0xf]  ;;  %v2737_v16 = vpop.permute.xlu0 %2736  ;;  %v2720_v17 = vpop.permute.xlu1 %2719  ;;  %2755 = vst.msk [vmem:[#allocation10 + $0x18] sm:$0xf] %vm2691_vm14, %v2751_v29  ;;  %v3100_v46 = vld [vmem:[#allocation9 + $0xa9] sm:$0xf] }
 0x915   : > { %2937 = vst.msk [vmem:[#allocation10 + $0xc] sm:$0xf] %vm2691_vm14, %v2933_v15  ;;  %2746 = vst.msk [vmem:[#allocation9 + $0xb1] sm:$0xf] %vm2691_vm14, %v2737_v16  ;;  %2890 = vrot.lane.b32.xlu0 %v2882_v18, %s6240_s14  ;;  %3131 = vrot.lane.b32.xlu1 %v3122_v19, %s4685_s25  ;;  %v2808_v27 = vld [vmem:[#allocation9 + $0x40] sm:$0xf] }
 0x916   : > { %2729 = vst.msk [vmem:[#allocation9 + $0x81] sm:$0xf] %vm2691_vm14, %v2720_v17  ;;  %v2858_v32 = vld [vmem:[#allocation9 + $0x41] sm:$0xf]  ;;  %v3524_v49 = vld [vmem:[#allocation9 + $0x99] sm:$0xf] }
 0x917   : > { %v2883_v34 = vld [vmem:[#allocation9 + $0xa0] sm:$0xf]  ;;  %v3124_v47 = vld [vmem:[#allocation9 + $0x7a] sm:$0xf]  ;;  %v3857_v51 = vld [vmem:[#allocation9 + $0x6a] sm:$0xf] }
 0x918   : > { %v2750_v35 = vld [vmem:[#allocation9 + $0xa0] sm:$0xf]  ;;  %v3761_v48 = vld [vmem:[#allocation9 + $0x39] sm:$0xf]  ;;  %v5674_v40 = vpop.permute.xlu0 %2840  ;;  %v5678_v41 = vpop.permute.xlu1 %2842  ;;  %v2809_v2 = vld [vmem:[#allocation9 + $0x48] sm:$0xf] }
 0x919   : > { %2915 = vrot.lane.b32.xlu0 %v2907_v20, %s4692_s13  ;;  %2771 = vrot.lane.b32.xlu1 %v2760_v21, %s6237_s23  ;;  %2754 = vst.msk [vmem:[#allocation10 + $0x10] sm:$0xf] %vm2691_vm14, %v2750_v35  ;;  %v3170_v39 = vld [vmem:[#allocation9 + $0x41] sm:$0xf]  ;;  %v3833_v44 = vld [vmem:[#allocation9 + $0x99] sm:$0xf] }
 0x91a   : > { %v3242_v45 = vld [vmem:[#allocation9 + $0xa1] sm:$0xf]  ;;  %v2859_v6 = vld [vmem:[#allocation9 + $0x49] sm:$0xf]  ;;  %v4555_v12 = vld [vmem:[%s6210_s8] sm:$0xff]  }
 0x91b   : > { %v3453_v52 = vld [vmem:[#allocation9 + $0x41] sm:$0xf]  ;;  %v3550_v8 = vld [vmem:[#allocation9 + $0x48] sm:$0xf]  ;;  %3042 = vmatpush1.bf16.msra.mxu1 %v4555_v12  ;;  %v4556_v14 = vld [vmem:[%s6210_s8 + $0x8] sm:$0xff]  }
 0x91c   : > { %v2935_v22 = vld [vmem:[#allocation9 + $0xb1] sm:$0xf]  ;;  %v5682_v43 = vpop.permute.xlu0 %3153  ;;  %v5684_v50 = vpop.permute.xlu1 %3155  ;;  %v3477_v60 = vld [vmem:[#allocation9 + $0xa0] sm:$0xf]  ;;  %v2884_v10 = vld [vmem:[#allocation9 + $0xa8] sm:$0xf]  ;;  %3043 = vmatprep.subr.bf16.mxu1 %v4680_v7 }
 0x91d   : > { %2939 = vst.msk [vmem:[#allocation10 + $0x1c] sm:$0xf] %vm2691_vm14, %v2935_v22  ;;  %3177 = vrot.lane.b32.xlu0 %v3169_v23, %s6235_s11  ;;  %2796 = vrot.lane.b32.xlu1 %v2785_v24, %s4685_s25  ;;  %v2784_v63 = vld [vmem:[#allocation9 + $0xa1] sm:$0xf]  ;;  %v2909_v15 = vld [vmem:[#allocation9 + $0x79] sm:$0xf] }
 0x91e   : > { %v3525_v3 = vld [vmem:[#allocation9 + $0xa1] sm:$0xf]  ;;  %v3810_v16 = vld [vmem:[#allocation9 + $0x71] sm:$0xf]  ;;  %v4558_v23 = vld [vmem:[%s6210_s8 + $0x18] sm:$0xff]  }
 0x91f   : > { %v3762_v11 = vld [vmem:[#allocation9 + $0x41] sm:$0xf]  ;;  %3044 = vmatpush1.bf16.msra.mxu1 %v4556_v14  ;;  %v4559_v22 = vld [vmem:[%s6210_s8] sm:$0xff]   ;;  %v3219_v35 = vld [vmem:[#allocation9 + $0x79] sm:$0xf] }
 0x920   : > { %v5688_v53 = vpop.permute.xlu0 %3201  ;;  %v5692_v54 = vpop.permute.xlu1 %3203  ;;  %v4557_v18 = vld [vmem:[%s6210_s8 + $0x10] sm:$0xff]   ;;  %3045 = vmatprep.subr.bf16.mxu1 %v4680_v7  ;;  %3374 = vmatpush1.bf16.msra.mxu0 %v4559_v22  ;;  %v3123_v25 = vld [vmem:[#allocation9 + $0x72] sm:$0xf]  ;;  %v3526_v14 = vld [vmem:[#allocation9 + $0xa9] sm:$0xf] }
 0x921   : > { %3225 = vrot.lane.b32.xlu0 %v3217_v26, %s6240_s14  ;;  %2817 = vrot.lane.b32.xlu1 %v2808_v27, %s4687_s28  ;;  %v3099_v20 = vld [vmem:[#allocation9 + $0xa1] sm:$0xf]  ;;  %v3858_v26 = vld [vmem:[#allocation9 + $0x72] sm:$0xf] }
 0x922   : > { %v3834_v21 = vld [vmem:[#allocation9 + $0xa1] sm:$0xf]  ;;  %3375 = vmatprep.subr.bf16.mxu0 %v4680_v7  ;;  %v4560_v29 = vld [vmem:[%s6210_s8 + $0x20] sm:$0xff]  }
 0x923   : > { %3046 = vmatpush1.bf16.msra.mxu1 %v4557_v18  ;;  %v3455_v22 = vld [vmem:[#allocation9 + $0x51] sm:$0xf] }
 0x924   : > { %v5696_v62 = vpop.permute.xlu0 %3436  ;;  %v5698_v1 = vpop.permute.xlu1 %3438  ;;  %3047 = vmatprep.subr.bf16.mxu1 %v4680_v7 }
 0x925   : > { %3249 = vrot.lane.b32.xlu0 %v3241_v30, %s4692_s13  ;;  %2867 = vrot.lane.b32.xlu1 %v2858_v32, %s6241_s22  ;;  %v3171_v30 = vld [vmem:[#allocation9 + $0x49] sm:$0xf]  ;;  %v2810_v32 = vld [vmem:[#allocation9 + $0x50] sm:$0xf] }
 0x927   : > { %3048 = vmatpush1.bf16.msra.mxu1 %v4558_v23 }
 0x928   : > { %v5702_v4 = vpop.permute.xlu0 %3793  ;;  %v5706_v5 = vpop.permute.xlu1 %3584  ;;  %3049 = vmatprep.subr.bf16.mxu1 %v4680_v7 }
 0x929   : > { %3460 = vrot.lane.b32.xlu0 %v3452_v33, %s4685_s25  ;;  %2892 = vrot.lane.b32.xlu1 %v2883_v34, %s6240_s14 }
 0x92b   : > { %3050 = vmatpush1.bf16.msra.mxu1 %v4560_v29  ;;  %v3479_v29 = vld [vmem:[#allocation9 + $0xb0] sm:$0xf] }
 0x92c   : > { %v5710_v9 = vpop.permute.xlu0 %2844  ;;  %v5715_v13 = vpop.permute.xlu1 %3795  ;;  %3051 = vmatprep.subr.bf16.mxu1 %v4680_v7 }
 0x92d   : > { %3484 = vrot.lane.b32.xlu0 %v3476_v36, %s4687_s28  ;;  %2917 = vrot.lane.b32.xlu1 %v2908_v37, %s4692_s13  ;;  %v2860_v36 = vld [vmem:[#allocation9 + $0x51] sm:$0xf]  ;;  %v4561_v37 = vld [vmem:[%s6210_s8 + $0x8] sm:$0xff]  }
 0x92e   : > { %3376 = vmatpush1.bf16.msra.mxu0 %v4561_v37  ;;  %v3503_v37 = vld [vmem:[#allocation9 + $0x81] sm:$0xf] }
 0x92f   : > { %3377 = vmatprep.subr.bf16.mxu0 %v4680_v7 }
 0x930   : > { %v5723_v17 = vpop.permute.xlu0 %3157  ;;  %v5730_v19 = vpop.permute.xlu1 %2846 }
 0x931   : > { %3508 = vrot.lane.b32.xlu0 %v3500_v38, %s6235_s11  ;;  %3111 = vrot.lane.b32.xlu1 %v3100_v46, %s6237_s23  ;;  %v4562_v38 = vld [vmem:[%s6210_s8 + $0x28] sm:$0xff]  }
 0x932   : > { %3052 = vmatpush1.bf16.msra.mxu1 %v4562_v38  ;;  %v4575_v38 = vld [vmem:[%s6210_s8 + $0x40] sm:$0xff]  }
 0x933   : > { %3053 = vmatprep.subr.bf16.mxu1 %v4680_v7 }
 0x934   : > { %v5741_v24 = vpop.permute.xlu0 %3205  ;;  %v5745_v27 = vpop.permute.xlu1 %3159 }
 0x935   : > { %3532 = vrot.lane.b32.xlu0 %v3524_v49, %s6241_s22  ;;  %3135 = vrot.lane.b32.xlu1 %v3124_v47, %s4685_s25  ;;  %v3243_v49 = vld [vmem:[#allocation9 + $0xa9] sm:$0xf]  ;;  %v2885_v47 = vld [vmem:[#allocation9 + $0xb0] sm:$0xf] }
 0x938   : > { %v5753_v33 = vpop.permute.xlu0 %3440  ;;  %v5757_v34 = vpop.permute.xlu1 %3207 }
 0x939   : > { %3769 = vrot.lane.b32.xlu0 %v3761_v48, %s6237_s23  ;;  %3179 = vrot.lane.b32.xlu1 %v3170_v39, %s6235_s11  ;;  %v4563_v39 = vld [vmem:[%s6210_s8 + $0x10] sm:$0xff]  }
 0x93a   : > { %3378 = vmatpush1.bf16.msra.mxu0 %v4563_v39  ;;  %v3835_v39 = vld [vmem:[#allocation9 + $0xa9] sm:$0xf] }
 0x93b   : > { %3379 = vmatprep.subr.bf16.mxu0 %v4680_v7 }
 0x93c   : > { %v5768_v46 = vpop.permute.xlu0 %3582  ;;  %v5772_v48 = vpop.permute.xlu1 %3442 }
 0x93d   : > { %3817 = vrot.lane.b32.xlu0 %v3809_v42, %s4687_s28  ;;  %3227 = vrot.lane.b32.xlu1 %v3218_v56, %s6240_s14  ;;  %v4564_v42 = vld [vmem:[%s6210_s8 + $0x30] sm:$0xff]   ;;  %v3454_v56 = vld [vmem:[#allocation9 + $0x49] sm:$0xf] }
 0x93e   : > { %3054 = vmatpush1.bf16.msra.mxu1 %v4564_v42  ;;  %v3527_v42 = vld [vmem:[#allocation9 + $0xb1] sm:$0xf] }
 0x93f   : > { %3055 = vmatprep.subr.bf16.mxu1 %v4680_v7 }
 0x941   : > { %3841 = vrot.lane.b32.xlu0 %v3833_v44, %s6235_s11  ;;  %3251 = vrot.lane.b32.xlu1 %v3242_v45, %s4692_s13  ;;  %v2910_v44 = vld [vmem:[#allocation9 + $0x81] sm:$0xf]  ;;  %v5782_v45 = vpop.permute.xlu0 %3797 }
 0x945   : > { %3865 = vrot.lane.b32.xlu0 %v3857_v51, %s6241_s22  ;;  %3462 = vrot.lane.b32.xlu1 %v3453_v52, %s4685_s25  ;;  %v4565_v51 = vld [vmem:[%s6210_s8 + $0x18] sm:$0xff]  }
 0x946   : > { %v4566_v52 = vld [vmem:[%s6210_s8 + $0x38] sm:$0xff]   ;;  %3380 = vmatpush1.bf16.msra.mxu0 %v4565_v51 }
 0x947   : > { %3056 = vmatpush1.bf16.msra.mxu1 %v4566_v52  ;;  %3381 = vmatprep.subr.bf16.mxu0 %v4680_v7 }
 0x948   : > { %3057 = vmatprep.subr.bf16.mxu1 %v4680_v7 }
 0x949   : > { %2769 = vrot.lane.b32.xlu0 %v2759_v55, %s6237_s23  ;;  %3486 = vrot.lane.b32.xlu1 %v3477_v60, %s4687_s28  ;;  %v5792_v55 = vpop.permute.xlu1 %3799  ;;  %v3478_v60 = vld [vmem:[#allocation9 + $0xa8] sm:$0xf] }
 0x94d   : > { %2794 = vrot.lane.b32.xlu0 %v2784_v63, %s4685_s25  ;;  %3510 = vrot.lane.b32.xlu1 %v3501_v0, %s6235_s11  ;;  %v3172_v63 = vld [vmem:[#allocation9 + $0x51] sm:$0xf] }
 0x94e   : > { %v4567_v0 = vld [vmem:[%s6210_s8 + $0x20] sm:$0xff]  }
 0x94f   : > { %3382 = vmatpush1.bf16.msra.mxu0 %v4567_v0  ;;  %v3882_v0 = vld [vmem:[#allocation9 + $0x19] sm:$0xf] }
 0x950   : > { %3383 = vmatprep.subr.bf16.mxu0 %v4680_v7 }
 0x951   : > { %2819 = vrot.lane.b32.xlu0 %v2809_v2, %s4687_s28  ;;  %3534 = vrot.lane.b32.xlu1 %v3525_v3, %s6241_s22  ;;  %v4568_v2 = vld [vmem:[%s6210_s8 + $0x40] sm:$0xff]   ;;  %v5804_v3 = vpop.permute.xlu0 %3586 }
 0x952   : > { %3058 = vmatpush1.bf16.msra.mxu1 %v4568_v2  ;;  %v3884_v2 = vld [vmem:[#allocation9 + $0x29] sm:$0xf] }
 0x953   : > { %3706 = vmatprep.subr.bf16.mxu1 %v4680_v7 }
 0x955   : > { %2869 = vrot.lane.b32.xlu0 %v2859_v6, %s6241_s22  ;;  %3559 = vrot.lane.b32.xlu1 %v3550_v8, %s6240_s14  ;;  %v3502_v8 = vld [vmem:[#allocation9 + $0x79] sm:$0xf] }
 0x959   : > { %2894 = vrot.lane.b32.xlu0 %v2884_v10, %s6240_s14  ;;  %3771 = vrot.lane.b32.xlu1 %v3762_v11, %s6237_s23  ;;  %v3220_v10 = vld [vmem:[#allocation9 + $0x81] sm:$0xf] }
 0x95d   : > { %2919 = vrot.lane.b32.xlu0 %v2909_v15, %s4692_s13  ;;  %3819 = vrot.lane.b32.xlu1 %v3810_v16, %s4687_s28  ;;  %v3244_v15 = vld [vmem:[#allocation9 + $0xb1] sm:$0xf]  ;;  %v4569_v16 = vld [vmem:[%s6210_s8 + $0x28] sm:$0xff]  }
 0x95e   : > { %3384 = vmatpush1.bf16.msra.mxu0 %v4569_v16  ;;  %v3420_v16 = vld [vmem:[#allocation9 + $0x38] sm:$0xf] }
 0x95f   : > { %3385 = vmatprep.subr.bf16.mxu0 %v4680_v7 }
 0x961   : > { %3109 = vrot.lane.b32.xlu0 %v3099_v20, %s6237_s23  ;;  %3843 = vrot.lane.b32.xlu1 %v3834_v21, %s6235_s11  ;;  %v3549_v21 = vld [vmem:[#allocation9 + $0x40] sm:$0xf] }
 0x965   : > { %3133 = vrot.lane.b32.xlu0 %v3123_v25, %s4685_s25  ;;  %3867 = vrot.lane.b32.xlu1 %v3858_v26, %s6241_s22  ;;  %v3763_v26 = vld [vmem:[#allocation9 + $0x49] sm:$0xf] }
 0x969   : > { %3181 = vrot.lane.b32.xlu0 %v3171_v30, %s6235_s11  ;;  %2821 = vrot.lane.b32.xlu1 %v2810_v32, %s4687_s28  ;;  %v4573_v30 = vld [vmem:[%s6210_s8 + $0x38] sm:$0xff]  }
 0x96d   : > { %3229 = vrot.lane.b32.xlu0 %v3219_v35, %s6240_s14  ;;  %2871 = vrot.lane.b32.xlu1 %v2860_v36, %s6241_s22  ;;  %v3811_v36 = vld [vmem:[#allocation9 + $0x79] sm:$0xf] }
 0x971   : > { %3253 = vrot.lane.b32.xlu0 %v3243_v49, %s4692_s13  ;;  %2896 = vrot.lane.b32.xlu1 %v2885_v47, %s6240_s14 }
 0x975   : > { %3464 = vrot.lane.b32.xlu0 %v3454_v56, %s4685_s25  ;;  %2921 = vrot.lane.b32.xlu1 %v2910_v44, %s4692_s13  ;;  %v3089_v56 = vld [vmem:[#allocation9 + $0x61] sm:$0xf]  ;;  %v3265_v44 = vld [vmem:[#allocation9 + $0x6a] sm:$0xf] }
 0x979   : > { %3488 = vrot.lane.b32.xlu0 %v3478_v60, %s4687_s28  ;;  %3183 = vrot.lane.b32.xlu1 %v3172_v63, %s6235_s11  ;;  %v3859_v63 = vld [vmem:[#allocation9 + $0x7a] sm:$0xf] }
 0x97b   : > { %v2768_v6 = vpop.permute.xlu1 %2767 }
 0x97c   : > { %2779 = vst.msk [vmem:[#allocation10 + $0x8] sm:$0xf] %vm2777_vm15, %v2768_v6 }
 0x97d   : > { %3512 = vrot.lane.b32.xlu0 %v3502_v8, %s6235_s11  ;;  %3231 = vrot.lane.b32.xlu1 %v3220_v10, %s6240_s14  ;;  %v3906_v10 = vld [vmem:[#allocation9 + $0x49] sm:$0xf] }
 0x97f   : > { %v2816_v11 = vpop.permute.xlu0 %2815  ;;  %v2793_v12 = vpop.permute.xlu1 %2792 }
 0x980   : > { %2828 = vst.msk [vmem:[#allocation10] sm:$0xf] %vm2827_vm12, %v2816_v11 }
 0x981   : > { %2804 = vst.msk [vmem:[#allocation10 + $0x8] sm:$0xf] %vm2802_vm0, %v2793_v12  ;;  %3536 = vrot.lane.b32.xlu0 %v3526_v14, %s6241_s22  ;;  %3255 = vrot.lane.b32.xlu1 %v3244_v15, %s4692_s13  ;;  %v3883_v12 = vld [vmem:[#allocation9 + $0x21] sm:$0xf]  ;;  %v3764_v14 = vld [vmem:[#allocation9 + $0x51] sm:$0xf] }
 0x982   : > { %2853 = vst.msk [vmem:[#allocation10] sm:$0xf] %vm2852_vm1, %v5674_v40  ;;  %v4571_v40 = vld [vmem:[%s6210_s8 + $0x30] sm:$0xff]  }
 0x983   : > { %v2866_v18 = vpop.permute.xlu0 %2865  ;;  %v5822_v20 = vpop.permute.xlu1 %3107  ;;  %3386 = vmatpush1.bf16.msra.mxu0 %v4571_v40  ;;  %v3598_v15 = vld [vmem:[#allocation9 + $0x41] sm:$0xf] }
 0x984   : > { %2878 = vst.msk [vmem:[#allocation10] sm:$0xf] %vm2877_vm2, %v2866_v18  ;;  %3387 = vmatprep.subr.bf16.mxu0 %v4680_v7  ;;  %v3905_v40 = vld [vmem:[#allocation9 + $0x41] sm:$0xf] }
 0x985   : > { %3557 = vrot.lane.b32.xlu0 %v3549_v21, %s6240_s14  ;;  %3466 = vrot.lane.b32.xlu1 %v3455_v22, %s4685_s25 }
 0x987   : > { %v2891_v23 = vpop.permute.xlu0 %2890  ;;  %v5831_v25 = vpop.permute.xlu1 %3131  ;;  %3388 = vmatpush1.bf16.msra.mxu0 %v4573_v30 }
 0x988   : > { %2903 = vst.msk [vmem:[#allocation10] sm:$0xf] %vm2902_vm3, %v2891_v23  ;;  %3389 = vmatprep.subr.bf16.mxu0 %v4680_v7  ;;  %v3812_v23 = vld [vmem:[#allocation9 + $0x81] sm:$0xf] }
 0x989   : > { %3773 = vrot.lane.b32.xlu0 %v3763_v26, %s6237_s23  ;;  %3490 = vrot.lane.b32.xlu1 %v3479_v29, %s4687_s28  ;;  %v3266_v26 = vld [vmem:[#allocation9 + $0x72] sm:$0xf]  ;;  %v3090_v29 = vld [vmem:[#allocation9 + $0x69] sm:$0xf] }
 0x98b   : > { %v2916_v32 = vpop.permute.xlu0 %2915  ;;  %v2772_v35 = vpop.permute.xlu1 %2771  ;;  %3390 = vmatpush1.bf16.msra.mxu0 %v4575_v38 }
 0x98c   : > { %2928 = vst.msk [vmem:[#allocation10] sm:$0xf] %vm2927_vm4, %v2916_v32  ;;  %4037 = vmatprep.subr.bf16.mxu0 %v4680_v7 }
 0x98d   : > { %2781 = vst.msk [vmem:[#allocation10 + $0x18] sm:$0xf] %vm2777_vm15, %v2772_v35  ;;  %3821 = vrot.lane.b32.xlu0 %v3811_v36, %s4687_s28  ;;  %3514 = vrot.lane.b32.xlu1 %v3503_v37, %s6235_s11  ;;  %v3836_v36 = vld [vmem:[#allocation9 + $0xb1] sm:$0xf] }
 0x98f   : > { %v3178_v49 = vpop.permute.xlu0 %3177  ;;  %v2797_v47 = vpop.permute.xlu1 %2796 }
 0x990   : > { %2806 = vst.msk [vmem:[#allocation10 + $0x18] sm:$0xf] %vm2802_vm0, %v2797_v47 }
 0x991   : > { %3845 = vrot.lane.b32.xlu0 %v3835_v39, %s6235_s11  ;;  %3538 = vrot.lane.b32.xlu1 %v3527_v42, %s6241_s22  ;;  %v3599_v42 = vld [vmem:[#allocation9 + $0x49] sm:$0xf] }
 0x993   : > { %v5852_v51 = vld [vmem:[#allocation10] sm:$0xff]  ;;  %v3226_v52 = vpop.permute.xlu0 %3225  ;;  %v2818_v60 = vpop.permute.xlu1 %2817 }
 0x994   : > { %3093 = vst.msk [vmem:[#allocation10] sm:$0xf] %vm2691_vm14, %v3089_v56  ;;  %3269 = vst.msk [vmem:[#allocation10 + $0x4] sm:$0xf] %vm2691_vm14, %v3265_v44  ;;  %v3421_v56 = vld [vmem:[#allocation9 + $0x40] sm:$0xf] }
 0x995   : > { %2829 = vst.msk [vmem:[#allocation10 + $0x8] sm:$0xf] %vm2827_vm12, %v2818_v60  ;;  %3869 = vrot.lane.b32.xlu0 %v3859_v63, %s6241_s22  ;;  %3891 = vrot.lane.b32.xlu1 %v3882_v0, %s6240_s14 }
 0x996   : > { %3117 = vst.msk [vmem:[#allocation10] sm:$0xf] %vm2777_vm15, %v5624_v58  ;;  %v3551_v58 = vld [vmem:[#allocation9 + $0x50] sm:$0xf] }
 0x997   : > { %2854 = vst.msk [vmem:[#allocation10 + $0x8] sm:$0xf] %vm2852_vm1, %v5678_v41  ;;  %v3250_v6 = vpop.permute.xlu0 %3249  ;;  %v2868_v8 = vpop.permute.xlu1 %2867 }
 0x998   : > { %3141 = vst.msk [vmem:[#allocation10] sm:$0xf] %vm2802_vm0, %v5628_v59 }
 0x999   : > { %3165 = vst.msk [vmem:[#allocation10] sm:$0xf] %vm2827_vm12, %v5682_v43  ;;  %3561 = vrot.lane.b32.xlu0 %v3551_v58, %s6240_s14  ;;  %3895 = vrot.lane.b32.xlu1 %v3884_v2, %s6240_s14  ;;  %v3881_v43 = vld [vmem:[#allocation9 + $0x11] sm:$0xf] }
 0x99a   : > { %3189 = vst.msk [vmem:[#allocation10] sm:$0xf] %vm2852_vm1, %v3178_v49  ;;  %v3860_v49 = vld [vmem:[#allocation9 + $0x82] sm:$0xf] }
 0x99b   : > { %2879 = vst.msk [vmem:[#allocation10 + $0x8] sm:$0xf] %vm2877_vm2, %v2868_v8  ;;  %3213 = vst.msk [vmem:[#allocation10] sm:$0xf] %vm2877_vm2, %v5688_v53  ;;  %v3461_v59 = vpop.permute.xlu0 %3460  ;;  %v2893_v41 = vpop.permute.xlu1 %2892 }
 0x99c   : > { %3237 = vst.msk [vmem:[#allocation10] sm:$0xf] %vm2902_vm3, %v3226_v52  ;;  %2904 = vst.msk [vmem:[#allocation10 + $0x8] sm:$0xf] %vm2902_vm3, %v2893_v41 }
 0x99d   : > { %3261 = vst.msk [vmem:[#allocation10] sm:$0xf] %vm2927_vm4, %v3250_v6  ;;  %3889 = vrot.lane.b32.xlu0 %v3881_v43, %s6240_s14  ;;  %3915 = vrot.lane.b32.xlu1 %v3906_v10, %s4692_s13  ;;  %v3930_v43 = vld [vmem:[#allocation9 + $0x1a] sm:$0xf] }
 0x99f   : > { %v3485_v11 = vpop.permute.xlu0 %3484  ;;  %v2918_v53 = vpop.permute.xlu1 %2917 }
 0x9a0   : > { %2929 = vst.msk [vmem:[#allocation10 + $0x8] sm:$0xf] %vm2927_vm4, %v2918_v53  ;;  %v3267_v53 = vld [vmem:[#allocation9 + $0x7a] sm:$0xf] }
 0x9a1   : > { %3893 = vrot.lane.b32.xlu0 %v3883_v12, %s6240_s14  ;;  %3775 = vrot.lane.b32.xlu1 %v3764_v14, %s6237_s23  ;;  %v3091_v12 = vld [vmem:[#allocation9 + $0x71] sm:$0xf] }
 0x9a3   : > { %v3509_v21 = vpop.permute.xlu0 %3508  ;;  %v5885_v22 = vpop.permute.xlu1 %3111 }
 0x9a4   : > { %v5881_v18 = vld [vmem:[#allocation10] sm:$0xff] }
 0x9a5   : > { %3424 = vst.msk [vmem:[#allocation10] sm:$0xf] %vm2691_vm14, %v3420_v16  ;;  %3602 = vst.msk [vmem:[#allocation10 + $0x4] sm:$0xf] %vm2691_vm14, %v3598_v15  ;;  %3913 = vrot.lane.b32.xlu0 %v3905_v40, %s4692_s13  ;;  %3823 = vrot.lane.b32.xlu1 %v3812_v23, %s4687_s28 }
 0x9a6   : > { %3448 = vst.msk [vmem:[#allocation10] sm:$0xf] %vm2777_vm15, %v5696_v62  ;;  %v3907_v62 = vld [vmem:[#allocation9 + $0x51] sm:$0xf] }
 0x9a7   : > { %3472 = vst.msk [vmem:[#allocation10] sm:$0xf] %vm2802_vm0, %v3461_v59  ;;  %v5893_v30 = vld [vmem:[#allocation10 + $0x8] sm:$0xff]  ;;  %v3533_v32 = vpop.permute.xlu0 %3532  ;;  %v5896_v35 = vpop.permute.xlu1 %3135 }
 0x9a8   : > { %3496 = vst.msk [vmem:[#allocation10] sm:$0xf] %vm2827_vm12, %v3485_v11  ;;  %v3754_v11 = vld [vmem:[#allocation9 + $0x11] sm:$0xf] }
 0x9a9   : > { %3520 = vst.msk [vmem:[#allocation10] sm:$0xf] %vm2852_vm1, %v3509_v21  ;;  %3917 = vrot.lane.b32.xlu0 %v3907_v62, %s4692_s13  ;;  %3847 = vrot.lane.b32.xlu1 %v3836_v36, %s6235_s11  ;;  %v3422_v62 = vld [vmem:[#allocation9 + $0x48] sm:$0xf] }
 0x9aa   : > { %3094 = vst.msk [vmem:[#allocation10 + $0x8] sm:$0xf] %vm2691_vm14, %v3090_v29  ;;  %3270 = vst.msk [vmem:[#allocation10 + $0xc] sm:$0xf] %vm2691_vm14, %v3266_v26 }
 0x9ab   : > { %3544 = vst.msk [vmem:[#allocation10] sm:$0xf] %vm2877_vm2, %v3533_v32  ;;  %v5909_v37 = vpop.permute.xlu0 %3769  ;;  %v3180_v38 = vpop.permute.xlu1 %3179 }
 0x9ac   : > { %3118 = vst.msk [vmem:[#allocation10 + $0x8] sm:$0xf] %vm2777_vm15, %v5822_v20  ;;  %v3908_v20 = vld [vmem:[#allocation9 + $0x59] sm:$0xf] }
 0x9ad   : > { %3142 = vst.msk [vmem:[#allocation10 + $0x8] sm:$0xf] %vm2802_vm0, %v5831_v25  ;;  %1576 = vrot.lane.b32.xlu0 %v5236_v28, %s6234_s30  ;;  %3871 = vrot.lane.b32.xlu1 %v3860_v49, %s6241_s22  ;;  %v3268_v49 = vld [vmem:[#allocation9 + $0x82] sm:$0xf] }
 0x9ae   : > { %3166 = vst.msk [vmem:[#allocation10 + $0x8] sm:$0xf] %vm2827_vm12, %v5684_v50 }
 0x9af   : > { %3190 = vst.msk [vmem:[#allocation10 + $0x8] sm:$0xf] %vm2852_vm1, %v3180_v38  ;;  %v5917_v47 = vpop.permute.xlu0 %3817  ;;  %v3228_v25 = vpop.permute.xlu1 %3227 }
 0x9b0   : > { %3214 = vst.msk [vmem:[#allocation10 + $0x8] sm:$0xf] %vm2877_vm2, %v5692_v54 }
 0x9b1   : > { %3238 = vst.msk [vmem:[#allocation10 + $0x8] sm:$0xf] %vm2902_vm3, %v3228_v25  ;;  %3919 = vrot.lane.b32.xlu1 %v3908_v20, %s4692_s13  ;;  %v3092_v20 = vld [vmem:[#allocation9 + $0x79] sm:$0xf] }
 0x9b3   : > { %v5921_v50 = vpop.permute.xlu0 %3841  ;;  %v3252_v39 = vpop.permute.xlu1 %3251 }
 0x9b4   : > { %3262 = vst.msk [vmem:[#allocation10 + $0x8] sm:$0xf] %vm2927_vm4, %v3252_v39 }
 0x9b5   : > { %1578 = vrot.lane.b32.xlu1 %v5240_v31, %s6234_s30 }
 0x9b7   : > { %v5926_v54 = vpop.permute.xlu0 %3865  ;;  %v3463_v28 = vpop.permute.xlu1 %3462 }
 0x9bb   : > { %v5928_v44 = vld [vmem:[#allocation10 + $0x8] sm:$0xff]  ;;  %v2770_v52 = vpop.permute.xlu0 %2769  ;;  %v3487_v60 = vpop.permute.xlu1 %3486 }
 0x9bc   : > { %3425 = vst.msk [vmem:[#allocation10 + $0x8] sm:$0xf] %vm2691_vm14, %v3421_v56  ;;  %3603 = vst.msk [vmem:[#allocation10 + $0xc] sm:$0xf] %vm2691_vm14, %v3599_v42  ;;  %v2949_v42 = vcombine.high %v5852_v51, %v5893_v30 }
 0x9bd   : > { %2780 = vst.msk [vmem:[#allocation10 + $0x10] sm:$0xf] %vm2777_vm15, %v2770_v52  ;;  %3449 = vst.msk [vmem:[#allocation10 + $0x8] sm:$0xf] %vm2777_vm15, %v5698_v1 }
 0x9be   : > { %3473 = vst.msk [vmem:[#allocation10 + $0x8] sm:$0xf] %vm2802_vm0, %v3463_v28 }
 0x9bf   : > { %3497 = vst.msk [vmem:[#allocation10 + $0x8] sm:$0xf] %vm2827_vm12, %v3487_v60  ;;  %v2795_v31 = vpop.permute.xlu0 %2794  ;;  %v3511_v63 = vpop.permute.xlu1 %3510 }
 0x9c0   : > { %2805 = vst.msk [vmem:[#allocation10 + $0x10] sm:$0xf] %vm2802_vm0, %v2795_v31 }
 0x9c1   : > { %3521 = vst.msk [vmem:[#allocation10 + $0x8] sm:$0xf] %vm2852_vm1, %v3511_v63  ;;  %v4570_v63 = vld [vmem:[%s6210_s8] sm:$0xff]  }
 0x9c3   : > { %v2820_v0 = vpop.permute.xlu0 %2819  ;;  %v3535_v2 = vpop.permute.xlu1 %3534 }
 0x9c4   : > { %2830 = vst.msk [vmem:[#allocation10 + $0x10] sm:$0xf] %vm2827_vm12, %v2820_v0 }
 0x9c5   : > { %3545 = vst.msk [vmem:[#allocation10 + $0x8] sm:$0xf] %vm2877_vm2, %v3535_v2 }
 0x9c6   : > { %2855 = vst.msk [vmem:[#allocation10 + $0x10] sm:$0xf] %vm2852_vm1, %v5710_v9 }
 0x9c7   : > { %v2870_v1 = vpop.permute.xlu0 %2869  ;;  %v3560_v6 = vpop.permute.xlu1 %3559 }
 0x9c8   : > { %2880 = vst.msk [vmem:[#allocation10 + $0x10] sm:$0xf] %vm2877_vm2, %v2870_v1  ;;  %v3601_v1 = vld [vmem:[#allocation9 + $0x59] sm:$0xf] }
 0x9c9   : > { %3570 = vst.msk [vmem:[#allocation10 + $0x8] sm:$0xf] %vm2902_vm3, %v3560_v6  ;;  %v3423_v6 = vld [vmem:[#allocation9 + $0x50] sm:$0xf] }
 0x9ca   : > { %3595 = vst.msk [vmem:[#allocation10 + $0x8] sm:$0xf] %vm2927_vm4, %v5706_v5 }
 0x9cb   : > { %v2895_v8 = vpop.permute.xlu0 %2894  ;;  %v3772_v58 = vpop.permute.xlu1 %3771 }
 0x9cc   : > { %2905 = vst.msk [vmem:[#allocation10 + $0x10] sm:$0xf] %vm2902_vm3, %v2895_v8 }
 0x9cf   : > { %v2920_v59 = vpop.permute.xlu0 %2919  ;;  %v3820_v41 = vpop.permute.xlu1 %3819 }
 0x9d0   : > { %2930 = vst.msk [vmem:[#allocation10 + $0x10] sm:$0xf] %vm2927_vm4, %v2920_v59 }
 0x9d1   : > { %v5948_v10 = vld [vmem:[#allocation10 + $0x8] sm:$0xff] }
 0x9d2   : > { %3758 = vst.msk [vmem:[#allocation10 + $0x8] sm:$0xf] %vm2691_vm14, %v3754_v11  ;;  %3934 = vst.msk [vmem:[#allocation10 + $0xc] sm:$0xf] %vm2691_vm14, %v3930_v43  ;;  %v3281_v11 = vcombine.low %v5881_v18, %v5928_v44 }
 0x9d3   : > { %3782 = vst.msk [vmem:[#allocation10 + $0x8] sm:$0xf] %vm2777_vm15, %v3772_v58  ;;  %v3110_v5 = vpop.permute.xlu0 %3109  ;;  %v3844_v9 = vpop.permute.xlu1 %3843  ;;  %v4576_v58 = vld [vmem:[%s6210_s8 + $0x18] sm:$0xff]  }
 0x9d4   : > { %3806 = vst.msk [vmem:[#allocation10 + $0x8] sm:$0xf] %vm2802_vm0, %v5715_v13 }
 0x9d5   : > { %3830 = vst.msk [vmem:[#allocation10 + $0x8] sm:$0xf] %vm2827_vm12, %v3820_v41  ;;  %v3282_v41 = vcombine.high %v5881_v18, %v5928_v44  ;;  %v4579_v18 = vld [vmem:[%s6210_s8] sm:$0xff]  }
 0x9d6   : > { %3854 = vst.msk [vmem:[#allocation10 + $0x8] sm:$0xf] %vm2852_vm1, %v3844_v9  ;;  %v3929_v9 = vld [vmem:[#allocation9 + $0x12] sm:$0xf] }
 0x9d7   : > { %v2942_v14 = vld [vmem:[#allocation10 + $0x10] sm:$0xff]  ;;  %v3134_v15 = vpop.permute.xlu0 %3133  ;;  %v3868_v16 = vpop.permute.xlu1 %3867 }
 0x9d8   : > { %3095 = vst.msk [vmem:[#allocation10 + $0x10] sm:$0xf] %vm2691_vm14, %v3091_v12  ;;  %3271 = vst.msk [vmem:[#allocation10 + $0x14] sm:$0xf] %vm2691_vm14, %v3267_v53  ;;  %v3753_v53 = vld [vmem:[#allocation9 + $0x9] sm:$0xf] }
 0x9d9   : > { %3878 = vst.msk [vmem:[#allocation10 + $0x8] sm:$0xf] %vm2877_vm2, %v3868_v16 }
 0x9da   : > { %3119 = vst.msk [vmem:[#allocation10 + $0x10] sm:$0xf] %vm2777_vm15, %v3110_v5 }
 0x9db   : > { %3143 = vst.msk [vmem:[#allocation10 + $0x10] sm:$0xf] %vm2802_vm0, %v3134_v15  ;;  %v3182_v13 = vpop.permute.xlu0 %3181  ;;  %v2822_v21 = vpop.permute.xlu1 %2821 }
 0x9dc   : > { %3167 = vst.msk [vmem:[#allocation10 + $0x10] sm:$0xf] %vm2827_vm12, %v5723_v17  ;;  %2831 = vst.msk [vmem:[#allocation10 + $0x18] sm:$0xf] %vm2827_vm12, %v2822_v21  ;;  %v3932_v21 = vld [vmem:[#allocation9 + $0x2a] sm:$0xf] }
 0x9dd   : > { %3191 = vst.msk [vmem:[#allocation10 + $0x10] sm:$0xf] %vm2852_vm1, %v3182_v13  ;;  %2856 = vst.msk [vmem:[#allocation10 + $0x18] sm:$0xf] %vm2852_vm1, %v5730_v19 }
 0x9de   : > { %3215 = vst.msk [vmem:[#allocation10 + $0x10] sm:$0xf] %vm2877_vm2, %v5741_v24  ;;  %v3600_v24 = vld [vmem:[#allocation9 + $0x51] sm:$0xf] }
 0x9df   : > { %v3230_v40 = vpop.permute.xlu0 %3229  ;;  %v2872_v23 = vpop.permute.xlu1 %2871 }
 0x9e0   : > { %3239 = vst.msk [vmem:[#allocation10 + $0x10] sm:$0xf] %vm2902_vm3, %v3230_v40 }
 0x9e1   : > { %2881 = vst.msk [vmem:[#allocation10 + $0x18] sm:$0xf] %vm2877_vm2, %v2872_v23  ;;  %v3756_v23 = vld [vmem:[#allocation9 + $0x21] sm:$0xf] }
 0x9e3   : > { %v3254_v26 = vpop.permute.xlu0 %3253  ;;  %v2897_v17 = vpop.permute.xlu1 %2896 }
 0x9e4   : > { %3263 = vst.msk [vmem:[#allocation10 + $0x10] sm:$0xf] %vm2927_vm4, %v3254_v26  ;;  %v4585_v26 = vld [vmem:[%s6210_s8 + $0x18] sm:$0xff]  }
 0x9e5   : > { %2906 = vst.msk [vmem:[#allocation10 + $0x18] sm:$0xf] %vm2902_vm3, %v2897_v17  ;;  %v4582_v17 = vld [vmem:[%s6210_s8 + $0x38] sm:$0xff]  }
 0x9e7   : > { %v3465_v29 = vpop.permute.xlu0 %3464  ;;  %v2922_v32 = vpop.permute.xlu1 %2921 }
 0x9e8   : > { %2931 = vst.msk [vmem:[#allocation10 + $0x18] sm:$0xf] %vm2927_vm4, %v2922_v32  ;;  %v4586_v32 = vld [vmem:[%s6210_s8 + $0x20] sm:$0xff]  }
 0x9eb   : > { %v5976_v36 = vld [vmem:[#allocation10 + $0x10] sm:$0xff]  ;;  %v3489_v19 = vpop.permute.xlu0 %3488  ;;  %v3184_v38 = vpop.permute.xlu1 %3183 }
 0x9ec   : > { %3426 = vst.msk [vmem:[#allocation10 + $0x10] sm:$0xf] %vm2691_vm14, %v3422_v62  ;;  %3604 = vst.msk [vmem:[#allocation10 + $0x14] sm:$0xf] %vm2691_vm14, %v3600_v24  ;;  %v4584_v24 = vld [vmem:[%s6210_s8 + $0x40] sm:$0xff]  }
 0x9ed   : > { %3450 = vst.msk [vmem:[#allocation10 + $0x10] sm:$0xf] %vm2777_vm15, %v5753_v33  ;;  %v2948_v33 = vcombine.low %v5852_v51, %v5893_v30  ;;  %v4572_v51 = vld [vmem:[%s6210_s8 + $0x8] sm:$0xff]  }
 0x9ee   : > { %3474 = vst.msk [vmem:[#allocation10 + $0x10] sm:$0xf] %vm2802_vm0, %v3465_v29 }
 0x9ef   : > { %v2943_v25 = vld [vmem:[#allocation10 + $0x18] sm:$0xff]  ;;  %3498 = vst.msk [vmem:[#allocation10 + $0x10] sm:$0xf] %vm2827_vm12, %v3489_v19  ;;  %v3513_v39 = vpop.permute.xlu0 %3512  ;;  %v3232_v28 = vpop.permute.xlu1 %3231  ;;  %v3931_v19 = vld [vmem:[#allocation9 + $0x22] sm:$0xf] }
 0x9f0   : > { %3096 = vst.msk [vmem:[#allocation10 + $0x18] sm:$0xf] %vm2691_vm14, %v3092_v20  ;;  %3272 = vst.msk [vmem:[#allocation10 + $0x1c] sm:$0xf] %vm2691_vm14, %v3268_v49  ;;  %v2951_v56 = vcombine.high %v2942_v14, %v2943_v25  ;;  %v2950_v52 = vcombine.low %v2942_v14, %v2943_v25 }
 0x9f1   : > { %3522 = vst.msk [vmem:[#allocation10 + $0x10] sm:$0xf] %vm2852_vm1, %v3513_v39 }
 0x9f2   : > { %3120 = vst.msk [vmem:[#allocation10 + $0x18] sm:$0xf] %vm2777_vm15, %v5885_v22  ;;  %v2957_v60 = vpack.c.bf16 %v2951_v56, %v2949_v42  ;;  %v2956_v31 = vpack.c.bf16 %v2950_v52, %v2948_v33  ;;  %v4587_v42 = vld [vmem:[%s6210_s8 + $0x28] sm:$0xff]  }
 0x9f3   : > { %3144 = vst.msk [vmem:[#allocation10 + $0x18] sm:$0xf] %vm2802_vm0, %v5896_v35  ;;  %v3537_v0 = vpop.permute.xlu0 %3536  ;;  %v3256_v2 = vpop.permute.xlu1 %3255 }
 0x9f4   : > { %3168 = vst.msk [vmem:[#allocation10 + $0x18] sm:$0xf] %vm2827_vm12, %v5745_v27  ;;  %4308 = vmatprep.mubr.msk.bf16.mxu1 %vm3037_vm5, %v2957_v60 }
 0x9f5   : > { %3192 = vst.msk [vmem:[#allocation10 + $0x18] sm:$0xf] %vm2852_vm1, %v3184_v38  ;;  %3074 = vmatmul.mubr.bf16.vlgmr.msra.gmra.mrb[4].mxu1 %v2956_v31  ;;  %v3755_v38 = vld [vmem:[#allocation9 + $0x19] sm:$0xf]  ;;  %v4589_v31 = vld [vmem:[%s6210_s8 + $0x38] sm:$0xff]  }
 0x9f6   : > { %3546 = vst.msk [vmem:[#allocation10 + $0x10] sm:$0xf] %vm2877_vm2, %v3537_v0  ;;  %3216 = vst.msk [vmem:[#allocation10 + $0x18] sm:$0xf] %vm2877_vm2, %v5757_v34  ;;  %3707 = vmatpush1.bf16.msra.mxu1 %v4570_v63  ;;  %v4574_v34 = vld [vmem:[%s6210_s8 + $0x10] sm:$0xff]  }
 0x9f7   : > { %3240 = vst.msk [vmem:[#allocation10 + $0x18] sm:$0xf] %vm2902_vm3, %v3232_v28  ;;  %v3558_v27 = vpop.permute.xlu0 %3557  ;;  %v3467_v22 = vpop.permute.xlu1 %3466  ;;  %3708 = vmatprep.subr.bf16.mxu1 %v4680_v7 }
 0x9f8   : > { %3264 = vst.msk [vmem:[#allocation10 + $0x18] sm:$0xf] %vm2927_vm4, %v3256_v2  ;;  %v4590_v2 = vld [vmem:[%s6210_s8 + $0x40] sm:$0xff]  }
 0x9f9   : > { %3569 = vst.msk [vmem:[#allocation10] sm:$0xf] %vm2902_vm3, %v3558_v27 }
 0x9fa   : > { %3594 = vst.msk [vmem:[#allocation10] sm:$0xf] %vm2927_vm4, %v5768_v46  ;;  %3709 = vmatpush1.bf16.msra.mxu1 %v4572_v51 }
 0x9fb   : > { %v6017_v30 = vpop.permute.xlu0 %3773  ;;  %v3491_v35 = vpop.permute.xlu1 %3490  ;;  %3710 = vmatprep.subr.bf16.mxu1 %v4680_v7 }
 0x9fe   : > { %3711 = vmatpush1.bf16.msra.mxu1 %v4574_v34 }
 0x9ff   : > { %v3276_v8 = vld [vmem:[#allocation10 + $0x18] sm:$0xff]  ;;  %v6024_v46 = vpop.permute.xlu0 %3821  ;;  %v3515_v59 = vpop.permute.xlu1 %3514  ;;  %3712 = vmatprep.subr.bf16.mxu1 %v4680_v7 }
 0xa00   : > { %3427 = vst.msk [vmem:[#allocation10 + $0x18] sm:$0xf] %vm2691_vm14, %v3423_v6  ;;  %v3284_v43 = vcombine.high %v5976_v36, %v3276_v8  ;;  %v3283_v5 = vcombine.low %v5976_v36, %v3276_v8  ;;  %3605 = vst.msk [vmem:[#allocation10 + $0x1c] sm:$0xf] %vm2691_vm14, %v3601_v1 }
 0xa01   : > { %3451 = vst.msk [vmem:[#allocation10 + $0x18] sm:$0xf] %vm2777_vm15, %v5772_v48  ;;  %v6036_v12 = vld [vmem:[#allocation10] sm:$0xff]  ;;  %v4577_v48 = vld [vmem:[%s6210_s8 + $0x20] sm:$0xff]  }
 0xa02   : > { %3757 = vst.msk [vmem:[#allocation10] sm:$0xf] %vm2691_vm14, %v3753_v53  ;;  %3933 = vst.msk [vmem:[#allocation10 + $0x4] sm:$0xf] %vm2691_vm14, %v3929_v9  ;;  %v3290_v14 = vpack.c.bf16 %v3284_v43, %v3282_v41  ;;  %v3289_v15 = vpack.c.bf16 %v3283_v5, %v3281_v11  ;;  %3713 = vmatpush1.bf16.msra.mxu1 %v4576_v58  ;;  %v3615_v20 = vcombine.high %v6036_v12, %v5948_v10  ;;  %v3082_v58 = vld [vmem:[%s4791_s26] sm:$0xff]  ;;  %v3083_v43 = vld [vmem:[%s4791_s26 + $0x8] sm:$0xff] }
 0xa03   : > { %3475 = vst.msk [vmem:[#allocation10 + $0x18] sm:$0xf] %vm2802_vm0, %v3467_v22  ;;  %v6053_v44 = vpop.permute.xlu0 %3845  ;;  %v3539_v16 = vpop.permute.xlu1 %3538  ;;  %3714 = vmatprep.subr.bf16.mxu1 %v4680_v7  ;;  %v3614_v39 = vcombine.low %v6036_v12, %v5948_v10 }
 0xa04   : > { %3781 = vst.msk [vmem:[#allocation10] sm:$0xf] %vm2777_vm15, %v5909_v37  ;;  %4319 = vmatprep.mubr.msk.bf16.mxu0 %vm3037_vm5, %v3290_v14  ;;  %v4578_v37 = vld [vmem:[%s6210_s8 + $0x28] sm:$0xff]   ;;  %v3414_v14 = vld [vmem:[%s4791_s26 + $0x10] sm:$0xff] }
 0xa05   : > { %3499 = vst.msk [vmem:[#allocation10 + $0x18] sm:$0xf] %vm2827_vm12, %v3491_v35  ;;  %3406 = vmatmul.mubr.bf16.vlgmr.msra.gmra.mrb[8].mxu0 %v3289_v15 }
 0xa06   : > { %3805 = vst.msk [vmem:[#allocation10] sm:$0xf] %vm2802_vm0, %v5702_v4  ;;  %4038 = vmatpush1.bf16.msra.mxu0 %v4579_v18  ;;  %v4581_v4 = vld [vmem:[%s6210_s8 + $0x8] sm:$0xff]   ;;  %3715 = vmatpush1.bf16.msra.mxu1 %v4577_v48 }
 0xa07   : > { %3523 = vst.msk [vmem:[#allocation10 + $0x18] sm:$0xf] %vm2852_vm1, %v3515_v59  ;;  %4039 = vmatprep.subr.bf16.mxu0 %v4680_v7  ;;  %3716 = vmatprep.subr.bf16.mxu1 %v4680_v7 }
 0xa08   : > { %3829 = vst.msk [vmem:[#allocation10] sm:$0xf] %vm2827_vm12, %v5917_v47  ;;  %v6075_v47 = vpop.permute.xlu0 %3869 }
 0xa09   : > { %3547 = vst.msk [vmem:[#allocation10 + $0x18] sm:$0xf] %vm2877_vm2, %v3539_v16  ;;  %v4591_v22 = vld [vmem:[#allocation10 + $0x4] ss:$8 sps:$4 sm:$0xff]  }
 0xa0a   : > { %3853 = vst.msk [vmem:[#allocation10] sm:$0xf] %vm2852_vm1, %v5921_v50  ;;  %4040 = vmatpush1.bf16.msra.mxu0 %v4581_v4  ;;  %v4583_v50 = vld [vmem:[%s6210_s8 + $0x10] sm:$0xff]   ;;  %3717 = vmatpush1.bf16.msra.mxu1 %v4578_v37 }
 0xa0b   : > { %3572 = vst.msk [vmem:[#allocation10 + $0x18] sm:$0xf] %vm2902_vm3, %v5626_v57  ;;  %v3892_v57 = vpop.permute.xlu1 %3891  ;;  %4041 = vmatprep.subr.bf16.mxu0 %v4680_v7  ;;  %3718 = vmatprep.subr.bf16.mxu1 %v4680_v7 }
 0xa0c   : > { %3877 = vst.msk [vmem:[#allocation10] sm:$0xf] %vm2877_vm2, %v5926_v54  ;;  %v3562_v54 = vpop.permute.xlu0 %3561 }
 0xa0d   : > { %3597 = vst.msk [vmem:[#allocation10 + $0x18] sm:$0xf] %vm2927_vm4, %v5630_v61  ;;  %v4580_v61 = vld [vmem:[%s6210_s8 + $0x30] sm:$0xff]  }
 0xa0e   : > { %3902 = vst.msk [vmem:[#allocation10 + $0x8] sm:$0xf] %vm2902_vm3, %v3892_v57  ;;  %3571 = vst.msk [vmem:[#allocation10 + $0x10] sm:$0xf] %vm2902_vm3, %v3562_v54  ;;  %4042 = vmatpush1.bf16.msra.mxu0 %v4583_v50  ;;  %3719 = vmatpush1.bf16.msra.mxu1 %v4580_v61  ;;  %v3747_v50 = vld [vmem:[%s4791_s26 + $0x20] sm:$0xff] }
 0xa0f   : > { %v6086_v13 = vpop.permute.xlu1 %3895  ;;  %3596 = vst.msk [vmem:[#allocation10 + $0x10] sm:$0xf] %vm2927_vm4, %v5804_v3  ;;  %4043 = vmatprep.subr.bf16.mxu0 %v4680_v7  ;;  %3720 = vmatprep.subr.bf16.mxu1 %v4680_v7 }
 0xa10   : > { %v3890_v29 = vpop.permute.xlu0 %3889 }
 0xa11   : > { %3901 = vst.msk [vmem:[#allocation10] sm:$0xf] %vm2902_vm3, %v3890_v29 }
 0xa12   : > { %4044 = vmatpush1.bf16.msra.mxu0 %v4585_v26  ;;  %3721 = vmatpush1.bf16.msra.mxu1 %v4582_v17 }
 0xa13   : > { %v3916_v3 = vpop.permute.xlu1 %3915  ;;  %4045 = vmatprep.subr.bf16.mxu0 %v4680_v7  ;;  %3722 = vmatprep.subr.bf16.mxu1 %v4680_v7 }
 0xa14   : > { %v3609_v40 = vld [vmem:[#allocation10 + $0x18] sm:$0xff]  ;;  %3926 = vst.msk [vmem:[#allocation10 + $0x8] sm:$0xf] %vm2927_vm4, %v3916_v3  ;;  %v3894_v62 = vpop.permute.xlu0 %3893  ;;  %v4078_v3 = vld [vmem:[%s4791_s26 + $0x30] sm:$0xff] }
 0xa15   : > { %3760 = vst.msk [vmem:[#allocation10 + $0x18] sm:$0xf] %vm2691_vm14, %v3756_v23  ;;  %3936 = vst.msk [vmem:[#allocation10 + $0x1c] sm:$0xf] %vm2691_vm14, %v3932_v21  ;;  %v3748_v21 = vld [vmem:[%s4791_s26 + $0x28] sm:$0xff] }
 0xa16   : > { %v3608_v49 = vld [vmem:[#allocation10 + $0x10] sm:$0xff]  ;;  %4046 = vmatpush1.bf16.msra.mxu0 %v4586_v32  ;;  %3723 = vmatpush1.bf16.msra.mxu1 %v4584_v24 }
 0xa17   : > { %v3776_v36 = vpop.permute.xlu1 %3775  ;;  %3759 = vst.msk [vmem:[#allocation10 + $0x10] sm:$0xf] %vm2691_vm14, %v3755_v38  ;;  %3935 = vst.msk [vmem:[#allocation10 + $0x14] sm:$0xf] %vm2691_vm14, %v3931_v19  ;;  %v3617_v25 = vcombine.high %v3608_v49, %v3609_v40  ;;  %v3616_v28 = vcombine.low %v3608_v49, %v3609_v40  ;;  %4047 = vmatprep.subr.bf16.mxu0 %v4680_v7 }
 0xa18   : > { %3784 = vst.msk [vmem:[#allocation10 + $0x18] sm:$0xf] %vm2777_vm15, %v3776_v36  ;;  %3783 = vst.msk [vmem:[#allocation10 + $0x10] sm:$0xf] %vm2777_vm15, %v6017_v30  ;;  %v4079_v36 = vld [vmem:[%s4791_s26 + $0x38] sm:$0xff] }
 0xa19   : > { %3808 = vst.msk [vmem:[#allocation10 + $0x18] sm:$0xf] %vm2802_vm0, %v5792_v55  ;;  %3807 = vst.msk [vmem:[#allocation10 + $0x10] sm:$0xf] %vm2802_vm0, %v5782_v45  ;;  %v3914_v55 = vpop.permute.xlu0 %3913  ;;  %v3623_v33 = vpack.c.bf16 %v3617_v25, %v3615_v20  ;;  %v3622_v52 = vpack.c.bf16 %v3616_v28, %v3614_v39  ;;  %v4588_v45 = vld [vmem:[%s6210_s8 + $0x30] sm:$0xff]  }
 0xa1a   : > { %3831 = vst.msk [vmem:[#allocation10 + $0x10] sm:$0xf] %vm2827_vm12, %v6024_v46  ;;  %4048 = vmatpush1.bf16.msra.mxu0 %v4587_v42 }
 0xa1b   : > { %v3824_v56 = vpop.permute.xlu1 %3823  ;;  %3925 = vst.msk [vmem:[#allocation10] sm:$0xf] %vm2927_vm4, %v3914_v55  ;;  %4330 = vmatprep.mubr.msk.bf16.mxu1 %vm3037_vm5, %v3623_v33  ;;  %4049 = vmatprep.subr.bf16.mxu0 %v4680_v7 }
 0xa1c   : > { %3832 = vst.msk [vmem:[#allocation10 + $0x18] sm:$0xf] %vm2827_vm12, %v3824_v56  ;;  %3739 = vmatmul.mubr.bf16.vlgmr.msra.gmra.mrb[8].mxu1 %v3622_v52 }
 0xa1d   : > { %3855 = vst.msk [vmem:[#allocation10 + $0x10] sm:$0xf] %vm2852_vm1, %v6053_v44  ;;  %v3918_v10 = vpop.permute.xlu0 %3917  ;;  %v3415_v44 = vld [vmem:[%s4791_s26 + $0x18] sm:$0xff] }
 0xa1e   : > { %3879 = vst.msk [vmem:[#allocation10 + $0x10] sm:$0xf] %vm2877_vm2, %v6075_v47  ;;  %4050 = vmatpush1.bf16.msra.mxu0 %v4588_v45  ;;  %v4593_v30 = vld [vmem:[#allocation10 + $0x14] ss:$8 sps:$4 sm:$0xff]  }
 0xa1f   : > { %3903 = vst.msk [vmem:[#allocation10 + $0x10] sm:$0xf] %vm2902_vm3, %v3894_v62  ;;  %v3848_v60 = vpop.permute.xlu1 %3847  ;;  %4051 = vmatprep.subr.bf16.mxu0 %v4680_v7  ;;  %v3954_v1 = vpack.c.bf16 %v4593_v30, %v4591_v22 }
 0xa20   : > { %3927 = vst.msk [vmem:[#allocation10 + $0x10] sm:$0xf] %vm2927_vm4, %v3918_v10 }
 0xa21   : > { %3856 = vst.msk [vmem:[#allocation10 + $0x18] sm:$0xf] %vm2852_vm1, %v3848_v60  ;;  %v1577_v63 = vpop.permute.xlu0 %1576  ;;  %4341 = vmatprep.mubr.msk.bf16.mxu0 %vm3037_vm5, %v3954_v1 }
 0xa22   : > { %1583 = vst.msk [vmem:[#allocation5] sm:$0xff] %vm1582_vm7, %v1577_v63  ;;  %4052 = vmatpush1.bf16.msra.mxu0 %v4589_v31  ;;  %v4595_v34 = vld [vmem:[#allocation10] ss:$8 sps:$4 sm:$0xff]  }
 0xa23   : > { %v3872_v0 = vpop.permute.xlu1 %3871  ;;  %4053 = vmatprep.subr.bf16.mxu0 %v4680_v7  ;;  %v4298_v7 = vld [vmem:[%s6211_s9] ss:$0 sm:$0xff] }
 0xa24   : > { %3880 = vst.msk [vmem:[#allocation10 + $0x18] sm:$0xf] %vm2877_vm2, %v3872_v0 }
 0xa25   : > { %3904 = vst.msk [vmem:[#allocation10 + $0x18] sm:$0xf] %vm2902_vm3, %v6086_v13 }
 0xa26   : > { %4054 = vmatpush1.bf16.msra.mxu0 %v4590_v2 }
 0xa27   : > { %v3920_v51 = vpop.permute.xlu1 %3919 }
 0xa28   : > { %3928 = vst.msk [vmem:[#allocation10 + $0x18] sm:$0xf] %vm2927_vm4, %v3920_v51 }
 0xa2b   : > { %v1579_v27 = vpop.permute.xlu1 %1578 }
 0xa2c   : > { %1584 = vst.msk [vmem:[#allocation5 + $0x8] sm:$0xff] %vm1582_vm7, %v1579_v27 }
 0xa2f   : > { %v4596_v35 = vld [vmem:[#allocation10 + $0x10] ss:$8 sps:$4 sm:$0xff]  }
 0xa30   : > { %v3953_v6 = vpack.c.bf16 %v4596_v35, %v4595_v34 }
 0xa32   : > { %4070 = vmatmul.mubr.bf16.vlgmr.msra.gmra.mrb[12].mxu0 %v3953_v6 }
 0xac8   : > { %v3075_v8 = vpop.f32.mrb[4].mxu1 }
 0xac9   : > { %v3076_v46 = vadd.f32 %v4298_v7, %v3075_v8  ;;  %v3077_v59 = vpop.f32.mrb[5].mxu1 }
 0xaca   : > { %v3078_v41 = vpop.f32.mrb[6].mxu1 }
 0xacb   : > { %v3084_v11 = vadd.f32 %v3082_v58, %v3076_v46  ;;  %v3079_v5 = vadd.f32 %v4298_v7, %v3078_v41  ;;  %v3080_v9 = vpop.f32.mrb[7].mxu1 }
 0xacd   : > { %3087 = vst.msk [vmem:[%s4791_s26] sm:$0xff] %vm3086_vm8, %v3084_v11  ;;  %v3085_v53 = vadd.f32 %v3083_v43, %v3079_v5 }
 0xacf   : > { %3088 = vst.msk [vmem:[%s4791_s26 + $0x8] sm:$0xff] %vm3086_vm8, %v3085_v53 }
 0xad8   : > { %v3407_v12 = vpop.f32.mrb[8].mxu0 }
 0xad9   : > { %v3408_v15 = vadd.f32 %v4298_v7, %v3407_v12  ;;  %v3409_v18 = vpop.f32.mrb[9].mxu0 }
 0xada   : > { %v3410_v48 = vpop.f32.mrb[10].mxu0 }
 0xadb   : > { %v3416_v16 = vadd.f32 %v3414_v14, %v3408_v15  ;;  %v3411_v4 = vadd.f32 %v4298_v7, %v3410_v48  ;;  %v3412_v37 = vpop.f32.mrb[11].mxu0 }
 0xadd   : > { %3418 = vst.msk [vmem:[%s4791_s26 + $0x10] sm:$0xff] %vm3086_vm8, %v3416_v16  ;;  %v3417_v47 = vadd.f32 %v3415_v44, %v3411_v4 }
 0xadf   : > { %3419 = vst.msk [vmem:[%s4791_s26 + $0x18] sm:$0xff] %vm3086_vm8, %v3417_v47 }
 0xaef   : > { %v3740_v57 = vpop.f32.mrb[8].mxu1 }
 0xaf0   : > { %v3741_v61 = vadd.f32 %v4298_v7, %v3740_v57  ;;  %v3742_v54 = vpop.f32.mrb[9].mxu1 }
 0xaf1   : > { %v3743_v13 = vpop.f32.mrb[10].mxu1 }
 0xaf2   : > { %v3749_v40 = vadd.f32 %v3747_v50, %v3741_v61  ;;  %v3744_v23 = vadd.f32 %v4298_v7, %v3743_v13  ;;  %v3745_v26 = vpop.f32.mrb[11].mxu1 }
 0xaf4   : > { %3751 = vst.msk [vmem:[%s4791_s26 + $0x20] sm:$0xff] %vm3086_vm8, %v3749_v40  ;;  %v3750_v17 = vadd.f32 %v3748_v21, %v3744_v23 }
 0xaf6   : > { %3752 = vst.msk [vmem:[%s4791_s26 + $0x28] sm:$0xff] %vm3086_vm8, %v3750_v17 }
 0xb05   : > { %v4071_v29 = vpop.f32.mrb[12].mxu0 }
 0xb06   : > { %v4072_v32 = vadd.f32 %v4298_v7, %v4071_v29  ;;  %v4073_v24 = vpop.f32.mrb[13].mxu0 }
 0xb07   : > { %v4074_v62 = vpop.f32.mrb[14].mxu0 }
 0xb08   : > { %v4080_v19 = vadd.f32 %v4078_v3, %v4072_v32  ;;  %v4075_v38 = vadd.f32 %v4298_v7, %v4074_v62  ;;  %v4076_v49 = vpop.f32.mrb[15].mxu0 }
 0xb0a   : > { %4082 = vst.msk [vmem:[%s4791_s26 + $0x30] sm:$0xff] %vm3086_vm8, %v4080_v19  ;;  %v4081_v20 = vadd.f32 %v4079_v36, %v4075_v38 }
 0xb0c   : > { %4083 = vst.msk [vmem:[%s4791_s26 + $0x38] sm:$0xff] %vm3086_vm8, %v4081_v20 }
 0xb0d PF: > { %s20_s17 = sadd.s32 1, %s4651_s17   ;;  %s6242_s13 = smov %s4643_s15 }
 0xb0e   : > { %p17_p7 = scmp.ge.s32.totalorder %s20_s17, 6   ;;  %s6243_s14 = smov %s4647_s16 }
 0xb0f   : > { %s6244_s15 = smov %s6247_s18  ;;  %s6245_s16 = smov %s6251_s19 }
 0xb10   :  { %19 = sbr.rel (!%p17_p7) target bundleno = 3 (0x3), region = 112 }

</bundles_post_ra>
